<compile_context>
chip_gen: v5e
topology: v5e:2x2
jax: 0.10.0
libtpu: 0.0.40
codegen_flags: <defaults>
</compile_context>

<pallas_src>
import functools
import math

import jax
import jax.numpy as jnp
from jax.experimental import pallas as pl
from jax.experimental.pallas import tpu as pltpu

# ----------------------------- small BERT config -----------------------------
VOCAB = 100
HIDDEN = 32
NUM_HEADS = 4
HEAD_DIM = HIDDEN // NUM_HEADS
INTERMEDIATE = 64
NUM_LAYERS = 2
MAX_SEQ = 16
LN_EPS = 1e-12
# TODO(synk): torch.distributed.all_gather has no single-device Pallas
# equivalent; with world_size=1 the gather is an identity and the loss is
# multiplied by 1, matching the reference semantics on one process.
WORLD_SIZE = 1


# ------------------------------ in-kernel helpers ------------------------------
def _ln(x, g, b):
    mu = jnp.mean(x, axis=-1, keepdims=True)
    var = jnp.mean(jnp.square(x - mu), axis=-1, keepdims=True)
    return (x - mu) * jax.lax.rsqrt(var + LN_EPS) * g + b


def _gelu(x):
    # TODO(synk): tanh-approx GELU; HF BERT default is exact erf-GELU.
    return 0.5 * x * (1.0 + jnp.tanh(0.7978845608028654 * (x + 0.044715 * x * x * x)))


# ------------------------------- fused encode kernel ---------------------------
def _encoder_kernel(emb_ref, mask_ref, embln_ref, wslab_ref, w2slab_ref,
                    bslab_ref, cls_ref, ctx_ref,
                    *, B2, S, H, NH, HD, I, NL):
    """Whole BERT encode for the row-stacked (query ++ corpus) batch.

    emb_ref:   [B2*S, H] f32    (B2 = 2*B sequences, S tokens each)
    mask_ref:  [B2, S]   f32
    embln_ref: [2, H]    f32    (row 0 = gamma, row 1 = beta)
    wslab_ref: [L, H, 3H + H + I] bf16   (wqkv | wo | w1)
    w2slab_ref:[L, I, H] bf16
    bslab_ref: [L, 1, 9H + I] f32  (bqkv|bo|ln1g|ln1b|b1|b2|ln2g|ln2b)
    cls_ref:   [B2, H]   f32 output
    ctx_ref:   [B2*S, H] f32 VMEM scratch for attention context
    """
    scale = 1.0 / math.sqrt(HD)
    R = B2 * S
    bf16 = jnp.bfloat16

    x = _ln(emb_ref[...], embln_ref[0:1, :], embln_ref[1:2, :])        # [R, H] f32
    kbias = ((1.0 - mask_ref[...]) * -1e9)[:, None, :]                 # [B2, 1, S]

    for l in range(NL):                                # static unroll (NL=2)
        # --- static slab slices (no per-stream DMA bookkeeping) ---
        wqkv = wslab_ref[l, :, 0:3 * H]                # [H, 3H] bf16
        wo = wslab_ref[l, :, 3 * H:4 * H]              # [H, H]
        w1 = wslab_ref[l, :, 4 * H:4 * H + I]          # [H, I]
        w2 = w2slab_ref[l]                             # [I, H]
        bqkv = bslab_ref[l, :, 0:3 * H]                # [1, 3H] f32
        bo = bslab_ref[l, :, 3 * H:4 * H]
        ln1g = bslab_ref[l, :, 4 * H:5 * H]
        ln1b = bslab_ref[l, :, 5 * H:6 * H]
        b1 = bslab_ref[l, :, 6 * H:6 * H + I]
        b2 = bslab_ref[l, :, 6 * H + I:7 * H + I]
        ln2g = bslab_ref[l, :, 7 * H + I:8 * H + I]
        ln2b = bslab_ref[l, :, 8 * H + I:9 * H + I]

        # fused QKV projection: one MXU pass, bf16 operands, f32 accumulate
        qkv = jnp.dot(x.astype(bf16), wqkv,
                      preferred_element_type=jnp.float32) + bqkv       # [R, 3H] f32

        # per-head attention, batched over all B2 sequences per head
        for h in range(NH):
            qh = qkv[:, h * HD:(h + 1) * HD].reshape(B2, S, HD).astype(bf16)
            kh = qkv[:, H + h * HD:H + (h + 1) * HD].reshape(B2, S, HD).astype(bf16)
            vh = qkv[:, 2 * H + h * HD:2 * H + (h + 1) * HD].reshape(B2, S, HD).astype(bf16)
            s = jnp.einsum('bqd,bkd->bqk', qh, kh,
                           preferred_element_type=jnp.float32) * scale + kbias
            s = s - jnp.max(s, axis=-1, keepdims=True)
            p = jnp.exp(s)
            # divide -> EUP reciprocal + VPU multiply (EUP slot otherwise idle)
            p = p * pl.reciprocal(jnp.sum(p, axis=-1, keepdims=True), approx=True)
            ch = jnp.einsum('bqk,bkd->bqd', p.astype(bf16), vh,
                            preferred_element_type=jnp.float32)        # [B2, S, HD]
            ctx_ref[:, h * HD:(h + 1) * HD] = ch.reshape(R, HD)        # no concat

        attn = jnp.dot(ctx_ref[...].astype(bf16), wo,
                       preferred_element_type=jnp.float32) + bo
        x = _ln(x + attn, ln1g, ln1b)                                  # residual fused in LN

        hid = _gelu(jnp.dot(x.astype(bf16), w1,
                            preferred_element_type=jnp.float32) + b1)
        ffn = jnp.dot(hid.astype(bf16), w2,
                      preferred_element_type=jnp.float32) + b2
        x = _ln(x + ffn, ln2g, ln2b)

    # CLS rows: last_hidden_state[:, 0] -> direct per-row stores (no gather)
    for b in range(B2):
        cls_ref[b:b + 1, :] = x[b * S:b * S + 1, :]


def fused_encode(params, emb, mask):
    """emb: [2B*S, H] f32 row-stacked; mask: [2B, S] f32 -> CLS embeddings [2B, H]."""
    B2S, H = emb.shape
    B2, S = mask.shape
    L, I = NUM_LAYERS, INTERMEDIATE

    def cspec(shape):
        z = (0,) * len(shape)
        return pl.BlockSpec(shape, lambda i, _z=z: _z)

    kernel = functools.partial(_encoder_kernel, B2=B2, S=S, H=H,
                               NH=NUM_HEADS, HD=HEAD_DIM, I=I, NL=L)
    return pl.pallas_call(
        kernel,
        grid=(1,),                                   # single step: no sequential re-pass
        in_specs=[
            cspec((B2S, H)),                         # stacked embeddings
            cspec((B2, S)),                          # attention mask
            cspec((2, H)),                           # embedding LN gamma/beta
            cspec((L, H, 4 * H + I)),                # weight slab (wqkv|wo|w1), bf16
            cspec((L, I, H)),                        # w2 slab, bf16
            cspec((L, 1, 9 * H + I)),                # bias / LN slab, f32
        ],
        out_specs=cspec((B2, H)),
        out_shape=jax.ShapeDtypeStruct((B2, H), jnp.float32),
        scratch_shapes=[pltpu.VMEM((B2S, H), jnp.float32)],
        compiler_params=pltpu.CompilerParams(dimension_semantics=("arbitrary",)),
    )(emb, mask, params["emb_ln"], params["wslab"], params["w2"], params["bslab"])


# ------------------------------ parameter setup -------------------------------
def init_params(key):
    k = jax.random.split(key, 7)
    s = 0.02
    L, H, I = NUM_LAYERS, HIDDEN, INTERMEDIATE
    wqkv = s * jax.random.normal(k[3], (L, H, 3 * H), jnp.float32)
    wo = s * jax.random.normal(k[4], (L, H, H), jnp.float32)
    w1 = s * jax.random.normal(k[5], (L, H, I), jnp.float32)
    w2 = s * jax.random.normal(k[6], (L, I, H), jnp.float32)
    # pack weights into slabs (bf16 for MXU + halved DMA bytes); biases/LN stay f32
    wslab = jnp.concatenate([wqkv, wo, w1], axis=-1).astype(jnp.bfloat16)   # [L,H,4H+I]
    bslab = jnp.concatenate([
        jnp.zeros((L, 1, 3 * H)),   # bqkv
        jnp.zeros((L, 1, H)),       # bo
        jnp.ones((L, 1, H)),        # ln1 gamma
        jnp.zeros((L, 1, H)),       # ln1 beta
        jnp.zeros((L, 1, I)),       # b1
        jnp.zeros((L, 1, H)),       # b2
        jnp.ones((L, 1, H)),        # ln2 gamma
        jnp.zeros((L, 1, H)),       # ln2 beta
    ], axis=-1).astype(jnp.float32)                                         # [L,1,9H+I]
    emb_ln = jnp.concatenate([jnp.ones((1, H)), jnp.zeros((1, H))],
                             axis=0).astype(jnp.float32)                    # [2, H]
    return {
        "word_emb": s * jax.random.normal(k[0], (VOCAB, H), jnp.float32),
        "pos_emb": s * jax.random.normal(k[1], (MAX_SEQ, H), jnp.float32),
        "type_emb": s * jax.random.normal(k[2], (2, H), jnp.float32),
        "emb_ln": emb_ln,
        "wslab": wslab,
        "w2": w2.astype(jnp.bfloat16),
        "bslab": bslab,
    }


# ------------------------------- model forward --------------------------------
@jax.jit
def bert_retriever_forward(params, query_input_ids, query_attention_mask,
                           corpus_input_ids, corpus_attention_mask):
    B, S = query_input_ids.shape
    # row-stack query + corpus so one kernel invocation encodes both
    ids = jnp.concatenate([query_input_ids, corpus_input_ids], axis=0)        # [2B, S]
    mask = jnp.concatenate([query_attention_mask, corpus_attention_mask],
                           axis=0).astype(jnp.float32)                        # [2B, S]

    # embedding gather + sums stay in XLA (gather has no clean tiny-Pallas win)
    # TODO(synk): token_type_ids assumed all-zero (index 0) as in the reference usage.
    emb = (jnp.take(params["word_emb"], ids, axis=0)
           + params["pos_emb"][:S][None, :, :]
           + params["type_emb"][0][None, None, :])                            # [2B, S, H]
    emb = emb.reshape(2 * B * S, HIDDEN)

    cls = fused_encode(params, emb, mask)                                     # [2B, H]
    q_emb, c_emb = cls[:B], cls[B:]

    # all_gather across world_size=1 is identity (see TODO at top).
    # Contrastive loss at N=2, H=32 in plain JAX (Pallas launch = pure overhead).
    n = q_emb.shape[0]
    sim1 = q_emb @ c_emb.T                                                    # [N, N]
    sim2 = q_emb @ q_emb.T                                                    # [N, N]
    sim2 = jnp.where(jnp.eye(n, dtype=bool), -jnp.inf, sim2)                  # fill_diagonal_(-inf)
    logits = jnp.concatenate([sim1, sim2], axis=1)                            # [N, 2N]
    lse = jax.scipy.special.logsumexp(logits, axis=-1)
    loss = jnp.mean(lse - jnp.diagonal(sim1)) * WORLD_SIZE
    return (loss,)


# ------------------------------------ main -------------------------------------
if __name__ == "__main__":
    key = jax.random.PRNGKey(0)
    pkey, qkey, ckey = jax.random.split(key, 3)
    params = init_params(pkey)

    B, S = 2, 8
    query_input_ids = jax.random.randint(qkey, (B, S), 0, VOCAB, dtype=jnp.int32)
    corpus_input_ids = jax.random.randint(ckey, (B, S), 0, VOCAB, dtype=jnp.int32)
    query_attention_mask = jnp.ones((B, S), jnp.int32)
    # give the corpus a bit of padding to exercise the attention mask
    corpus_attention_mask = jnp.concatenate(
        [jnp.ones((B, S - 2), jnp.int32), jnp.zeros((B, 2), jnp.int32)], axis=1)

    (loss,) = bert_retriever_forward(params, query_input_ids, query_attention_mask,
                                     corpus_input_ids, corpus_attention_mask)
    jax.block_until_ready(loss)
    assert loss.shape == () and bool(jnp.isfinite(loss))
    print("KERNEL_OK")
</pallas_src>

<mosaic_0001>
module attributes {stable_mosaic.version = 11 : i64} {
  func.func @_encoder_kernel(%arg0: i32, %arg1: memref<32x32xf32, #tpu.memory_space<vmem>>, %arg2: memref<4x8xf32, #tpu.memory_space<vmem>>, %arg3: memref<2x32xf32, #tpu.memory_space<vmem>>, %arg4: memref<2x32x192xbf16, #tpu.memory_space<vmem>>, %arg5: memref<2x64x32xbf16, #tpu.memory_space<vmem>>, %arg6: memref<2x1x352xf32, #tpu.memory_space<vmem>>, %arg7: memref<4x32xf32, #tpu.memory_space<vmem>>, %arg8: memref<32x32xf32, #tpu.memory_space<vmem>>) attributes {dimension_semantics = [#tpu.dimension_semantics<arbitrary>], iteration_bounds = array<i64: 1>, scalar_prefetch = 0 : i64, scratch_operands = 1 : i64, tpu.core_type = #tpu.core_type<tc>, window_params = [{pipeline_mode = #tpu.pipeline_mode<synchronous>, transform_indices = @transform_0, window_bounds = array<i64: 32, 32>}, {pipeline_mode = #tpu.pipeline_mode<synchronous>, transform_indices = @transform_1, window_bounds = array<i64: 4, 8>}, {pipeline_mode = #tpu.pipeline_mode<synchronous>, transform_indices = @transform_2, window_bounds = array<i64: 2, 32>}, {pipeline_mode = #tpu.pipeline_mode<synchronous>, transform_indices = @transform_3, window_bounds = array<i64: 2, 32, 192>}, {pipeline_mode = #tpu.pipeline_mode<synchronous>, transform_indices = @transform_4, window_bounds = array<i64: 2, 64, 32>}, {pipeline_mode = #tpu.pipeline_mode<synchronous>, transform_indices = @transform_5, window_bounds = array<i64: 2, 1, 352>}, {pipeline_mode = #tpu.pipeline_mode<synchronous>, transform_indices = @transform_6, window_bounds = array<i64: 4, 32>}]} {
    %c0 = arith.constant 0 : index
    %c0_0 = arith.constant 0 : index
    %0 = vector.load %arg1[%c0, %c0_0] : memref<32x32xf32, #tpu.memory_space<vmem>>, vector<32x32xf32>
    %c0_1 = arith.constant 0 : index
    %c0_2 = arith.constant 0 : index
    %1 = vector.load %arg3[%c0_1, %c0_2] : memref<2x32xf32, #tpu.memory_space<vmem>>, vector<1x32xf32>
    %c1 = arith.constant 1 : index
    %c0_3 = arith.constant 0 : index
    %2 = vector.load %arg3[%c1, %c0_3] : memref<2x32xf32, #tpu.memory_space<vmem>>, vector<1x32xf32>
    %cst = arith.constant dense<0.000000e+00> : vector<32xf32>
    %3 = vector.multi_reduction <add>, %0, %cst [1] : vector<32x32xf32> to vector<32xf32>
    %4 = vector.shape_cast %3 : vector<32xf32> to vector<32x1xf32>
    %cst_4 = arith.constant 3.200000e+01 : f32
    %5 = vector.broadcast %cst_4 : f32 to vector<32x1xf32>
    %6 = arith.divf %4, %5 : vector<32x1xf32>
    %7 = vector.broadcast %6 : vector<32x1xf32> to vector<32x32xf32>
    %8 = arith.subf %0, %7 : vector<32x32xf32>
    %9 = arith.mulf %8, %8 : vector<32x32xf32>
    %cst_5 = arith.constant dense<0.000000e+00> : vector<32xf32>
    %10 = vector.multi_reduction <add>, %9, %cst_5 [1] : vector<32x32xf32> to vector<32xf32>
    %11 = vector.shape_cast %10 : vector<32xf32> to vector<32x1xf32>
    %cst_6 = arith.constant 3.200000e+01 : f32
    %12 = vector.broadcast %cst_6 : f32 to vector<32x1xf32>
    %13 = arith.divf %11, %12 : vector<32x1xf32>
    %14 = vector.broadcast %6 : vector<32x1xf32> to vector<32x32xf32>
    %15 = arith.subf %0, %14 : vector<32x32xf32>
    %cst_7 = arith.constant 9.99999996E-13 : f32
    %16 = vector.broadcast %cst_7 : f32 to vector<32x1xf32>
    %17 = arith.addf %13, %16 : vector<32x1xf32>
    %18 = math.rsqrt %17 : vector<32x1xf32>
    %19 = vector.broadcast %18 : vector<32x1xf32> to vector<32x32xf32>
    %20 = arith.mulf %15, %19 : vector<32x32xf32>
    %21 = vector.broadcast %1 : vector<1x32xf32> to vector<32x32xf32>
    %22 = arith.mulf %20, %21 : vector<32x32xf32>
    %23 = vector.broadcast %2 : vector<1x32xf32> to vector<32x32xf32>
    %24 = arith.addf %22, %23 : vector<32x32xf32>
    %c0_8 = arith.constant 0 : index
    %c0_9 = arith.constant 0 : index
    %25 = vector.load %arg2[%c0_8, %c0_9] : memref<4x8xf32, #tpu.memory_space<vmem>>, vector<4x8xf32>
    %cst_10 = arith.constant 1.000000e+00 : f32
    %26 = vector.broadcast %cst_10 : f32 to vector<4x8xf32>
    %27 = arith.subf %26, %25 : vector<4x8xf32>
    %cst_11 = arith.constant -1.000000e+09 : f32
    %28 = vector.broadcast %cst_11 : f32 to vector<4x8xf32>
    %29 = arith.mulf %27, %28 : vector<4x8xf32>
    %30 = vector.shape_cast %29 : vector<4x8xf32> to vector<4x1x8xf32>
    %c0_12 = arith.constant 0 : index
    %c0_13 = arith.constant 0 : index
    %c0_14 = arith.constant 0 : index
    %31 = vector.load %arg4[%c0_12, %c0_13, %c0_14] : memref<2x32x192xbf16, #tpu.memory_space<vmem>>, vector<1x32x96xbf16>
    %32 = vector.shape_cast %31 : vector<1x32x96xbf16> to vector<32x96xbf16>
    %c0_15 = arith.constant 0 : index
    %c0_16 = arith.constant 0 : index
    %c96 = arith.constant 96 : index
    %33 = vector.load %arg4[%c0_15, %c0_16, %c96] : memref<2x32x192xbf16, #tpu.memory_space<vmem>>, vector<1x32x32xbf16>
    %34 = vector.shape_cast %33 : vector<1x32x32xbf16> to vector<32x32xbf16>
    %c0_17 = arith.constant 0 : index
    %c0_18 = arith.constant 0 : index
    %c128 = arith.constant 128 : index
    %35 = vector.load %arg4[%c0_17, %c0_18, %c128] : memref<2x32x192xbf16, #tpu.memory_space<vmem>>, vector<1x32x64xbf16>
    %36 = vector.shape_cast %35 : vector<1x32x64xbf16> to vector<32x64xbf16>
    %c0_19 = arith.constant 0 : index
    %c0_20 = arith.constant 0 : index
    %c0_21 = arith.constant 0 : index
    %37 = vector.load %arg5[%c0_19, %c0_20, %c0_21] : memref<2x64x32xbf16, #tpu.memory_space<vmem>>, vector<1x64x32xbf16>
    %38 = vector.shape_cast %37 : vector<1x64x32xbf16> to vector<64x32xbf16>
    %c0_22 = arith.constant 0 : index
    %c0_23 = arith.constant 0 : index
    %c0_24 = arith.constant 0 : index
    %39 = vector.load %arg6[%c0_22, %c0_23, %c0_24] : memref<2x1x352xf32, #tpu.memory_space<vmem>>, vector<1x1x96xf32>
    %40 = vector.shape_cast %39 : vector<1x1x96xf32> to vector<1x96xf32>
    %c0_25 = arith.constant 0 : index
    %c0_26 = arith.constant 0 : index
    %c96_27 = arith.constant 96 : index
    %41 = vector.load %arg6[%c0_25, %c0_26, %c96_27] : memref<2x1x352xf32, #tpu.memory_space<vmem>>, vector<1x1x32xf32>
    %42 = vector.shape_cast %41 : vector<1x1x32xf32> to vector<1x32xf32>
    %c0_28 = arith.constant 0 : index
    %c0_29 = arith.constant 0 : index
    %c128_30 = arith.constant 128 : index
    %43 = vector.load %arg6[%c0_28, %c0_29, %c128_30] : memref<2x1x352xf32, #tpu.memory_space<vmem>>, vector<1x1x32xf32>
    %44 = vector.shape_cast %43 : vector<1x1x32xf32> to vector<1x32xf32>
    %c0_31 = arith.constant 0 : index
    %c0_32 = arith.constant 0 : index
    %c160 = arith.constant 160 : index
    %45 = vector.load %arg6[%c0_31, %c0_32, %c160] : memref<2x1x352xf32, #tpu.memory_space<vmem>>, vector<1x1x32xf32>
    %46 = vector.shape_cast %45 : vector<1x1x32xf32> to vector<1x32xf32>
    %c0_33 = arith.constant 0 : index
    %c0_34 = arith.constant 0 : index
    %c192 = arith.constant 192 : index
    %47 = vector.load %arg6[%c0_33, %c0_34, %c192] : memref<2x1x352xf32, #tpu.memory_space<vmem>>, vector<1x1x64xf32>
    %48 = vector.shape_cast %47 : vector<1x1x64xf32> to vector<1x64xf32>
    %c0_35 = arith.constant 0 : index
    %c0_36 = arith.constant 0 : index
    %c256 = arith.constant 256 : index
    %49 = vector.load %arg6[%c0_35, %c0_36, %c256] : memref<2x1x352xf32, #tpu.memory_space<vmem>>, vector<1x1x32xf32>
    %50 = vector.shape_cast %49 : vector<1x1x32xf32> to vector<1x32xf32>
    %c0_37 = arith.constant 0 : index
    %c0_38 = arith.constant 0 : index
    %c288 = arith.constant 288 : index
    %51 = vector.load %arg6[%c0_37, %c0_38, %c288] : memref<2x1x352xf32, #tpu.memory_space<vmem>>, vector<1x1x32xf32>
    %52 = vector.shape_cast %51 : vector<1x1x32xf32> to vector<1x32xf32>
    %c0_39 = arith.constant 0 : index
    %c0_40 = arith.constant 0 : index
    %c320 = arith.constant 320 : index
    %53 = vector.load %arg6[%c0_39, %c0_40, %c320] : memref<2x1x352xf32, #tpu.memory_space<vmem>>, vector<1x1x32xf32>
    %54 = vector.shape_cast %53 : vector<1x1x32xf32> to vector<1x32xf32>
    %55 = arith.truncf %24 : vector<32x32xf32> to vector<32x32xbf16>
    %cst_41 = arith.constant dense<0.000000e+00> : vector<32x96xf32>
    %56 = tpu.matmul %55, %32, %cst_41 {dimension_numbers = #tpu.dot_dimension_numbers<[1], [0], [0], [1], [0, 0, 1, 1], [], []>} : vector<32x32xbf16>, vector<32x96xbf16>, vector<32x96xf32> -> vector<32x96xf32>
    %57 = vector.broadcast %40 : vector<1x96xf32> to vector<32x96xf32>
    %58 = arith.addf %56, %57 : vector<32x96xf32>
    %59 = vector.extract_strided_slice %58 {offsets = [0, 0], sizes = [32, 8], strides = [1, 1]} : vector<32x96xf32> to vector<32x8xf32>
    %60 = vector.shape_cast %59 : vector<32x8xf32> to vector<4x8x8xf32>
    %61 = arith.truncf %60 : vector<4x8x8xf32> to vector<4x8x8xbf16>
    %62 = vector.extract_strided_slice %58 {offsets = [0, 32], sizes = [32, 8], strides = [1, 1]} : vector<32x96xf32> to vector<32x8xf32>
    %63 = vector.shape_cast %62 : vector<32x8xf32> to vector<4x8x8xf32>
    %64 = arith.truncf %63 : vector<4x8x8xf32> to vector<4x8x8xbf16>
    %65 = vector.extract_strided_slice %58 {offsets = [0, 64], sizes = [32, 8], strides = [1, 1]} : vector<32x96xf32> to vector<32x8xf32>
    %66 = vector.shape_cast %65 : vector<32x8xf32> to vector<4x8x8xf32>
    %67 = arith.truncf %66 : vector<4x8x8xf32> to vector<4x8x8xbf16>
    "tpu.trace_start"() <{level = 10 : i32, message = "bqd,bkd->bqk"}> : () -> ()
    %cst_42 = arith.constant dense<0.000000e+00> : vector<4x8x8xf32>
    %68 = tpu.matmul %61, %64, %cst_42 {dimension_numbers = #tpu.dot_dimension_numbers<[2], [2], [1], [1], [0, 0, 0, 1, 1, 1], [0], [0]>} : vector<4x8x8xbf16>, vector<4x8x8xbf16>, vector<4x8x8xf32> -> vector<4x8x8xf32>
    "tpu.trace_stop"() : () -> ()
    %cst_43 = arith.constant 0.353553385 : f32
    %69 = vector.broadcast %cst_43 : f32 to vector<4x8x8xf32>
    %70 = arith.mulf %68, %69 : vector<4x8x8xf32>
    %71 = vector.broadcast %30 : vector<4x1x8xf32> to vector<4x8x8xf32>
    %72 = arith.addf %70, %71 : vector<4x8x8xf32>
    %cst_44 = arith.constant dense<0xFF800000> : vector<4x8xf32>
    %73 = vector.multi_reduction <maximumf>, %72, %cst_44 [2] : vector<4x8x8xf32> to vector<4x8xf32>
    %74 = vector.shape_cast %73 : vector<4x8xf32> to vector<4x8x1xf32>
    %75 = vector.broadcast %74 : vector<4x8x1xf32> to vector<4x8x8xf32>
    %76 = arith.subf %72, %75 : vector<4x8x8xf32>
    %77 = math.exp %76 : vector<4x8x8xf32>
    %cst_45 = arith.constant dense<0.000000e+00> : vector<4x8xf32>
    %78 = vector.multi_reduction <add>, %77, %cst_45 [2] : vector<4x8x8xf32> to vector<4x8xf32>
    %79 = vector.shape_cast %78 : vector<4x8xf32> to vector<4x8x1xf32>
    %80 = tpu.reciprocal %79 {approx = true} : vector<4x8x1xf32> -> vector<4x8x1xf32>
    %81 = vector.broadcast %80 : vector<4x8x1xf32> to vector<4x8x8xf32>
    %82 = arith.mulf %77, %81 : vector<4x8x8xf32>
    %83 = arith.truncf %82 : vector<4x8x8xf32> to vector<4x8x8xbf16>
    "tpu.trace_start"() <{level = 10 : i32, message = "bqk,bkd->bqd"}> : () -> ()
    %cst_46 = arith.constant dense<0.000000e+00> : vector<4x8x8xf32>
    %84 = tpu.matmul %83, %67, %cst_46 {dimension_numbers = #tpu.dot_dimension_numbers<[2], [1], [1], [2], [0, 0, 0, 1, 1, 2], [0], [0]>} : vector<4x8x8xbf16>, vector<4x8x8xbf16>, vector<4x8x8xf32> -> vector<4x8x8xf32>
    "tpu.trace_stop"() : () -> ()
    %85 = vector.shape_cast %84 : vector<4x8x8xf32> to vector<32x8xf32>
    %c0_47 = arith.constant 0 : index
    %c0_48 = arith.constant 0 : index
    %86 = vector.load %arg8[%c0_47, %c0_48] : memref<32x32xf32, #tpu.memory_space<vmem>>, vector<32x8xf32>
    tpu.vector_store %arg8[%c0_47, %c0_48], %85 {strides = array<i32>} : memref<32x32xf32, #tpu.memory_space<vmem>>, vector<32x8xf32>,
    %87 = vector.extract_strided_slice %58 {offsets = [0, 8], sizes = [32, 8], strides = [1, 1]} : vector<32x96xf32> to vector<32x8xf32>
    %88 = vector.shape_cast %87 : vector<32x8xf32> to vector<4x8x8xf32>
    %89 = arith.truncf %88 : vector<4x8x8xf32> to vector<4x8x8xbf16>
    %90 = vector.extract_strided_slice %58 {offsets = [0, 40], sizes = [32, 8], strides = [1, 1]} : vector<32x96xf32> to vector<32x8xf32>
    %91 = vector.shape_cast %90 : vector<32x8xf32> to vector<4x8x8xf32>
    %92 = arith.truncf %91 : vector<4x8x8xf32> to vector<4x8x8xbf16>
    %93 = vector.extract_strided_slice %58 {offsets = [0, 72], sizes = [32, 8], strides = [1, 1]} : vector<32x96xf32> to vector<32x8xf32>
    %94 = vector.shape_cast %93 : vector<32x8xf32> to vector<4x8x8xf32>
    %95 = arith.truncf %94 : vector<4x8x8xf32> to vector<4x8x8xbf16>
    "tpu.trace_start"() <{level = 10 : i32, message = "bqd,bkd->bqk"}> : () -> ()
    %cst_49 = arith.constant dense<0.000000e+00> : vector<4x8x8xf32>
    %96 = tpu.matmul %89, %92, %cst_49 {dimension_numbers = #tpu.dot_dimension_numbers<[2], [2], [1], [1], [0, 0, 0, 1, 1, 1], [0], [0]>} : vector<4x8x8xbf16>, vector<4x8x8xbf16>, vector<4x8x8xf32> -> vector<4x8x8xf32>
    "tpu.trace_stop"() : () -> ()
    %cst_50 = arith.constant 0.353553385 : f32
    %97 = vector.broadcast %cst_50 : f32 to vector<4x8x8xf32>
    %98 = arith.mulf %96, %97 : vector<4x8x8xf32>
    %99 = vector.broadcast %30 : vector<4x1x8xf32> to vector<4x8x8xf32>
    %100 = arith.addf %98, %99 : vector<4x8x8xf32>
    %cst_51 = arith.constant dense<0xFF800000> : vector<4x8xf32>
    %101 = vector.multi_reduction <maximumf>, %100, %cst_51 [2] : vector<4x8x8xf32> to vector<4x8xf32>
    %102 = vector.shape_cast %101 : vector<4x8xf32> to vector<4x8x1xf32>
    %103 = vector.broadcast %102 : vector<4x8x1xf32> to vector<4x8x8xf32>
    %104 = arith.subf %100, %103 : vector<4x8x8xf32>
    %105 = math.exp %104 : vector<4x8x8xf32>
    %cst_52 = arith.constant dense<0.000000e+00> : vector<4x8xf32>
    %106 = vector.multi_reduction <add>, %105, %cst_52 [2] : vector<4x8x8xf32> to vector<4x8xf32>
    %107 = vector.shape_cast %106 : vector<4x8xf32> to vector<4x8x1xf32>
    %108 = tpu.reciprocal %107 {approx = true} : vector<4x8x1xf32> -> vector<4x8x1xf32>
    %109 = vector.broadcast %108 : vector<4x8x1xf32> to vector<4x8x8xf32>
    %110 = arith.mulf %105, %109 : vector<4x8x8xf32>
    %111 = arith.truncf %110 : vector<4x8x8xf32> to vector<4x8x8xbf16>
    "tpu.trace_start"() <{level = 10 : i32, message = "bqk,bkd->bqd"}> : () -> ()
    %cst_53 = arith.constant dense<0.000000e+00> : vector<4x8x8xf32>
    %112 = tpu.matmul %111, %95, %cst_53 {dimension_numbers = #tpu.dot_dimension_numbers<[2], [1], [1], [2], [0, 0, 0, 1, 1, 2], [0], [0]>} : vector<4x8x8xbf16>, vector<4x8x8xbf16>, vector<4x8x8xf32> -> vector<4x8x8xf32>
    "tpu.trace_stop"() : () -> ()
    %113 = vector.shape_cast %112 : vector<4x8x8xf32> to vector<32x8xf32>
    %c0_54 = arith.constant 0 : index
    %c8 = arith.constant 8 : index
    %114 = vector.load %arg8[%c0_54, %c8] : memref<32x32xf32, #tpu.memory_space<vmem>>, vector<32x8xf32>
    tpu.vector_store %arg8[%c0_54, %c8], %113 {strides = array<i32>} : memref<32x32xf32, #tpu.memory_space<vmem>>, vector<32x8xf32>,
    %115 = vector.extract_strided_slice %58 {offsets = [0, 16], sizes = [32, 8], strides = [1, 1]} : vector<32x96xf32> to vector<32x8xf32>
    %116 = vector.shape_cast %115 : vector<32x8xf32> to vector<4x8x8xf32>
    %117 = arith.truncf %116 : vector<4x8x8xf32> to vector<4x8x8xbf16>
    %118 = vector.extract_strided_slice %58 {offsets = [0, 48], sizes = [32, 8], strides = [1, 1]} : vector<32x96xf32> to vector<32x8xf32>
    %119 = vector.shape_cast %118 : vector<32x8xf32> to vector<4x8x8xf32>
    %120 = arith.truncf %119 : vector<4x8x8xf32> to vector<4x8x8xbf16>
    %121 = vector.extract_strided_slice %58 {offsets = [0, 80], sizes = [32, 8], strides = [1, 1]} : vector<32x96xf32> to vector<32x8xf32>
    %122 = vector.shape_cast %121 : vector<32x8xf32> to vector<4x8x8xf32>
    %123 = arith.truncf %122 : vector<4x8x8xf32> to vector<4x8x8xbf16>
    "tpu.trace_start"() <{level = 10 : i32, message = "bqd,bkd->bqk"}> : () -> ()
    %cst_55 = arith.constant dense<0.000000e+00> : vector<4x8x8xf32>
    %124 = tpu.matmul %117, %120, %cst_55 {dimension_numbers = #tpu.dot_dimension_numbers<[2], [2], [1], [1], [0, 0, 0, 1, 1, 1], [0], [0]>} : vector<4x8x8xbf16>, vector<4x8x8xbf16>, vector<4x8x8xf32> -> vector<4x8x8xf32>
    "tpu.trace_stop"() : () -> ()
    %cst_56 = arith.constant 0.353553385 : f32
    %125 = vector.broadcast %cst_56 : f32 to vector<4x8x8xf32>
    %126 = arith.mulf %124, %125 : vector<4x8x8xf32>
    %127 = vector.broadcast %30 : vector<4x1x8xf32> to vector<4x8x8xf32>
    %128 = arith.addf %126, %127 : vector<4x8x8xf32>
    %cst_57 = arith.constant dense<0xFF800000> : vector<4x8xf32>
    %129 = vector.multi_reduction <maximumf>, %128, %cst_57 [2] : vector<4x8x8xf32> to vector<4x8xf32>
    %130 = vector.shape_cast %129 : vector<4x8xf32> to vector<4x8x1xf32>
    %131 = vector.broadcast %130 : vector<4x8x1xf32> to vector<4x8x8xf32>
    %132 = arith.subf %128, %131 : vector<4x8x8xf32>
    %133 = math.exp %132 : vector<4x8x8xf32>
    %cst_58 = arith.constant dense<0.000000e+00> : vector<4x8xf32>
    %134 = vector.multi_reduction <add>, %133, %cst_58 [2] : vector<4x8x8xf32> to vector<4x8xf32>
    %135 = vector.shape_cast %134 : vector<4x8xf32> to vector<4x8x1xf32>
    %136 = tpu.reciprocal %135 {approx = true} : vector<4x8x1xf32> -> vector<4x8x1xf32>
    %137 = vector.broadcast %136 : vector<4x8x1xf32> to vector<4x8x8xf32>
    %138 = arith.mulf %133, %137 : vector<4x8x8xf32>
    %139 = arith.truncf %138 : vector<4x8x8xf32> to vector<4x8x8xbf16>
    "tpu.trace_start"() <{level = 10 : i32, message = "bqk,bkd->bqd"}> : () -> ()
    %cst_59 = arith.constant dense<0.000000e+00> : vector<4x8x8xf32>
    %140 = tpu.matmul %139, %123, %cst_59 {dimension_numbers = #tpu.dot_dimension_numbers<[2], [1], [1], [2], [0, 0, 0, 1, 1, 2], [0], [0]>} : vector<4x8x8xbf16>, vector<4x8x8xbf16>, vector<4x8x8xf32> -> vector<4x8x8xf32>
    "tpu.trace_stop"() : () -> ()
    %141 = vector.shape_cast %140 : vector<4x8x8xf32> to vector<32x8xf32>
    %c0_60 = arith.constant 0 : index
    %c16 = arith.constant 16 : index
    %142 = vector.load %arg8[%c0_60, %c16] : memref<32x32xf32, #tpu.memory_space<vmem>>, vector<32x8xf32>
    tpu.vector_store %arg8[%c0_60, %c16], %141 {strides = array<i32>} : memref<32x32xf32, #tpu.memory_space<vmem>>, vector<32x8xf32>,
    %143 = vector.extract_strided_slice %58 {offsets = [0, 24], sizes = [32, 8], strides = [1, 1]} : vector<32x96xf32> to vector<32x8xf32>
    %144 = vector.shape_cast %143 : vector<32x8xf32> to vector<4x8x8xf32>
    %145 = arith.truncf %144 : vector<4x8x8xf32> to vector<4x8x8xbf16>
    %146 = vector.extract_strided_slice %58 {offsets = [0, 56], sizes = [32, 8], strides = [1, 1]} : vector<32x96xf32> to vector<32x8xf32>
    %147 = vector.shape_cast %146 : vector<32x8xf32> to vector<4x8x8xf32>
    %148 = arith.truncf %147 : vector<4x8x8xf32> to vector<4x8x8xbf16>
    %149 = vector.extract_strided_slice %58 {offsets = [0, 88], sizes = [32, 8], strides = [1, 1]} : vector<32x96xf32> to vector<32x8xf32>
    %150 = vector.shape_cast %149 : vector<32x8xf32> to vector<4x8x8xf32>
    %151 = arith.truncf %150 : vector<4x8x8xf32> to vector<4x8x8xbf16>
    "tpu.trace_start"() <{level = 10 : i32, message = "bqd,bkd->bqk"}> : () -> ()
    %cst_61 = arith.constant dense<0.000000e+00> : vector<4x8x8xf32>
    %152 = tpu.matmul %145, %148, %cst_61 {dimension_numbers = #tpu.dot_dimension_numbers<[2], [2], [1], [1], [0, 0, 0, 1, 1, 1], [0], [0]>} : vector<4x8x8xbf16>, vector<4x8x8xbf16>, vector<4x8x8xf32> -> vector<4x8x8xf32>
    "tpu.trace_stop"() : () -> ()
    %cst_62 = arith.constant 0.353553385 : f32
    %153 = vector.broadcast %cst_62 : f32 to vector<4x8x8xf32>
    %154 = arith.mulf %152, %153 : vector<4x8x8xf32>
    %155 = vector.broadcast %30 : vector<4x1x8xf32> to vector<4x8x8xf32>
    %156 = arith.addf %154, %155 : vector<4x8x8xf32>
    %cst_63 = arith.constant dense<0xFF800000> : vector<4x8xf32>
    %157 = vector.multi_reduction <maximumf>, %156, %cst_63 [2] : vector<4x8x8xf32> to vector<4x8xf32>
    %158 = vector.shape_cast %157 : vector<4x8xf32> to vector<4x8x1xf32>
    %159 = vector.broadcast %158 : vector<4x8x1xf32> to vector<4x8x8xf32>
    %160 = arith.subf %156, %159 : vector<4x8x8xf32>
    %161 = math.exp %160 : vector<4x8x8xf32>
    %cst_64 = arith.constant dense<0.000000e+00> : vector<4x8xf32>
    %162 = vector.multi_reduction <add>, %161, %cst_64 [2] : vector<4x8x8xf32> to vector<4x8xf32>
    %163 = vector.shape_cast %162 : vector<4x8xf32> to vector<4x8x1xf32>
    %164 = tpu.reciprocal %163 {approx = true} : vector<4x8x1xf32> -> vector<4x8x1xf32>
    %165 = vector.broadcast %164 : vector<4x8x1xf32> to vector<4x8x8xf32>
    %166 = arith.mulf %161, %165 : vector<4x8x8xf32>
    %167 = arith.truncf %166 : vector<4x8x8xf32> to vector<4x8x8xbf16>
    "tpu.trace_start"() <{level = 10 : i32, message = "bqk,bkd->bqd"}> : () -> ()
    %cst_65 = arith.constant dense<0.000000e+00> : vector<4x8x8xf32>
    %168 = tpu.matmul %167, %151, %cst_65 {dimension_numbers = #tpu.dot_dimension_numbers<[2], [1], [1], [2], [0, 0, 0, 1, 1, 2], [0], [0]>} : vector<4x8x8xbf16>, vector<4x8x8xbf16>, vector<4x8x8xf32> -> vector<4x8x8xf32>
    "tpu.trace_stop"() : () -> ()
    %169 = vector.shape_cast %168 : vector<4x8x8xf32> to vector<32x8xf32>
    %c0_66 = arith.constant 0 : index
    %c24 = arith.constant 24 : index
    %170 = vector.load %arg8[%c0_66, %c24] : memref<32x32xf32, #tpu.memory_space<vmem>>, vector<32x8xf32>
    tpu.vector_store %arg8[%c0_66, %c24], %169 {strides = array<i32>} : memref<32x32xf32, #tpu.memory_space<vmem>>, vector<32x8xf32>,
    %c0_67 = arith.constant 0 : index
    %c0_68 = arith.constant 0 : index
    %171 = vector.load %arg8[%c0_67, %c0_68] : memref<32x32xf32, #tpu.memory_space<vmem>>, vector<32x32xf32>
    %172 = arith.truncf %171 : vector<32x32xf32> to vector<32x32xbf16>
    %cst_69 = arith.constant dense<0.000000e+00> : vector<32x32xf32>
    %173 = tpu.matmul %172, %34, %cst_69 {dimension_numbers = #tpu.dot_dimension_numbers<[1], [0], [0], [1], [0, 0, 1, 1], [], []>} : vector<32x32xbf16>, vector<32x32xbf16>, vector<32x32xf32> -> vector<32x32xf32>
    %174 = vector.broadcast %42 : vector<1x32xf32> to vector<32x32xf32>
    %175 = arith.addf %173, %174 : vector<32x32xf32>
    %176 = arith.addf %24, %175 : vector<32x32xf32>
    %cst_70 = arith.constant dense<0.000000e+00> : vector<32xf32>
    %177 = vector.multi_reduction <add>, %176, %cst_70 [1] : vector<32x32xf32> to vector<32xf32>
    %178 = vector.shape_cast %177 : vector<32xf32> to vector<32x1xf32>
    %cst_71 = arith.constant 3.200000e+01 : f32
    %179 = vector.broadcast %cst_71 : f32 to vector<32x1xf32>
    %180 = arith.divf %178, %179 : vector<32x1xf32>
    %181 = vector.broadcast %180 : vector<32x1xf32> to vector<32x32xf32>
    %182 = arith.subf %176, %181 : vector<32x32xf32>
    %183 = arith.mulf %182, %182 : vector<32x32xf32>
    %cst_72 = arith.constant dense<0.000000e+00> : vector<32xf32>
    %184 = vector.multi_reduction <add>, %183, %cst_72 [1] : vector<32x32xf32> to vector<32xf32>
    %185 = vector.shape_cast %184 : vector<32xf32> to vector<32x1xf32>
    %cst_73 = arith.constant 3.200000e+01 : f32
    %186 = vector.broadcast %cst_73 : f32 to vector<32x1xf32>
    %187 = arith.divf %185, %186 : vector<32x1xf32>
    %188 = vector.broadcast %180 : vector<32x1xf32> to vector<32x32xf32>
    %189 = arith.subf %176, %188 : vector<32x32xf32>
    %cst_74 = arith.constant 9.99999996E-13 : f32
    %190 = vector.broadcast %cst_74 : f32 to vector<32x1xf32>
    %191 = arith.addf %187, %190 : vector<32x1xf32>
    %192 = math.rsqrt %191 : vector<32x1xf32>
    %193 = vector.broadcast %192 : vector<32x1xf32> to vector<32x32xf32>
    %194 = arith.mulf %189, %193 : vector<32x32xf32>
    %195 = vector.broadcast %44 : vector<1x32xf32> to vector<32x32xf32>
    %196 = arith.mulf %194, %195 : vector<32x32xf32>
    %197 = vector.broadcast %46 : vector<1x32xf32> to vector<32x32xf32>
    %198 = arith.addf %196, %197 : vector<32x32xf32>
    %199 = arith.truncf %198 : vector<32x32xf32> to vector<32x32xbf16>
    %cst_75 = arith.constant dense<0.000000e+00> : vector<32x64xf32>
    %200 = tpu.matmul %199, %36, %cst_75 {dimension_numbers = #tpu.dot_dimension_numbers<[1], [0], [0], [1], [0, 0, 1, 1], [], []>} : vector<32x32xbf16>, vector<32x64xbf16>, vector<32x64xf32> -> vector<32x64xf32>
    %201 = vector.broadcast %48 : vector<1x64xf32> to vector<32x64xf32>
    %202 = arith.addf %200, %201 : vector<32x64xf32>
    %cst_76 = arith.constant 5.000000e-01 : f32
    %203 = vector.broadcast %cst_76 : f32 to vector<32x64xf32>
    %204 = arith.mulf %203, %202 : vector<32x64xf32>
    %cst_77 = arith.constant 4.471500e-02 : f32
    %205 = vector.broadcast %cst_77 : f32 to vector<32x64xf32>
    %206 = arith.mulf %205, %202 : vector<32x64xf32>
    %207 = arith.mulf %206, %202 : vector<32x64xf32>
    %208 = arith.mulf %207, %202 : vector<32x64xf32>
    %209 = arith.addf %202, %208 : vector<32x64xf32>
    %cst_78 = arith.constant 0.797884583 : f32
    %210 = vector.broadcast %cst_78 : f32 to vector<32x64xf32>
    %211 = arith.mulf %210, %209 : vector<32x64xf32>
    %212 = math.tanh %211 : vector<32x64xf32>
    %cst_79 = arith.constant 1.000000e+00 : f32
    %213 = vector.broadcast %cst_79 : f32 to vector<32x64xf32>
    %214 = arith.addf %213, %212 : vector<32x64xf32>
    %215 = arith.mulf %204, %214 : vector<32x64xf32>
    %216 = arith.truncf %215 : vector<32x64xf32> to vector<32x64xbf16>
    %cst_80 = arith.constant dense<0.000000e+00> : vector<32x32xf32>
    %217 = tpu.matmul %216, %38, %cst_80 {dimension_numbers = #tpu.dot_dimension_numbers<[1], [0], [0], [1], [0, 0, 1, 1], [], []>} : vector<32x64xbf16>, vector<64x32xbf16>, vector<32x32xf32> -> vector<32x32xf32>
    %218 = vector.broadcast %50 : vector<1x32xf32> to vector<32x32xf32>
    %219 = arith.addf %217, %218 : vector<32x32xf32>
    %220 = arith.addf %198, %219 : vector<32x32xf32>
    %cst_81 = arith.constant dense<0.000000e+00> : vector<32xf32>
    %221 = vector.multi_reduction <add>, %220, %cst_81 [1] : vector<32x32xf32> to vector<32xf32>
    %222 = vector.shape_cast %221 : vector<32xf32> to vector<32x1xf32>
    %cst_82 = arith.constant 3.200000e+01 : f32
    %223 = vector.broadcast %cst_82 : f32 to vector<32x1xf32>
    %224 = arith.divf %222, %223 : vector<32x1xf32>
    %225 = vector.broadcast %224 : vector<32x1xf32> to vector<32x32xf32>
    %226 = arith.subf %220, %225 : vector<32x32xf32>
    %227 = arith.mulf %226, %226 : vector<32x32xf32>
    %cst_83 = arith.constant dense<0.000000e+00> : vector<32xf32>
    %228 = vector.multi_reduction <add>, %227, %cst_83 [1] : vector<32x32xf32> to vector<32xf32>
    %229 = vector.shape_cast %228 : vector<32xf32> to vector<32x1xf32>
    %cst_84 = arith.constant 3.200000e+01 : f32
    %230 = vector.broadcast %cst_84 : f32 to vector<32x1xf32>
    %231 = arith.divf %229, %230 : vector<32x1xf32>
    %232 = vector.broadcast %224 : vector<32x1xf32> to vector<32x32xf32>
    %233 = arith.subf %220, %232 : vector<32x32xf32>
    %cst_85 = arith.constant 9.99999996E-13 : f32
    %234 = vector.broadcast %cst_85 : f32 to vector<32x1xf32>
    %235 = arith.addf %231, %234 : vector<32x1xf32>
    %236 = math.rsqrt %235 : vector<32x1xf32>
    %237 = vector.broadcast %236 : vector<32x1xf32> to vector<32x32xf32>
    %238 = arith.mulf %233, %237 : vector<32x32xf32>
    %239 = vector.broadcast %52 : vector<1x32xf32> to vector<32x32xf32>
    %240 = arith.mulf %238, %239 : vector<32x32xf32>
    %241 = vector.broadcast %54 : vector<1x32xf32> to vector<32x32xf32>
    %242 = arith.addf %240, %241 : vector<32x32xf32>
    %c1_86 = arith.constant 1 : index
    %c0_87 = arith.constant 0 : index
    %c0_88 = arith.constant 0 : index
    %243 = vector.load %arg4[%c1_86, %c0_87, %c0_88] : memref<2x32x192xbf16, #tpu.memory_space<vmem>>, vector<1x32x96xbf16>
    %244 = vector.shape_cast %243 : vector<1x32x96xbf16> to vector<32x96xbf16>
    %c1_89 = arith.constant 1 : index
    %c0_90 = arith.constant 0 : index
    %c96_91 = arith.constant 96 : index
    %245 = vector.load %arg4[%c1_89, %c0_90, %c96_91] : memref<2x32x192xbf16, #tpu.memory_space<vmem>>, vector<1x32x32xbf16>
    %246 = vector.shape_cast %245 : vector<1x32x32xbf16> to vector<32x32xbf16>
    %c1_92 = arith.constant 1 : index
    %c0_93 = arith.constant 0 : index
    %c128_94 = arith.constant 128 : index
    %247 = vector.load %arg4[%c1_92, %c0_93, %c128_94] : memref<2x32x192xbf16, #tpu.memory_space<vmem>>, vector<1x32x64xbf16>
    %248 = vector.shape_cast %247 : vector<1x32x64xbf16> to vector<32x64xbf16>
    %c1_95 = arith.constant 1 : index
    %c0_96 = arith.constant 0 : index
    %c0_97 = arith.constant 0 : index
    %249 = vector.load %arg5[%c1_95, %c0_96, %c0_97] : memref<2x64x32xbf16, #tpu.memory_space<vmem>>, vector<1x64x32xbf16>
    %250 = vector.shape_cast %249 : vector<1x64x32xbf16> to vector<64x32xbf16>
    %c1_98 = arith.constant 1 : index
    %c0_99 = arith.constant 0 : index
    %c0_100 = arith.constant 0 : index
    %251 = vector.load %arg6[%c1_98, %c0_99, %c0_100] : memref<2x1x352xf32, #tpu.memory_space<vmem>>, vector<1x1x96xf32>
    %252 = vector.shape_cast %251 : vector<1x1x96xf32> to vector<1x96xf32>
    %c1_101 = arith.constant 1 : index
    %c0_102 = arith.constant 0 : index
    %c96_103 = arith.constant 96 : index
    %253 = vector.load %arg6[%c1_101, %c0_102, %c96_103] : memref<2x1x352xf32, #tpu.memory_space<vmem>>, vector<1x1x32xf32>
    %254 = vector.shape_cast %253 : vector<1x1x32xf32> to vector<1x32xf32>
    %c1_104 = arith.constant 1 : index
    %c0_105 = arith.constant 0 : index
    %c128_106 = arith.constant 128 : index
    %255 = vector.load %arg6[%c1_104, %c0_105, %c128_106] : memref<2x1x352xf32, #tpu.memory_space<vmem>>, vector<1x1x32xf32>
    %256 = vector.shape_cast %255 : vector<1x1x32xf32> to vector<1x32xf32>
    %c1_107 = arith.constant 1 : index
    %c0_108 = arith.constant 0 : index
    %c160_109 = arith.constant 160 : index
    %257 = vector.load %arg6[%c1_107, %c0_108, %c160_109] : memref<2x1x352xf32, #tpu.memory_space<vmem>>, vector<1x1x32xf32>
    %258 = vector.shape_cast %257 : vector<1x1x32xf32> to vector<1x32xf32>
    %c1_110 = arith.constant 1 : index
    %c0_111 = arith.constant 0 : index
    %c192_112 = arith.constant 192 : index
    %259 = vector.load %arg6[%c1_110, %c0_111, %c192_112] : memref<2x1x352xf32, #tpu.memory_space<vmem>>, vector<1x1x64xf32>
    %260 = vector.shape_cast %259 : vector<1x1x64xf32> to vector<1x64xf32>
    %c1_113 = arith.constant 1 : index
    %c0_114 = arith.constant 0 : index
    %c256_115 = arith.constant 256 : index
    %261 = vector.load %arg6[%c1_113, %c0_114, %c256_115] : memref<2x1x352xf32, #tpu.memory_space<vmem>>, vector<1x1x32xf32>
    %262 = vector.shape_cast %261 : vector<1x1x32xf32> to vector<1x32xf32>
    %c1_116 = arith.constant 1 : index
    %c0_117 = arith.constant 0 : index
    %c288_118 = arith.constant 288 : index
    %263 = vector.load %arg6[%c1_116, %c0_117, %c288_118] : memref<2x1x352xf32, #tpu.memory_space<vmem>>, vector<1x1x32xf32>
    %264 = vector.shape_cast %263 : vector<1x1x32xf32> to vector<1x32xf32>
    %c1_119 = arith.constant 1 : index
    %c0_120 = arith.constant 0 : index
    %c320_121 = arith.constant 320 : index
    %265 = vector.load %arg6[%c1_119, %c0_120, %c320_121] : memref<2x1x352xf32, #tpu.memory_space<vmem>>, vector<1x1x32xf32>
    %266 = vector.shape_cast %265 : vector<1x1x32xf32> to vector<1x32xf32>
    %267 = arith.truncf %242 : vector<32x32xf32> to vector<32x32xbf16>
    %cst_122 = arith.constant dense<0.000000e+00> : vector<32x96xf32>
    %268 = tpu.matmul %267, %244, %cst_122 {dimension_numbers = #tpu.dot_dimension_numbers<[1], [0], [0], [1], [0, 0, 1, 1], [], []>} : vector<32x32xbf16>, vector<32x96xbf16>, vector<32x96xf32> -> vector<32x96xf32>
    %269 = vector.broadcast %252 : vector<1x96xf32> to vector<32x96xf32>
    %270 = arith.addf %268, %269 : vector<32x96xf32>
    %271 = vector.extract_strided_slice %270 {offsets = [0, 0], sizes = [32, 8], strides = [1, 1]} : vector<32x96xf32> to vector<32x8xf32>
    %272 = vector.shape_cast %271 : vector<32x8xf32> to vector<4x8x8xf32>
    %273 = arith.truncf %272 : vector<4x8x8xf32> to vector<4x8x8xbf16>
    %274 = vector.extract_strided_slice %270 {offsets = [0, 32], sizes = [32, 8], strides = [1, 1]} : vector<32x96xf32> to vector<32x8xf32>
    %275 = vector.shape_cast %274 : vector<32x8xf32> to vector<4x8x8xf32>
    %276 = arith.truncf %275 : vector<4x8x8xf32> to vector<4x8x8xbf16>
    %277 = vector.extract_strided_slice %270 {offsets = [0, 64], sizes = [32, 8], strides = [1, 1]} : vector<32x96xf32> to vector<32x8xf32>
    %278 = vector.shape_cast %277 : vector<32x8xf32> to vector<4x8x8xf32>
    %279 = arith.truncf %278 : vector<4x8x8xf32> to vector<4x8x8xbf16>
    "tpu.trace_start"() <{level = 10 : i32, message = "bqd,bkd->bqk"}> : () -> ()
    %cst_123 = arith.constant dense<0.000000e+00> : vector<4x8x8xf32>
    %280 = tpu.matmul %273, %276, %cst_123 {dimension_numbers = #tpu.dot_dimension_numbers<[2], [2], [1], [1], [0, 0, 0, 1, 1, 1], [0], [0]>} : vector<4x8x8xbf16>, vector<4x8x8xbf16>, vector<4x8x8xf32> -> vector<4x8x8xf32>
    "tpu.trace_stop"() : () -> ()
    %cst_124 = arith.constant 0.353553385 : f32
    %281 = vector.broadcast %cst_124 : f32 to vector<4x8x8xf32>
    %282 = arith.mulf %280, %281 : vector<4x8x8xf32>
    %283 = vector.broadcast %30 : vector<4x1x8xf32> to vector<4x8x8xf32>
    %284 = arith.addf %282, %283 : vector<4x8x8xf32>
    %cst_125 = arith.constant dense<0xFF800000> : vector<4x8xf32>
    %285 = vector.multi_reduction <maximumf>, %284, %cst_125 [2] : vector<4x8x8xf32> to vector<4x8xf32>
    %286 = vector.shape_cast %285 : vector<4x8xf32> to vector<4x8x1xf32>
    %287 = vector.broadcast %286 : vector<4x8x1xf32> to vector<4x8x8xf32>
    %288 = arith.subf %284, %287 : vector<4x8x8xf32>
    %289 = math.exp %288 : vector<4x8x8xf32>
    %cst_126 = arith.constant dense<0.000000e+00> : vector<4x8xf32>
    %290 = vector.multi_reduction <add>, %289, %cst_126 [2] : vector<4x8x8xf32> to vector<4x8xf32>
    %291 = vector.shape_cast %290 : vector<4x8xf32> to vector<4x8x1xf32>
    %292 = tpu.reciprocal %291 {approx = true} : vector<4x8x1xf32> -> vector<4x8x1xf32>
    %293 = vector.broadcast %292 : vector<4x8x1xf32> to vector<4x8x8xf32>
    %294 = arith.mulf %289, %293 : vector<4x8x8xf32>
    %295 = arith.truncf %294 : vector<4x8x8xf32> to vector<4x8x8xbf16>
    "tpu.trace_start"() <{level = 10 : i32, message = "bqk,bkd->bqd"}> : () -> ()
    %cst_127 = arith.constant dense<0.000000e+00> : vector<4x8x8xf32>
    %296 = tpu.matmul %295, %279, %cst_127 {dimension_numbers = #tpu.dot_dimension_numbers<[2], [1], [1], [2], [0, 0, 0, 1, 1, 2], [0], [0]>} : vector<4x8x8xbf16>, vector<4x8x8xbf16>, vector<4x8x8xf32> -> vector<4x8x8xf32>
    "tpu.trace_stop"() : () -> ()
    %297 = vector.shape_cast %296 : vector<4x8x8xf32> to vector<32x8xf32>
    %c0_128 = arith.constant 0 : index
    %c0_129 = arith.constant 0 : index
    %298 = vector.load %arg8[%c0_128, %c0_129] : memref<32x32xf32, #tpu.memory_space<vmem>>, vector<32x8xf32>
    tpu.vector_store %arg8[%c0_128, %c0_129], %297 {strides = array<i32>} : memref<32x32xf32, #tpu.memory_space<vmem>>, vector<32x8xf32>,
    %299 = vector.extract_strided_slice %270 {offsets = [0, 8], sizes = [32, 8], strides = [1, 1]} : vector<32x96xf32> to vector<32x8xf32>
    %300 = vector.shape_cast %299 : vector<32x8xf32> to vector<4x8x8xf32>
    %301 = arith.truncf %300 : vector<4x8x8xf32> to vector<4x8x8xbf16>
    %302 = vector.extract_strided_slice %270 {offsets = [0, 40], sizes = [32, 8], strides = [1, 1]} : vector<32x96xf32> to vector<32x8xf32>
    %303 = vector.shape_cast %302 : vector<32x8xf32> to vector<4x8x8xf32>
    %304 = arith.truncf %303 : vector<4x8x8xf32> to vector<4x8x8xbf16>
    %305 = vector.extract_strided_slice %270 {offsets = [0, 72], sizes = [32, 8], strides = [1, 1]} : vector<32x96xf32> to vector<32x8xf32>
    %306 = vector.shape_cast %305 : vector<32x8xf32> to vector<4x8x8xf32>
    %307 = arith.truncf %306 : vector<4x8x8xf32> to vector<4x8x8xbf16>
    "tpu.trace_start"() <{level = 10 : i32, message = "bqd,bkd->bqk"}> : () -> ()
    %cst_130 = arith.constant dense<0.000000e+00> : vector<4x8x8xf32>
    %308 = tpu.matmul %301, %304, %cst_130 {dimension_numbers = #tpu.dot_dimension_numbers<[2], [2], [1], [1], [0, 0, 0, 1, 1, 1], [0], [0]>} : vector<4x8x8xbf16>, vector<4x8x8xbf16>, vector<4x8x8xf32> -> vector<4x8x8xf32>
    "tpu.trace_stop"() : () -> ()
    %cst_131 = arith.constant 0.353553385 : f32
    %309 = vector.broadcast %cst_131 : f32 to vector<4x8x8xf32>
    %310 = arith.mulf %308, %309 : vector<4x8x8xf32>
    %311 = vector.broadcast %30 : vector<4x1x8xf32> to vector<4x8x8xf32>
    %312 = arith.addf %310, %311 : vector<4x8x8xf32>
    %cst_132 = arith.constant dense<0xFF800000> : vector<4x8xf32>
    %313 = vector.multi_reduction <maximumf>, %312, %cst_132 [2] : vector<4x8x8xf32> to vector<4x8xf32>
    %314 = vector.shape_cast %313 : vector<4x8xf32> to vector<4x8x1xf32>
    %315 = vector.broadcast %314 : vector<4x8x1xf32> to vector<4x8x8xf32>
    %316 = arith.subf %312, %315 : vector<4x8x8xf32>
    %317 = math.exp %316 : vector<4x8x8xf32>
    %cst_133 = arith.constant dense<0.000000e+00> : vector<4x8xf32>
    %318 = vector.multi_reduction <add>, %317, %cst_133 [2] : vector<4x8x8xf32> to vector<4x8xf32>
    %319 = vector.shape_cast %318 : vector<4x8xf32> to vector<4x8x1xf32>
    %320 = tpu.reciprocal %319 {approx = true} : vector<4x8x1xf32> -> vector<4x8x1xf32>
    %321 = vector.broadcast %320 : vector<4x8x1xf32> to vector<4x8x8xf32>
    %322 = arith.mulf %317, %321 : vector<4x8x8xf32>
    %323 = arith.truncf %322 : vector<4x8x8xf32> to vector<4x8x8xbf16>
    "tpu.trace_start"() <{level = 10 : i32, message = "bqk,bkd->bqd"}> : () -> ()
    %cst_134 = arith.constant dense<0.000000e+00> : vector<4x8x8xf32>
    %324 = tpu.matmul %323, %307, %cst_134 {dimension_numbers = #tpu.dot_dimension_numbers<[2], [1], [1], [2], [0, 0, 0, 1, 1, 2], [0], [0]>} : vector<4x8x8xbf16>, vector<4x8x8xbf16>, vector<4x8x8xf32> -> vector<4x8x8xf32>
    "tpu.trace_stop"() : () -> ()
    %325 = vector.shape_cast %324 : vector<4x8x8xf32> to vector<32x8xf32>
    %c0_135 = arith.constant 0 : index
    %c8_136 = arith.constant 8 : index
    %326 = vector.load %arg8[%c0_135, %c8_136] : memref<32x32xf32, #tpu.memory_space<vmem>>, vector<32x8xf32>
    tpu.vector_store %arg8[%c0_135, %c8_136], %325 {strides = array<i32>} : memref<32x32xf32, #tpu.memory_space<vmem>>, vector<32x8xf32>,
    %327 = vector.extract_strided_slice %270 {offsets = [0, 16], sizes = [32, 8], strides = [1, 1]} : vector<32x96xf32> to vector<32x8xf32>
    %328 = vector.shape_cast %327 : vector<32x8xf32> to vector<4x8x8xf32>
    %329 = arith.truncf %328 : vector<4x8x8xf32> to vector<4x8x8xbf16>
    %330 = vector.extract_strided_slice %270 {offsets = [0, 48], sizes = [32, 8], strides = [1, 1]} : vector<32x96xf32> to vector<32x8xf32>
    %331 = vector.shape_cast %330 : vector<32x8xf32> to vector<4x8x8xf32>
    %332 = arith.truncf %331 : vector<4x8x8xf32> to vector<4x8x8xbf16>
    %333 = vector.extract_strided_slice %270 {offsets = [0, 80], sizes = [32, 8], strides = [1, 1]} : vector<32x96xf32> to vector<32x8xf32>
    %334 = vector.shape_cast %333 : vector<32x8xf32> to vector<4x8x8xf32>
    %335 = arith.truncf %334 : vector<4x8x8xf32> to vector<4x8x8xbf16>
    "tpu.trace_start"() <{level = 10 : i32, message = "bqd,bkd->bqk"}> : () -> ()
    %cst_137 = arith.constant dense<0.000000e+00> : vector<4x8x8xf32>
    %336 = tpu.matmul %329, %332, %cst_137 {dimension_numbers = #tpu.dot_dimension_numbers<[2], [2], [1], [1], [0, 0, 0, 1, 1, 1], [0], [0]>} : vector<4x8x8xbf16>, vector<4x8x8xbf16>, vector<4x8x8xf32> -> vector<4x8x8xf32>
    "tpu.trace_stop"() : () -> ()
    %cst_138 = arith.constant 0.353553385 : f32
    %337 = vector.broadcast %cst_138 : f32 to vector<4x8x8xf32>
    %338 = arith.mulf %336, %337 : vector<4x8x8xf32>
    %339 = vector.broadcast %30 : vector<4x1x8xf32> to vector<4x8x8xf32>
    %340 = arith.addf %338, %339 : vector<4x8x8xf32>
    %cst_139 = arith.constant dense<0xFF800000> : vector<4x8xf32>
    %341 = vector.multi_reduction <maximumf>, %340, %cst_139 [2] : vector<4x8x8xf32> to vector<4x8xf32>
    %342 = vector.shape_cast %341 : vector<4x8xf32> to vector<4x8x1xf32>
    %343 = vector.broadcast %342 : vector<4x8x1xf32> to vector<4x8x8xf32>
    %344 = arith.subf %340, %343 : vector<4x8x8xf32>
    %345 = math.exp %344 : vector<4x8x8xf32>
    %cst_140 = arith.constant dense<0.000000e+00> : vector<4x8xf32>
    %346 = vector.multi_reduction <add>, %345, %cst_140 [2] : vector<4x8x8xf32> to vector<4x8xf32>
    %347 = vector.shape_cast %346 : vector<4x8xf32> to vector<4x8x1xf32>
    %348 = tpu.reciprocal %347 {approx = true} : vector<4x8x1xf32> -> vector<4x8x1xf32>
    %349 = vector.broadcast %348 : vector<4x8x1xf32> to vector<4x8x8xf32>
    %350 = arith.mulf %345, %349 : vector<4x8x8xf32>
    %351 = arith.truncf %350 : vector<4x8x8xf32> to vector<4x8x8xbf16>
    "tpu.trace_start"() <{level = 10 : i32, message = "bqk,bkd->bqd"}> : () -> ()
    %cst_141 = arith.constant dense<0.000000e+00> : vector<4x8x8xf32>
    %352 = tpu.matmul %351, %335, %cst_141 {dimension_numbers = #tpu.dot_dimension_numbers<[2], [1], [1], [2], [0, 0, 0, 1, 1, 2], [0], [0]>} : vector<4x8x8xbf16>, vector<4x8x8xbf16>, vector<4x8x8xf32> -> vector<4x8x8xf32>
    "tpu.trace_stop"() : () -> ()
    %353 = vector.shape_cast %352 : vector<4x8x8xf32> to vector<32x8xf32>
    %c0_142 = arith.constant 0 : index
    %c16_143 = arith.constant 16 : index
    %354 = vector.load %arg8[%c0_142, %c16_143] : memref<32x32xf32, #tpu.memory_space<vmem>>, vector<32x8xf32>
    tpu.vector_store %arg8[%c0_142, %c16_143], %353 {strides = array<i32>} : memref<32x32xf32, #tpu.memory_space<vmem>>, vector<32x8xf32>,
    %355 = vector.extract_strided_slice %270 {offsets = [0, 24], sizes = [32, 8], strides = [1, 1]} : vector<32x96xf32> to vector<32x8xf32>
    %356 = vector.shape_cast %355 : vector<32x8xf32> to vector<4x8x8xf32>
    %357 = arith.truncf %356 : vector<4x8x8xf32> to vector<4x8x8xbf16>
    %358 = vector.extract_strided_slice %270 {offsets = [0, 56], sizes = [32, 8], strides = [1, 1]} : vector<32x96xf32> to vector<32x8xf32>
    %359 = vector.shape_cast %358 : vector<32x8xf32> to vector<4x8x8xf32>
    %360 = arith.truncf %359 : vector<4x8x8xf32> to vector<4x8x8xbf16>
    %361 = vector.extract_strided_slice %270 {offsets = [0, 88], sizes = [32, 8], strides = [1, 1]} : vector<32x96xf32> to vector<32x8xf32>
    %362 = vector.shape_cast %361 : vector<32x8xf32> to vector<4x8x8xf32>
    %363 = arith.truncf %362 : vector<4x8x8xf32> to vector<4x8x8xbf16>
    "tpu.trace_start"() <{level = 10 : i32, message = "bqd,bkd->bqk"}> : () -> ()
    %cst_144 = arith.constant dense<0.000000e+00> : vector<4x8x8xf32>
    %364 = tpu.matmul %357, %360, %cst_144 {dimension_numbers = #tpu.dot_dimension_numbers<[2], [2], [1], [1], [0, 0, 0, 1, 1, 1], [0], [0]>} : vector<4x8x8xbf16>, vector<4x8x8xbf16>, vector<4x8x8xf32> -> vector<4x8x8xf32>
    "tpu.trace_stop"() : () -> ()
    %cst_145 = arith.constant 0.353553385 : f32
    %365 = vector.broadcast %cst_145 : f32 to vector<4x8x8xf32>
    %366 = arith.mulf %364, %365 : vector<4x8x8xf32>
    %367 = vector.broadcast %30 : vector<4x1x8xf32> to vector<4x8x8xf32>
    %368 = arith.addf %366, %367 : vector<4x8x8xf32>
    %cst_146 = arith.constant dense<0xFF800000> : vector<4x8xf32>
    %369 = vector.multi_reduction <maximumf>, %368, %cst_146 [2] : vector<4x8x8xf32> to vector<4x8xf32>
    %370 = vector.shape_cast %369 : vector<4x8xf32> to vector<4x8x1xf32>
    %371 = vector.broadcast %370 : vector<4x8x1xf32> to vector<4x8x8xf32>
    %372 = arith.subf %368, %371 : vector<4x8x8xf32>
    %373 = math.exp %372 : vector<4x8x8xf32>
    %cst_147 = arith.constant dense<0.000000e+00> : vector<4x8xf32>
    %374 = vector.multi_reduction <add>, %373, %cst_147 [2] : vector<4x8x8xf32> to vector<4x8xf32>
    %375 = vector.shape_cast %374 : vector<4x8xf32> to vector<4x8x1xf32>
    %376 = tpu.reciprocal %375 {approx = true} : vector<4x8x1xf32> -> vector<4x8x1xf32>
    %377 = vector.broadcast %376 : vector<4x8x1xf32> to vector<4x8x8xf32>
    %378 = arith.mulf %373, %377 : vector<4x8x8xf32>
    %379 = arith.truncf %378 : vector<4x8x8xf32> to vector<4x8x8xbf16>
    "tpu.trace_start"() <{level = 10 : i32, message = "bqk,bkd->bqd"}> : () -> ()
    %cst_148 = arith.constant dense<0.000000e+00> : vector<4x8x8xf32>
    %380 = tpu.matmul %379, %363, %cst_148 {dimension_numbers = #tpu.dot_dimension_numbers<[2], [1], [1], [2], [0, 0, 0, 1, 1, 2], [0], [0]>} : vector<4x8x8xbf16>, vector<4x8x8xbf16>, vector<4x8x8xf32> -> vector<4x8x8xf32>
    "tpu.trace_stop"() : () -> ()
    %381 = vector.shape_cast %380 : vector<4x8x8xf32> to vector<32x8xf32>
    %c0_149 = arith.constant 0 : index
    %c24_150 = arith.constant 24 : index
    %382 = vector.load %arg8[%c0_149, %c24_150] : memref<32x32xf32, #tpu.memory_space<vmem>>, vector<32x8xf32>
    tpu.vector_store %arg8[%c0_149, %c24_150], %381 {strides = array<i32>} : memref<32x32xf32, #tpu.memory_space<vmem>>, vector<32x8xf32>,
    %c0_151 = arith.constant 0 : index
    %c0_152 = arith.constant 0 : index
    %383 = vector.load %arg8[%c0_151, %c0_152] : memref<32x32xf32, #tpu.memory_space<vmem>>, vector<32x32xf32>
    %384 = arith.truncf %383 : vector<32x32xf32> to vector<32x32xbf16>
    %cst_153 = arith.constant dense<0.000000e+00> : vector<32x32xf32>
    %385 = tpu.matmul %384, %246, %cst_153 {dimension_numbers = #tpu.dot_dimension_numbers<[1], [0], [0], [1], [0, 0, 1, 1], [], []>} : vector<32x32xbf16>, vector<32x32xbf16>, vector<32x32xf32> -> vector<32x32xf32>
    %386 = vector.broadcast %254 : vector<1x32xf32> to vector<32x32xf32>
    %387 = arith.addf %385, %386 : vector<32x32xf32>
    %388 = arith.addf %242, %387 : vector<32x32xf32>
    %cst_154 = arith.constant dense<0.000000e+00> : vector<32xf32>
    %389 = vector.multi_reduction <add>, %388, %cst_154 [1] : vector<32x32xf32> to vector<32xf32>
    %390 = vector.shape_cast %389 : vector<32xf32> to vector<32x1xf32>
    %cst_155 = arith.constant 3.200000e+01 : f32
    %391 = vector.broadcast %cst_155 : f32 to vector<32x1xf32>
    %392 = arith.divf %390, %391 : vector<32x1xf32>
    %393 = vector.broadcast %392 : vector<32x1xf32> to vector<32x32xf32>
    %394 = arith.subf %388, %393 : vector<32x32xf32>
    %395 = arith.mulf %394, %394 : vector<32x32xf32>
    %cst_156 = arith.constant dense<0.000000e+00> : vector<32xf32>
    %396 = vector.multi_reduction <add>, %395, %cst_156 [1] : vector<32x32xf32> to vector<32xf32>
    %397 = vector.shape_cast %396 : vector<32xf32> to vector<32x1xf32>
    %cst_157 = arith.constant 3.200000e+01 : f32
    %398 = vector.broadcast %cst_157 : f32 to vector<32x1xf32>
    %399 = arith.divf %397, %398 : vector<32x1xf32>
    %400 = vector.broadcast %392 : vector<32x1xf32> to vector<32x32xf32>
    %401 = arith.subf %388, %400 : vector<32x32xf32>
    %cst_158 = arith.constant 9.99999996E-13 : f32
    %402 = vector.broadcast %cst_158 : f32 to vector<32x1xf32>
    %403 = arith.addf %399, %402 : vector<32x1xf32>
    %404 = math.rsqrt %403 : vector<32x1xf32>
    %405 = vector.broadcast %404 : vector<32x1xf32> to vector<32x32xf32>
    %406 = arith.mulf %401, %405 : vector<32x32xf32>
    %407 = vector.broadcast %256 : vector<1x32xf32> to vector<32x32xf32>
    %408 = arith.mulf %406, %407 : vector<32x32xf32>
    %409 = vector.broadcast %258 : vector<1x32xf32> to vector<32x32xf32>
    %410 = arith.addf %408, %409 : vector<32x32xf32>
    %411 = arith.truncf %410 : vector<32x32xf32> to vector<32x32xbf16>
    %cst_159 = arith.constant dense<0.000000e+00> : vector<32x64xf32>
    %412 = tpu.matmul %411, %248, %cst_159 {dimension_numbers = #tpu.dot_dimension_numbers<[1], [0], [0], [1], [0, 0, 1, 1], [], []>} : vector<32x32xbf16>, vector<32x64xbf16>, vector<32x64xf32> -> vector<32x64xf32>
    %413 = vector.broadcast %260 : vector<1x64xf32> to vector<32x64xf32>
    %414 = arith.addf %412, %413 : vector<32x64xf32>
    %cst_160 = arith.constant 5.000000e-01 : f32
    %415 = vector.broadcast %cst_160 : f32 to vector<32x64xf32>
    %416 = arith.mulf %415, %414 : vector<32x64xf32>
    %cst_161 = arith.constant 4.471500e-02 : f32
    %417 = vector.broadcast %cst_161 : f32 to vector<32x64xf32>
    %418 = arith.mulf %417, %414 : vector<32x64xf32>
    %419 = arith.mulf %418, %414 : vector<32x64xf32>
    %420 = arith.mulf %419, %414 : vector<32x64xf32>
    %421 = arith.addf %414, %420 : vector<32x64xf32>
    %cst_162 = arith.constant 0.797884583 : f32
    %422 = vector.broadcast %cst_162 : f32 to vector<32x64xf32>
    %423 = arith.mulf %422, %421 : vector<32x64xf32>
    %424 = math.tanh %423 : vector<32x64xf32>
    %cst_163 = arith.constant 1.000000e+00 : f32
    %425 = vector.broadcast %cst_163 : f32 to vector<32x64xf32>
    %426 = arith.addf %425, %424 : vector<32x64xf32>
    %427 = arith.mulf %416, %426 : vector<32x64xf32>
    %428 = arith.truncf %427 : vector<32x64xf32> to vector<32x64xbf16>
    %cst_164 = arith.constant dense<0.000000e+00> : vector<32x32xf32>
    %429 = tpu.matmul %428, %250, %cst_164 {dimension_numbers = #tpu.dot_dimension_numbers<[1], [0], [0], [1], [0, 0, 1, 1], [], []>} : vector<32x64xbf16>, vector<64x32xbf16>, vector<32x32xf32> -> vector<32x32xf32>
    %430 = vector.broadcast %262 : vector<1x32xf32> to vector<32x32xf32>
    %431 = arith.addf %429, %430 : vector<32x32xf32>
    %432 = arith.addf %410, %431 : vector<32x32xf32>
    %cst_165 = arith.constant dense<0.000000e+00> : vector<32xf32>
    %433 = vector.multi_reduction <add>, %432, %cst_165 [1] : vector<32x32xf32> to vector<32xf32>
    %434 = vector.shape_cast %433 : vector<32xf32> to vector<32x1xf32>
    %cst_166 = arith.constant 3.200000e+01 : f32
    %435 = vector.broadcast %cst_166 : f32 to vector<32x1xf32>
    %436 = arith.divf %434, %435 : vector<32x1xf32>
    %437 = vector.broadcast %436 : vector<32x1xf32> to vector<32x32xf32>
    %438 = arith.subf %432, %437 : vector<32x32xf32>
    %439 = arith.mulf %438, %438 : vector<32x32xf32>
    %cst_167 = arith.constant dense<0.000000e+00> : vector<32xf32>
    %440 = vector.multi_reduction <add>, %439, %cst_167 [1] : vector<32x32xf32> to vector<32xf32>
    %441 = vector.shape_cast %440 : vector<32xf32> to vector<32x1xf32>
    %cst_168 = arith.constant 3.200000e+01 : f32
    %442 = vector.broadcast %cst_168 : f32 to vector<32x1xf32>
    %443 = arith.divf %441, %442 : vector<32x1xf32>
    %444 = vector.broadcast %436 : vector<32x1xf32> to vector<32x32xf32>
    %445 = arith.subf %432, %444 : vector<32x32xf32>
    %cst_169 = arith.constant 9.99999996E-13 : f32
    %446 = vector.broadcast %cst_169 : f32 to vector<32x1xf32>
    %447 = arith.addf %443, %446 : vector<32x1xf32>
    %448 = math.rsqrt %447 : vector<32x1xf32>
    %449 = vector.broadcast %448 : vector<32x1xf32> to vector<32x32xf32>
    %450 = arith.mulf %445, %449 : vector<32x32xf32>
    %451 = vector.broadcast %264 : vector<1x32xf32> to vector<32x32xf32>
    %452 = arith.mulf %450, %451 : vector<32x32xf32>
    %453 = vector.broadcast %266 : vector<1x32xf32> to vector<32x32xf32>
    %454 = arith.addf %452, %453 : vector<32x32xf32>
    %455 = vector.extract_strided_slice %454 {offsets = [0, 0], sizes = [1, 32], strides = [1, 1]} : vector<32x32xf32> to vector<1x32xf32>
    %c0_170 = arith.constant 0 : index
    %c0_171 = arith.constant 0 : index
    %456 = vector.load %arg7[%c0_170, %c0_171] : memref<4x32xf32, #tpu.memory_space<vmem>>, vector<1x32xf32>
    tpu.vector_store %arg7[%c0_170, %c0_171], %455 {strides = array<i32>} : memref<4x32xf32, #tpu.memory_space<vmem>>, vector<1x32xf32>,
    %457 = vector.extract_strided_slice %454 {offsets = [8, 0], sizes = [1, 32], strides = [1, 1]} : vector<32x32xf32> to vector<1x32xf32>
    %c1_172 = arith.constant 1 : index
    %c0_173 = arith.constant 0 : index
    %458 = vector.load %arg7[%c1_172, %c0_173] : memref<4x32xf32, #tpu.memory_space<vmem>>, vector<1x32xf32>
    tpu.vector_store %arg7[%c1_172, %c0_173], %457 {strides = array<i32>} : memref<4x32xf32, #tpu.memory_space<vmem>>, vector<1x32xf32>,
    %459 = vector.extract_strided_slice %454 {offsets = [16, 0], sizes = [1, 32], strides = [1, 1]} : vector<32x32xf32> to vector<1x32xf32>
    %c2 = arith.constant 2 : index
    %c0_174 = arith.constant 0 : index
    %460 = vector.load %arg7[%c2, %c0_174] : memref<4x32xf32, #tpu.memory_space<vmem>>, vector<1x32xf32>
    tpu.vector_store %arg7[%c2, %c0_174], %459 {strides = array<i32>} : memref<4x32xf32, #tpu.memory_space<vmem>>, vector<1x32xf32>,
    %461 = vector.extract_strided_slice %454 {offsets = [24, 0], sizes = [1, 32], strides = [1, 1]} : vector<32x32xf32> to vector<1x32xf32>
    %c3 = arith.constant 3 : index
    %c0_175 = arith.constant 0 : index
    %462 = vector.load %arg7[%c3, %c0_175] : memref<4x32xf32, #tpu.memory_space<vmem>>, vector<1x32xf32>
    tpu.vector_store %arg7[%c3, %c0_175], %461 {strides = array<i32>} : memref<4x32xf32, #tpu.memory_space<vmem>>, vector<1x32xf32>,
    return
  }
  func.func @transform_0(%arg0: i32) -> (i32, i32) {
    %c0_i32 = arith.constant 0 : i32
    %c0_i32_0 = arith.constant 0 : i32
    %c0_i32_1 = arith.constant 0 : i32
    return %c0_i32, %c0_i32_0 : i32, i32
  }
  func.func @transform_1(%arg0: i32) -> (i32, i32) {
    %c0_i32 = arith.constant 0 : i32
    %c0_i32_0 = arith.constant 0 : i32
    %c0_i32_1 = arith.constant 0 : i32
    return %c0_i32, %c0_i32_0 : i32, i32
  }
  func.func @transform_2(%arg0: i32) -> (i32, i32) {
    %c0_i32 = arith.constant 0 : i32
    %c0_i32_0 = arith.constant 0 : i32
    %c0_i32_1 = arith.constant 0 : i32
    return %c0_i32, %c0_i32_0 : i32, i32
  }
  func.func @transform_3(%arg0: i32) -> (i32, i32, i32) {
    %c0_i32 = arith.constant 0 : i32
    %c0_i32_0 = arith.constant 0 : i32
    %c0_i32_1 = arith.constant 0 : i32
    %c0_i32_2 = arith.constant 0 : i32
    return %c0_i32, %c0_i32_0, %c0_i32_1 : i32, i32, i32
  }
  func.func @transform_4(%arg0: i32) -> (i32, i32, i32) {
    %c0_i32 = arith.constant 0 : i32
    %c0_i32_0 = arith.constant 0 : i32
    %c0_i32_1 = arith.constant 0 : i32
    %c0_i32_2 = arith.constant 0 : i32
    return %c0_i32, %c0_i32_0, %c0_i32_1 : i32, i32, i32
  }
  func.func @transform_5(%arg0: i32) -> (i32, i32, i32) {
    %c0_i32 = arith.constant 0 : i32
    %c0_i32_0 = arith.constant 0 : i32
    %c0_i32_1 = arith.constant 0 : i32
    %c0_i32_2 = arith.constant 0 : i32
    return %c0_i32, %c0_i32_0, %c0_i32_1 : i32, i32, i32
  }
  func.func @transform_6(%arg0: i32) -> (i32, i32) {
    %c0_i32 = arith.constant 0 : i32
    %c0_i32_0 = arith.constant 0 : i32
    %c0_i32_1 = arith.constant 0 : i32
    return %c0_i32, %c0_i32_0 : i32, i32
  }
}

</mosaic_0001>

<bundles_post_ra>
// kernel: bert_retriever_forward.1
= control target key start
LH: loop header
LB: loop body
LE: loop exit
PB: predicated region body
PF: predicated region fallthrough
CT: control target
= control target key end

     0   :  { %vm30_vm0 = vcmask 261120   ;;  %v3452_v8 = vmov 32.0   ;;  %s3453_s17 = smov 96   ;;  %s3454_s18 = smov 64   ;;  %vm213_vm14 = vcmask 64512   ;;  %vm374_vm15 = vcmask 1043456   ;;  %s4447_s0 = inlined_call_operand.vmem [shape: f32[32,32], index: 0, kind: input, shape index: {}]   ;;  %s4448_s2 = inlined_call_operand.vmem [shape: f32[2,32], index: 2, kind: input, shape index: {}]   ;;  %s4449_s5 = inlined_call_operand.vmem [shape: f32[2,1,352], index: 5, kind: input, shape index: {}]   ;;  %s4450_s3 = inlined_call_operand.vmem [shape: bf16[2,32,192], index: 3, kind: input, shape index: {}]   ;;  %s4451_s1 = inlined_call_operand.vmem [shape: f32[4,8], index: 1, kind: input, shape index: {}]   ;;  %s4452_s4 = inlined_call_operand.vmem [shape: bf16[2,64,32], index: 4, kind: input, shape index: {}]   ;;  %s4453_s6 = inlined_call_operand.vmem [shape: f32[4,32], index: 6, kind: output, shape index: {}]  }
   0x1   :  { %v26_v0 = vld [vmem:[%s4447_s0 + $0x10] sm:$0xff]  ;;  %v24_v1 = vld [vmem:[%s4447_s0] sm:$0xff]  ;;  %v25_v4 = vld [vmem:[%s4447_s0 + $0x8] sm:$0xff]  ;;  %3264 = vrcp.f32 %v3452_v8  ;;  %s3456_s21 = smov 120   ;;  %s3457_s22 = smov 56  }
   0x2   :  { %v37_v2 = vsel %vm30_vm0, %v26_v0, 0.0  ;;  %v31_v3 = vsel %vm30_vm0, %v24_v1, 0.0  ;;  %v27_v5 = vld [vmem:[%s4447_s0 + $0x18] sm:$0xff]  ;;  %v34_v6 = vsel %vm30_vm0, %v25_v4, 0.0  ;;  %v3065_v35 = vld [vmem:[%s4450_s3 + $0x10] sm:$0xf] }
   0x3   :  { %38 = vadd.xlane.f32.xlu2 %v37_v2  ;;  %32 = vadd.xlane.f32.xlu0 %v31_v3  ;;  %v40_v7 = vsel %vm30_vm0, %v27_v5, 0.0  ;;  %v3223_v36 = vld [vmem:[%s4450_s3 + $0x14] sm:$0xf0]  ;;  %v3061_v42 = vld [vmem:[%s4450_s3] sm:$0xf]  ;;  %s3458_s23 = smov 80  }
   0x4   :  { %v3551_v37 = vor.u32 %v3223_v36, %v3065_v35  ;;  %v3222_v43 = vld [vmem:[%s4450_s3 + $0x4] sm:$0xf0]  ;;  %v3256_v8 = vld [vmem:[%s4448_s2] ss:$0 sm:$0xff]  ;;  %s3459_s24 = smov 112   ;;  %s3460_s25 = smov 48  }
   0x5   :  { %v3563_v46 = vor.u32 %v3222_v43, %v3061_v42  ;;  %s3461_s26 = smov 104   ;;  %s3462_s27 = smov 72  }
   0x6   :  { %191 = vmatpush.bf16.msra.mxu0 %v3551_v37  ;;  %3238 = vmatpush.bf16.msra.mxu1 %v3551_v37  ;;  %s3463_s28 = smov 40   ;;  %s3464_s0 = smov 8  }
   0x7   :  { %v3265_v9 = vpop.eup %3264  ;;  %s3465_s29 = smov 16   ;;  %s3466_s30 = smov 32  }
   0x8   :  { %v44_v10 = vmul.f32 32.0, %v3265_v9  ;;  %vm48_vm1 = vweird.f32 %v3265_v9  ;;  %s3467_s7 = smov 24  }
   0xa   :  { %v45_v11 = vsub.f32 1.0, %v44_v10  ;;  %192 = vmatpush.bf16.msra.mxu0 %v3563_v46  ;;  %3239 = vmatpush.bf16.msra.mxu1 %v3563_v46 }
   0xb   :  { %35 = vadd.xlane.f32.xlu0 %v34_v6  ;;  %41 = vadd.xlane.f32.xlu2 %v40_v7 }
   0xc   :  { %v46_v12 = vmul.f32 %v3265_v9, %v45_v11 }
   0xe   :  { %v47_v13 = vadd.f32 %v3265_v9, %v46_v12 }
  0x10   :  { %v3519_v14 = vsel %vm48_vm1, %v3265_v9, %v47_v13  ;;  %vm706_vm1 = vcmask 130112  }
  0x76   :  { %v39_v15 = vpop.xlane.xlu2 %38  ;;  %v33_v16 = vpop.xlane.xlu0 %32 }
  0x77   :  { %v52_v17 = vmul.f32 %v3519_v14, %v39_v15  ;;  %v50_v18 = vmul.f32 %v3519_v14, %v33_v16 }
  0x79   :  { %v3523_v19 = vsub.f32 %v26_v0, %v52_v17  ;;  %v3525_v20 = vsub.f32 %v24_v1, %v50_v18  ;;  %v3257_v18 = vld [vmem:[%s4448_s2 + $0x1] ss:$0 sm:$0xff] }
  0x7b   :  { %v60_v21 = vmul.f32 %v3523_v19, %v3523_v19  ;;  %v58_v22 = vmul.f32 %v3525_v20, %v3525_v20 }
  0x7d   :  { %v68_v23 = vsel %vm30_vm0, %v60_v21, 0.0  ;;  %v62_v24 = vsel %vm30_vm0, %v58_v22, 0.0 }
  0x7e   :  { %69 = vadd.xlane.f32.xlu0 %v68_v23  ;;  %63 = vadd.xlane.f32.xlu1 %v62_v24  ;;  %v36_v25 = vpop.xlane.xlu0 %35  ;;  %v42_v26 = vpop.xlane.xlu2 %41 }
  0x7f   :  { %v51_v27 = vmul.f32 %v3519_v14, %v36_v25  ;;  %v53_v28 = vmul.f32 %v3519_v14, %v42_v26 }
  0x81   :  { %v3535_v29 = vsub.f32 %v25_v4, %v51_v27  ;;  %v3537_v30 = vsub.f32 %v27_v5, %v53_v28 }
  0x83   :  { %v59_v31 = vmul.f32 %v3535_v29, %v3535_v29  ;;  %v61_v33 = vmul.f32 %v3537_v30, %v3537_v30 }
  0x85   :  { %v65_v32 = vsel %vm30_vm0, %v59_v31, 0.0  ;;  %v71_v34 = vsel %vm30_vm0, %v61_v33, 0.0 }
  0x86   :  { %66 = vadd.xlane.f32.xlu1 %v65_v32 }
  0x8e   :  { %72 = vadd.xlane.f32.xlu1 %v71_v34 }
  0xf1   :  { %v64_v38 = vpop.xlane.xlu1 %63  ;;  %v70_v39 = vpop.xlane.xlu0 %69 }
  0xf2   :  { %v74_v40 = vmul.f32 %v64_v38, %v3519_v14  ;;  %v76_v41 = vmul.f32 %v70_v39, %v3519_v14 }
  0xf4   :  { %v78_v44 = vadd.f32 1e-12, %v74_v40  ;;  %v80_v45 = vadd.f32 1e-12, %v76_v41 }
  0xf6   :  { %3266 = vrsqrt.f32 %v78_v44  ;;  %vm88_vm3 = vweird.f32 %v78_v44  ;;  %vm108_vm5 = vweird.f32 %v80_v45 }
  0xf7   :  { %3268 = vrsqrt.f32 %v80_v45 }
  0xf9   :  { %v67_v47 = vpop.xlane.xlu1 %66 }
  0xfa   :  { %v75_v48 = vmul.f32 %v67_v47, %v3519_v14 }
  0xfc   :  { %v3267_v49 = vpop.eup %3266  ;;  %v79_v50 = vadd.f32 1e-12, %v75_v48 }
  0xfd   :  { %v3269_v51 = vpop.eup %3268  ;;  %v83_v52 = vmul.f32 %v3267_v49, %v78_v44  ;;  %vm89_vm2 = vweird.f32 %v3267_v49 }
  0xfe   :  { %v103_v53 = vmul.f32 %v3269_v51, %v80_v45  ;;  %3270 = vrsqrt.f32 %v79_v50  ;;  %vm90_vm4 = vmor %vm88_vm3, %vm89_vm2  ;;  %vm109_vm6 = vweird.f32 %v3269_v51  ;;  %vm98_vm9 = vweird.f32 %v79_v50 }
  0xff   :  { %v84_v54 = vmul.f32 %v3267_v49, %v83_v52  ;;  %vm3573_vm8 = vmor %vm108_vm5, %vm109_vm6  ;;  %vm959_vm2 = vcmask 195712   ;;  %vm1212_vm3 = vcmask 261312  }
 0x100   :  { %v104_v56 = vmul.f32 %v3269_v51, %v103_v53 }
 0x101   :  { %v85_v55 = vmul.f32 0.5, %v84_v54  ;;  %v73_v57 = vpop.xlane.xlu1 %72 }
 0x102   :  { %v77_v58 = vmul.f32 %v73_v57, %v3519_v14  ;;  %v105_v63 = vmul.f32 0.5, %v104_v56 }
 0x103   :  { %v86_v59 = vsub.f32 1.5, %v85_v55 }
 0x104   :  { %v3271_v60 = vpop.eup %3270  ;;  %v81_v61 = vadd.f32 1e-12, %v77_v58  ;;  %v106_v3 = vsub.f32 1.5, %v105_v63 }
 0x105   :  { %v87_v62 = vmul.f32 %v3267_v49, %v86_v59  ;;  %v93_v0 = vmul.f32 %v3271_v60, %v79_v50  ;;  %vm99_vm7 = vweird.f32 %v3271_v60 }
 0x106   :  { %3272 = vrsqrt.f32 %v81_v61  ;;  %v107_v9 = vmul.f32 %v3269_v51, %v106_v3  ;;  %vm100_vm10 = vmor %vm98_vm9, %vm99_vm7  ;;  %vm118_vm11 = vweird.f32 %v81_v61 }
 0x107   :  { %v94_v1 = vmul.f32 %v3271_v60, %v93_v0  ;;  %v91_v2 = vsel %vm90_vm4, %v3267_v49, %v87_v62 }
 0x108   :  { %v122_v7 = vmul.f32 %v91_v2, %v3525_v20  ;;  %v111_v20 = vsel %vm3573_vm8, %v3269_v51, %v107_v9 }
 0x109   :  { %v95_v4 = vmul.f32 0.5, %v94_v1  ;;  %v124_v26 = vmul.f32 %v111_v20, %v3523_v19  ;;  %v3258_v19 = vld [vmem:[%s4449_s5] ss:$0 sm:$0xff] }
 0x10a   :  { %v127_v17 = vmul.f32 %v3256_v8, %v122_v7 }
 0x10b   :  { %v96_v5 = vsub.f32 1.5, %v95_v4  ;;  %v129_v32 = vmul.f32 %v3256_v8, %v124_v26  ;;  %v136_v4 = vld [vmem:[%s4451_s1] sm:$0xf]  ;;  %s3455_s1 = smov 88  }
 0x10c   :  { %v3273_v6 = vpop.eup %3272  ;;  %v3583_v24 = vadd.f32 %v3257_v18, %v127_v17 }
 0x10d   :  { %v97_v11 = vmul.f32 %v3271_v60, %v96_v5  ;;  %v113_v12 = vmul.f32 %v3273_v6, %v81_v61  ;;  %vm119_vm12 = vweird.f32 %v3273_v6  ;;  %v3592_v34 = vadd.f32 %v3257_v18, %v129_v32 }
 0x10e   :  { %vm120_vm13 = vmor %vm118_vm11, %vm119_vm12  ;;  %v137_v5 = vsub.f32 1.0, %v136_v4 }
 0x10f   :  { %v101_v13 = vsel %vm100_vm10, %v3271_v60, %v97_v11  ;;  %v114_v15 = vmul.f32 %v3273_v6, %v113_v12 }
 0x110   :  { %v123_v16 = vmul.f32 %v101_v13, %v3535_v29 }
 0x111   :  { %v115_v21 = vmul.f32 0.5, %v114_v15 }
 0x112   :  { %v128_v22 = vmul.f32 %v3256_v8, %v123_v16 }
 0x113   :  { %v116_v23 = vsub.f32 1.5, %v115_v21 }
 0x114   :  { %v3585_v25 = vadd.f32 %v3257_v18, %v128_v22 }
 0x115   :  { %v117_v27 = vmul.f32 %v3273_v6, %v116_v23 }
 0x116   :  { %v162_v28 = vpack.c.bf16 %v3585_v25, %v3583_v24 }
 0x117   :  { %v121_v29 = vsel %vm120_vm13, %v3273_v6, %v117_v27  ;;  %v138_v6 = vmul.f32 -1e+09, %v137_v5 }
 0x118   :  { %3067 = vmatmul.msk.bf16.vlgmr.msra.gmra.mxu0 %vm30_vm0, %v162_v28  ;;  %v125_v31 = vmul.f32 %v121_v29, %v3537_v30 }
 0x119   :  { %v140_v7 = vrot.slane %v138_v6, 1  ;;  %v3636_v15 = vperm.slane %v138_v6, 0  ;;  %v141_v22 = vrot.slane %v138_v6, 2  ;;  %v142_v28 = vrot.slane %v138_v6, 3 }
 0x11a   :  { %v130_v33 = vmul.f32 %v3256_v8, %v125_v31 }
 0x11b   :  { %v3632_v8 = vperm.slane %v140_v7, 0  ;;  %v3640_v23 = vperm.slane %v141_v22, 0 }
 0x11c   :  { %v3594_v35 = vadd.f32 %v3257_v18, %v130_v33 }
 0x11e   :  { %v163_v36 = vpack.c.bf16 %v3594_v35, %v3592_v34 }
 0x120   :  { %3068 = vmatmul.msk.bf16.vlgmr.msra.gmra.mxu1 %vm30_vm0, %v163_v36  ;;  %v3644_v36 = vperm.slane %v142_v28, 0 }
 0x195   :  { %v194_v38 = vpop.f32.mrf.mxu0 }
 0x196   :  { %v195_v39 = vadd.f32 %v3258_v19, %v194_v38 }
 0x198   :  { %v204_v40 = vpack.c.bf16 %v195_v39, %v195_v39 }
 0x19a   :  { %v209_v41 = vunpack.c.l.b16 %v204_v40 }
 0x19c   :  { %v3602_v30 = vpack.c.b16 %v209_v41, %v209_v41 }
 0x19d   :  { %v196_v42 = vpop.f32.mrf.mxu0  ;;  %v199_v43 = vpop.f32.mrf.mxu1 }
 0x19e   :  { %v197_v44 = vadd.f32 %v3258_v19, %v196_v42  ;;  %v200_v45 = vadd.f32 %v3258_v19, %v199_v43  ;;  %211 = vrot.lane.b32.xlu0 %v3602_v30, %s3453_s17 }
 0x1a0   :  { %v205_v47 = vpack.c.bf16 %v197_v44, %v197_v44  ;;  %v206_v48 = vpack.c.bf16 %v200_v45, %v200_v45 }
 0x1a2   :  { %v234_v49 = vunpack.c.l.b16 %v205_v47  ;;  %v258_v50 = vunpack.c.l.b16 %v206_v48 }
 0x1a4   :  { %v3606_v51 = vpack.c.b16 %v234_v49, %v234_v49  ;;  %v3608_v52 = vpack.c.b16 %v258_v50, %v258_v50 }
 0x1a5   :  { %v201_v53 = vpop.f32.mrf.mxu1 }
 0x1a6   :  { %v202_v54 = vadd.f32 %v3258_v19, %v201_v53  ;;  %236 = vrot.lane.b32.xlu2 %v3606_v51, %s3453_s17  ;;  %260 = vrot.lane.b32.xlu1 %v3608_v52, %s3453_s17 }
 0x1a8   :  { %v207_v55 = vpack.c.bf16 %v202_v54, %v202_v54 }
 0x1aa   :  { %v282_v56 = vunpack.c.l.b16 %v207_v55 }
 0x1ac   :  { %v3614_v57 = vpack.c.b16 %v282_v56, %v282_v56 }
 0x1ae   :  { %284 = vrot.lane.b32.xlu2 %v3614_v57, %s3453_s17  ;;  %391 = vrot.lane.b32.xlu1 %v3606_v51, %s3454_s18 }
 0x200   :  { %v237_v58 = vpop.permute.xlu2 %236 }
 0x201   :  { %v242_v59 = vsel %vm213_vm14, %v237_v58, 0 }
 0x202   :  { %251 = vmatpush.bf16.xpose.msra.mxu2 %v242_v59 }
 0x208   :  { %v285_v60 = vpop.permute.xlu2 %284 }
 0x209   :  { %3070 = vmatmul.msk.bf16.vlgmr.msra.gmra.mxu2 %vm213_vm14, %v205_v47  ;;  %v290_v63 = vsel %vm213_vm14, %v285_v60, 0 }
 0x210   :  { %v212_v61 = vpop.permute.xlu0 %211 }
 0x211   :  { %v218_v62 = vsel %vm213_vm14, %v212_v61, 0 }
 0x212   :  { %227 = vmatpush.bf16.xpose.msrb.mxu1 %v218_v62 }
 0x218   :  { %v261_v0 = vpop.permute.xlu1 %260 }
 0x219   :  { %3069 = vmatmul.msk.bf16.vlgmr.msrb.gmra.mxu1 %vm213_vm14, %v204_v40  ;;  %v266_v1 = vsel %vm213_vm14, %v261_v0, 0 }
 0x21a   :  { %299 = vmatpush.bf16.xpose.msra.mxu1 %v290_v63  ;;  %275 = vmatpush.bf16.xpose.msra.mxu3 %v266_v1 }
 0x220   :  { %v392_v2 = vpop.permute.xlu1 %391 }
 0x221   :  { %3071 = vmatmul.msk.bf16.vlgmr.msra.gmra.mxu3 %vm213_vm14, %v206_v48  ;;  %v397_v3 = vsel %vm374_vm15, %v392_v2, 0 }
 0x222   :  { %406 = vmatpush.bf16.msrb.mxu3 %v397_v3 }
 0x229   :  { %3072 = vmatmul.msk.bf16.vlgmr.msra.gmra.mxu1 %vm213_vm14, %v207_v55 }
 0x28c   :  { %v253_v9 = vpop.f32.mrf.mxu2 }
 0x28d   :  { %v306_v10 = vmul.f32 0.35355338, %v253_v9 }
 0x28f   :  { %v318_v11 = vadd.f32 %v3632_v8, %v306_v10 }
 0x291   :  { %v324_v12 = vsel %vm213_vm14, %v318_v11, -inf }
 0x292   :  { %325 = vmax.xlane.f32.xlu2 %v324_v12 }
 0x294   :  { %v255_v13 = vpop.f32.mrf.mxu2 }
 0x296   :  { %v229_v16 = vpop.f32.mrf.mxu1 }
 0x297   :  { %v305_v17 = vmul.f32 0.35355338, %v229_v16 }
 0x299   :  { %v317_v18 = vadd.f32 %v3636_v15, %v305_v17 }
 0x29b   :  { %v321_v20 = vsel %vm213_vm14, %v317_v18, -inf }
 0x29c   :  { %322 = vmax.xlane.f32.xlu0 %v321_v20 }
 0x29e   :  { %v231_v21 = vpop.f32.mrf.mxu1 }
 0x2a4   :  { %v277_v26 = vpop.f32.mrf.mxu3 }
 0x2a5   :  { %v307_v27 = vmul.f32 0.35355338, %v277_v26 }
 0x2a6   :  { %v301_v29 = vpop.f32.mrf.mxu1 }
 0x2a7   :  { %v319_v31 = vadd.f32 %v3640_v23, %v307_v27  ;;  %v308_v32 = vmul.f32 0.35355338, %v301_v29 }
 0x2a9   :  { %v327_v33 = vsel %vm213_vm14, %v319_v31, -inf  ;;  %v320_v38 = vadd.f32 %v3644_v36, %v308_v32 }
 0x2aa   :  { %369 = vrot.lane.b32.xlu2 %v3602_v30, %s3454_s18  ;;  %328 = vmax.xlane.f32.xlu0 %v327_v33 }
 0x2ab   :  { %v330_v40 = vsel %vm213_vm14, %v320_v38, -inf }
 0x2ac   :  { %v279_v19 = vpop.f32.mrf.mxu3 }
 0x2ae   :  { %v303_v39 = vpop.f32.mrf.mxu1 }
 0x2b2   :  { %483 = vrot.lane.b32.xlu2 %v3606_v51, %s3455_s1  ;;  %331 = vmax.xlane.f32.xlu0 %v330_v40 }
 0x2ba   :  { %481 = vrot.lane.b32.xlu2 %v3606_v51, %s3456_s21 }
 0x305   :  { %v326_v41 = vpop.xlane.xlu2 %325 }
 0x306   :  { %v334_v42 = vsub.f32 %v318_v11, %v326_v41 }
 0x308   :  { %v339_v43 = vmul.f32 1.442695, %v334_v42 }
 0x30a   :  { %3274 = vpow2.f32 %v339_v43 }
 0x30d   :  { %v370_v44 = vpop.permute.xlu2 %369 }
 0x30e   :  { %v376_v45 = vsel %vm374_vm15, %v370_v44, 0 }
 0x30f   :  { %385 = vmatpush.bf16.msrb.mxu2 %v376_v45  ;;  %v323_v47 = vpop.xlane.xlu0 %322 }
 0x310   :  { %v3275_v48 = vpop.eup %3274  ;;  %v333_v49 = vsub.f32 %v317_v18, %v323_v47 }
 0x311   :  { %v348_v50 = vsel %vm213_vm14, %v3275_v48, 0.0 }
 0x312   :  { %v337_v53 = vmul.f32 1.442695, %v333_v49  ;;  %349 = vadd.xlane.f32.xlu0 %v348_v50 }
 0x314   :  { %3276 = vpow2.f32 %v337_v53 }
 0x315   :  { %v484_v54 = vpop.permute.xlu2 %483 }
 0x316   :  { %v489_v55 = vsel %vm213_vm14, %v484_v54, 0 }
 0x317   :  { %498 = vmatpush.bf16.xpose.msra.mxu3 %v489_v55 }
 0x31a   :  { %v3277_v56 = vpop.eup %3276 }
 0x31b   :  { %v345_v58 = vsel %vm213_vm14, %v3277_v56, 0.0 }
 0x31c   :  { %346 = vadd.xlane.f32.xlu1 %v345_v58 }
 0x31d   :  { %v329_v59 = vpop.xlane.xlu0 %328  ;;  %v482_v18 = vpop.permute.xlu2 %481 }
 0x31e   :  { %v335_v1 = vsub.f32 %v319_v31, %v329_v59 }
 0x320   :  { %v341_v2 = vmul.f32 1.442695, %v335_v1 }
 0x325   :  { %v332_v60 = vpop.xlane.xlu0 %331 }
 0x326   :  { %v336_v61 = vsub.f32 %v320_v38, %v332_v60  ;;  %460 = vrot.lane.b32.xlu0 %v3602_v30, %s3455_s1 }
 0x328   :  { %v343_v62 = vmul.f32 1.442695, %v336_v61 }
 0x32a   :  { %3278 = vpow2.f32 %v343_v62 }
 0x32b   :  { %3280 = vpow2.f32 %v341_v2 }
 0x32e   :  { %412 = vrot.lane.b32.xlu0 %v3608_v52, %s3454_s18 }
 0x330   :  { %v3279_v63 = vpop.eup %3278 }
 0x331   :  { %v354_v0 = vsel %vm213_vm14, %v3279_v63, 0.0  ;;  %v3281_v3 = vpop.eup %3280 }
 0x332   :  { %355 = vadd.xlane.f32.xlu2 %v354_v0  ;;  %v351_v4 = vsel %vm213_vm14, %v3281_v3, 0.0 }
 0x335   :  { %458 = vrot.lane.b32.xlu1 %v3602_v30, %s3456_s21 }
 0x336   :  { %433 = vrot.lane.b32.xlu0 %v3614_v57, %s3454_s18 }
 0x33e   :  { %506 = vrot.lane.b32.xlu0 %v3608_v52, %s3455_s1 }
 0x346   :  { %529 = vrot.lane.b32.xlu0 %v3614_v57, %s3455_s1 }
 0x34a   :  { %627 = vrot.lane.b32.xlu2 %v3606_v51, %s3457_s22 }
 0x34e   :  { %504 = vrot.lane.b32.xlu0 %v3608_v52, %s3456_s21 }
 0x352   :  { %713 = vrot.lane.b32.xlu2 %v3602_v30, %s3458_s23 }
 0x35f   :  { %352 = vadd.xlane.f32.xlu1 %v351_v4 }
 0x378   :  { %527 = vrot.lane.b32.xlu1 %v3614_v57, %s3456_s21 }
 0x380   :  { %606 = vrot.lane.b32.xlu1 %v3602_v30, %s3457_s22 }
 0x385   :  { %v350_v5 = vpop.xlane.xlu0 %349 }
 0x386   :  { %3282 = vrcp.f32 %v350_v5 }
 0x38c   :  { %v3283_v6 = vpop.eup %3282 }
 0x38d   :  { %v362_v7 = vmul.f32 %v3283_v6, %v3275_v48 }
 0x38f   :  { %v347_v9 = vpop.xlane.xlu1 %346  ;;  %v366_v10 = vpack.c.bf16 %v362_v7, %v362_v7 }
 0x390   :  { %3284 = vrcp.f32 %v347_v9 }
 0x391   :  { %3074 = vmatmul.msk.bf16.vlgmr.msrb.gmra.mxu3 %vm213_vm14, %v366_v10 }
 0x396   :  { %v3285_v11 = vpop.eup %3284 }
 0x397   :  { %v361_v12 = vmul.f32 %v3285_v11, %v3277_v56 }
 0x398   :  { %v461_v13 = vpop.permute.xlu0 %460 }
 0x399   :  { %v466_v16 = vsel %vm213_vm14, %v461_v13, 0  ;;  %v365_v17 = vpack.c.bf16 %v361_v12, %v361_v12 }
 0x39a   :  { %475 = vmatpush.bf16.xpose.msra.mxu2 %v466_v16 }
 0x39b   :  { %3073 = vmatmul.msk.bf16.vlgmr.msrb.gmra.mxu2 %vm213_vm14, %v365_v17 }
 0x3a0   :  { %v413_v20 = vpop.permute.xlu0 %412 }
 0x3a1   :  { %3078 = vmatmul.msk.bf16.vlgmr.msra.gmra.mxu3 %vm213_vm14, %v482_v18  ;;  %v418_v21 = vsel %vm374_vm15, %v413_v20, 0 }
 0x3a2   :  { %427 = vmatpush.bf16.msrb.mxu0 %v418_v21 }
 0x3a5   :  { %v356_v22 = vpop.xlane.xlu2 %355 }
 0x3a6   :  { %3286 = vrcp.f32 %v356_v22 }
 0x3a7   :  { %v459_v28 = vpop.permute.xlu1 %458 }
 0x3a8   :  { %v434_v26 = vpop.permute.xlu0 %433 }
 0x3a9   :  { %v439_v27 = vsel %vm374_vm15, %v434_v26, 0 }
 0x3aa   :  { %448 = vmatpush.bf16.msrb.mxu1 %v439_v27 }
 0x3ab   :  { %3077 = vmatmul.msk.bf16.vlgmr.msra.gmra.mxu2 %vm213_vm14, %v459_v28 }
 0x3ac   :  { %v3287_v29 = vpop.eup %3286 }
 0x3ad   :  { %v364_v31 = vmul.f32 %v3287_v29, %v3279_v63  ;;  %v628_v32 = vpop.permute.xlu2 %627 }
 0x3ae   :  { %v633_v33 = vsel %vm374_vm15, %v628_v32, 0 }
 0x3af   :  { %v368_v19 = vpack.c.bf16 %v364_v31, %v364_v31  ;;  %642 = vmatpush.bf16.msrb.mxu3 %v633_v33 }
 0x3b0   :  { %v507_v38 = vpop.permute.xlu0 %506 }
 0x3b1   :  { %v512_v39 = vsel %vm213_vm14, %v507_v38, 0  ;;  %3076 = vmatmul.msk.bf16.vlgmr.msrb.gmra.mxu1 %vm213_vm14, %v368_v19 }
 0x3b2   :  { %521 = vmatpush.bf16.xpose.msra.mxu0 %v512_v39 }
 0x3b5   :  { %v714_v49 = vpop.permute.xlu2 %713 }
 0x3b6   :  { %v719_v54 = vsel %vm213_vm14, %v714_v49, 0 }
 0x3b8   :  { %v530_v40 = vpop.permute.xlu0 %529 }
 0x3b9   :  { %v535_v41 = vsel %vm213_vm14, %v530_v40, 0 }
 0x3ba   :  { %544 = vmatpush.bf16.xpose.msra.mxu1 %v535_v41 }
 0x3c0   :  { %v505_v48 = vpop.permute.xlu0 %504 }
 0x3d2   :  { %v353_v42 = vpop.xlane.xlu1 %352 }
 0x3d3   :  { %3288 = vrcp.f32 %v353_v42 }
 0x3d9   :  { %v3289_v43 = vpop.eup %3288 }
 0x3da   :  { %v363_v44 = vmul.f32 %v3289_v43, %v3281_v3 }
 0x3dc   :  { %v367_v45 = vpack.c.bf16 %v363_v44, %v363_v44 }
 0x3de   :  { %3075 = vmatmul.msk.bf16.vlgmr.msrb.gmra.mxu0 %vm213_vm14, %v367_v45 }
 0x3ea   :  { %v528_v47 = vpop.permute.xlu1 %527 }
 0x3eb   :  { %3080 = vmatmul.msk.bf16.vlgmr.msra.gmra.mxu1 %vm213_vm14, %v528_v47 }
 0x3ee   :  { %3079 = vmatmul.msk.bf16.vlgmr.msra.gmra.mxu0 %vm213_vm14, %v505_v48 }
 0x3f2   :  { %v607_v50 = vpop.permute.xlu1 %606 }
 0x3f3   :  { %v612_v53 = vsel %vm374_vm15, %v607_v50, 0 }
 0x3f4   :  { %621 = vmatpush.bf16.msrb.mxu2 %v612_v53 }
 0x3f8   :  { %728 = vmatpush.bf16.xpose.msra.mxu2 %v719_v54 }
 0x414   :  { %v408_v55 = vpop.f32.mrf.mxu3 }
 0x415   :  { %455 = vst.msk [vmem:[#allocation2 + $0x8] sm:$0xff] %vm213_vm14, %v408_v55 }
 0x41c   :  { %v410_v56 = vpop.f32.mrf.mxu3 }
 0x41e   :  { %v387_v58 = vpop.f32.mrf.mxu2 }
 0x41f   :  { %454 = vst.msk [vmem:[#allocation2] sm:$0xff] %vm213_vm14, %v387_v58 }
 0x424   :  { %v500_v59 = vpop.f32.mrf.mxu3 }
 0x425   :  { %v551_v60 = vmul.f32 0.35355338, %v500_v59 }
 0x426   :  { %v389_v61 = vpop.f32.mrf.mxu2 }
 0x427   :  { %v555_v62 = vadd.f32 %v551_v60, %v3632_v8 }
 0x429   :  { %v561_v63 = vsel %vm213_vm14, %v555_v62, -inf }
 0x42a   :  { %562 = vmax.xlane.f32.xlu2 %v561_v63 }
 0x42c   :  { %v502_v0 = vpop.f32.mrf.mxu3 }
 0x42e   :  { %v450_v1 = vpop.f32.mrf.mxu1  ;;  %v477_v2 = vpop.f32.mrf.mxu2 }
 0x42f   :  { %457 = vst.msk [vmem:[#allocation2 + $0x18] sm:$0xff] %vm213_vm14, %v450_v1  ;;  %v550_v3 = vmul.f32 0.35355338, %v477_v2 }
 0x431   :  { %v554_v4 = vadd.f32 %v550_v3, %v3636_v15 }
 0x433   :  { %v558_v5 = vsel %vm213_vm14, %v554_v4, -inf }
 0x434   :  { %559 = vmax.xlane.f32.xlu0 %v558_v5 }
 0x436   :  { %v452_v6 = vpop.f32.mrf.mxu1  ;;  %v479_v7 = vpop.f32.mrf.mxu2 }
 0x442   :  { %711 = vrot.lane.b32.xlu2 %v3602_v30, %s3459_s24 }
 0x45b   :  { %v429_v9 = vpop.f32.mrf.mxu0 }
 0x45c   :  { %456 = vst.msk [vmem:[#allocation2 + $0x10] sm:$0xff] %vm213_vm14, %v429_v9 }
 0x463   :  { %v431_v10 = vpop.f32.mrf.mxu0 }
 0x468   :  { %v546_v11 = vpop.f32.mrf.mxu1 }
 0x469   :  { %v553_v12 = vmul.f32 0.35355338, %v546_v11 }
 0x46b   :  { %v523_v13 = vpop.f32.mrf.mxu0  ;;  %v557_v16 = vadd.f32 %v553_v12, %v3644_v36 }
 0x46c   :  { %v552_v17 = vmul.f32 0.35355338, %v523_v13 }
 0x46d   :  { %v567_v18 = vsel %vm213_vm14, %v557_v16, -inf }
 0x46e   :  { %568 = vmax.xlane.f32.xlu0 %v567_v18  ;;  %v556_v20 = vadd.f32 %v552_v17, %v3640_v23 }
 0x470   :  { %v548_v21 = vpop.f32.mrf.mxu1  ;;  %v564_v22 = vsel %vm213_vm14, %v556_v20, -inf }
 0x471   :  { %565 = vmax.xlane.f32.xlu1 %v564_v22 }
 0x473   :  { %v525_v26 = vpop.f32.mrf.mxu0 }
 0x482   :  { %736 = vrot.lane.b32.xlu0 %v3606_v51, %s3458_s23 }
 0x49d   :  { %v563_v27 = vpop.xlane.xlu2 %562 }
 0x49e   :  { %v571_v31 = vsub.f32 %v555_v62, %v563_v27 }
 0x4a0   :  { %v576_v33 = vmul.f32 1.442695, %v571_v31 }
 0x4a5   :  { %v712_v56 = vpop.permute.xlu2 %711 }
 0x4a7   :  { %v560_v28 = vpop.xlane.xlu0 %559 }
 0x4a8   :  { %v570_v29 = vsub.f32 %v554_v4, %v560_v28 }
 0x4aa   :  { %v574_v32 = vmul.f32 1.442695, %v570_v29 }
 0x4ac   :  { %3290 = vpow2.f32 %v574_v32 }
 0x4ad   :  { %3292 = vpow2.f32 %v576_v33 }
 0x4b2   :  { %v3291_v19 = vpop.eup %3290 }
 0x4b3   :  { %v582_v38 = vsel %vm213_vm14, %v3291_v19, 0.0  ;;  %v3293_v39 = vpop.eup %3292 }
 0x4b4   :  { %583 = vadd.xlane.f32.xlu2 %v582_v38  ;;  %v585_v40 = vsel %vm213_vm14, %v3293_v39, 0.0 }
 0x4bc   :  { %586 = vadd.xlane.f32.xlu2 %v585_v40 }
 0x4d4   :  { %734 = vrot.lane.b32.xlu2 %v3606_v51, %s3459_s24 }
 0x4dc   :  { %648 = vrot.lane.b32.xlu2 %v3608_v52, %s3457_s22 }
 0x4e1   :  { %v569_v41 = vpop.xlane.xlu0 %568 }
 0x4e2   :  { %v573_v42 = vsub.f32 %v557_v16, %v569_v41 }
 0x4e4   :  { %v580_v43 = vmul.f32 1.442695, %v573_v42  ;;  %v566_v44 = vpop.xlane.xlu1 %565  ;;  %759 = vrot.lane.b32.xlu2 %v3608_v52, %s3458_s23 }
 0x4e5   :  { %v572_v45 = vsub.f32 %v556_v20, %v566_v44 }
 0x4e6   :  { %3294 = vpow2.f32 %v580_v43 }
 0x4e7   :  { %v578_v47 = vmul.f32 1.442695, %v572_v45 }
 0x4e9   :  { %3296 = vpow2.f32 %v578_v47 }
 0x4ec   :  { %v3295_v48 = vpop.eup %3294  ;;  %782 = vrot.lane.b32.xlu2 %v3614_v57, %s3458_s23 }
 0x4ed   :  { %v591_v49 = vsel %vm213_vm14, %v3295_v48, 0.0 }
 0x4ee   :  { %592 = vadd.xlane.f32.xlu1 %v591_v49 }
 0x4ef   :  { %v3297_v50 = vpop.eup %3296 }
 0x4f0   :  { %v588_v53 = vsel %vm213_vm14, %v3297_v50, 0.0 }
 0x4f1   :  { %589 = vadd.xlane.f32.xlu0 %v588_v53 }
 0x4f4   :  { %757 = vrot.lane.b32.xlu2 %v3608_v52, %s3459_s24  ;;  %v737_v54 = vpop.permute.xlu0 %736 }
 0x4f5   :  { %v742_v55 = vsel %vm213_vm14, %v737_v54, 0 }
 0x4f6   :  { %751 = vmatpush.bf16.xpose.msra.mxu3 %v742_v55 }
 0x507   :  { %669 = vrot.lane.b32.xlu1 %v3614_v57, %s3457_s22 }
 0x50f   :  { %780 = vrot.lane.b32.xlu1 %v3614_v57, %s3459_s24 }
 0x527   :  { %v584_v58 = vpop.xlane.xlu2 %583 }
 0x528   :  { %3298 = vrcp.f32 %v584_v58 }
 0x52e   :  { %v3299_v59 = vpop.eup %3298 }
 0x52f   :  { %v598_v60 = vmul.f32 %v3299_v59, %v3291_v19  ;;  %v587_v61 = vpop.xlane.xlu2 %586 }
 0x530   :  { %3300 = vrcp.f32 %v587_v61 }
 0x531   :  { %v602_v62 = vpack.c.bf16 %v598_v60, %v598_v60 }
 0x533   :  { %3081 = vmatmul.msk.bf16.vlgmr.msrb.gmra.mxu2 %vm213_vm14, %v602_v62 }
 0x536   :  { %v3301_v63 = vpop.eup %3300 }
 0x537   :  { %v599_v0 = vmul.f32 %v3301_v63, %v3293_v39  ;;  %v735_v1 = vpop.permute.xlu2 %734 }
 0x539   :  { %v603_v2 = vpack.c.bf16 %v599_v0, %v599_v0 }
 0x53b   :  { %3082 = vmatmul.msk.bf16.vlgmr.msrb.gmra.mxu3 %vm213_vm14, %v603_v2 }
 0x53f   :  { %v649_v3 = vpop.permute.xlu2 %648 }
 0x540   :  { %v654_v4 = vsel %vm374_vm15, %v649_v3, 0 }
 0x541   :  { %663 = vmatpush.bf16.msrb.mxu0 %v654_v4 }
 0x543   :  { %3085 = vmatmul.msk.bf16.vlgmr.msra.gmra.mxu2 %vm213_vm14, %v712_v56 }
 0x547   :  { %v760_v5 = vpop.permute.xlu2 %759 }
 0x548   :  { %v765_v6 = vsel %vm213_vm14, %v760_v5, 0 }
 0x549   :  { %774 = vmatpush.bf16.xpose.msra.mxu0 %v765_v6 }
 0x54b   :  { %3086 = vmatmul.msk.bf16.vlgmr.msra.gmra.mxu3 %vm213_vm14, %v735_v1 }
 0x54f   :  { %v783_v16 = vpop.permute.xlu2 %782 }
 0x550   :  { %v788_v21 = vsel %vm213_vm14, %v783_v16, 0 }
 0x557   :  { %v758_v26 = vpop.permute.xlu2 %757 }
 0x561   :  { %v593_v10 = vpop.xlane.xlu1 %592 }
 0x564   :  { %v590_v7 = vpop.xlane.xlu0 %589 }
 0x565   :  { %3302 = vrcp.f32 %v590_v7 }
 0x566   :  { %3304 = vrcp.f32 %v593_v10 }
 0x56b   :  { %v3303_v9 = vpop.eup %3302 }
 0x56c   :  { %v600_v11 = vmul.f32 %v3303_v9, %v3297_v50  ;;  %v3305_v13 = vpop.eup %3304 }
 0x56d   :  { %v601_v17 = vmul.f32 %v3305_v13, %v3295_v48 }
 0x56e   :  { %v604_v12 = vpack.c.bf16 %v600_v11, %v600_v11 }
 0x56f   :  { %v605_v22 = vpack.c.bf16 %v601_v17, %v601_v17 }
 0x570   :  { %3083 = vmatmul.msk.bf16.vlgmr.msrb.gmra.mxu0 %vm213_vm14, %v604_v12 }
 0x579   :  { %v670_v18 = vpop.permute.xlu1 %669 }
 0x57a   :  { %v675_v20 = vsel %vm374_vm15, %v670_v18, 0 }
 0x57b   :  { %684 = vmatpush.bf16.msrb.mxu1 %v675_v20 }
 0x57e   :  { %3084 = vmatmul.msk.bf16.vlgmr.msrb.gmra.mxu1 %vm213_vm14, %v605_v22 }
 0x57f   :  { %797 = vmatpush.bf16.xpose.msra.mxu1 %v788_v21 }
 0x580   :  { %3087 = vmatmul.msk.bf16.vlgmr.msra.gmra.mxu0 %vm213_vm14, %v758_v26 }
 0x581   :  { %v781_v27 = vpop.permute.xlu1 %780 }
 0x58e   :  { %3088 = vmatmul.msk.bf16.vlgmr.msra.gmra.mxu1 %vm213_vm14, %v781_v27 }
 0x5b6   :  { %v3745_v28 = vpop.f32.mrf.mxu2 }
 0x5be   :  { %v625_v29 = vpop.f32.mrf.mxu2  ;;  %v3747_v31 = vpop.f32.mrf.mxu3 }
 0x5c6   :  { %v646_v32 = vpop.f32.mrf.mxu3  ;;  %v730_v33 = vpop.f32.mrf.mxu2 }
 0x5c7   :  { %v803_v19 = vmul.f32 0.35355338, %v730_v33 }
 0x5c9   :  { %v807_v38 = vadd.f32 %v803_v19, %v3636_v15 }
 0x5cb   :  { %v811_v39 = vsel %vm213_vm14, %v807_v38, -inf }
 0x5cc   :  { %812 = vmax.xlane.f32.xlu2 %v811_v39 }
 0x5ce   :  { %v732_v40 = vpop.f32.mrf.mxu2  ;;  %v753_v41 = vpop.f32.mrf.mxu3 }
 0x5cf   :  { %v804_v61 = vmul.f32 0.35355338, %v753_v41 }
 0x5d1   :  { %v808_v1 = vadd.f32 %v804_v61, %v3632_v8 }
 0x5d3   :  { %v814_v4 = vsel %vm213_vm14, %v808_v1, -inf }
 0x5d6   :  { %v755_v42 = vpop.f32.mrf.mxu3 }
 0x5e4   :  { %880 = vrot.lane.b32.xlu2 %v3606_v51, %s3460_s25 }
 0x5ec   :  { %964 = vrot.lane.b32.xlu2 %v3602_v30, %s3461_s26 }
 0x5ed   :  { %v3755_v43 = vpop.f32.mrf.mxu0 }
 0x5f5   :  { %v667_v44 = vpop.f32.mrf.mxu0 }
 0x5fb   :  { %v3757_v45 = vpop.f32.mrf.mxu1 }
 0x5fd   :  { %v776_v47 = vpop.f32.mrf.mxu0 }
 0x5fe   :  { %v805_v48 = vmul.f32 0.35355338, %v776_v47 }
 0x600   :  { %v809_v49 = vadd.f32 %v805_v48, %v3640_v23 }
 0x602   :  { %v817_v50 = vsel %vm213_vm14, %v809_v49, -inf }
 0x603   :  { %818 = vmax.xlane.f32.xlu0 %v817_v50  ;;  %v688_v53 = vpop.f32.mrf.mxu1 }
 0x605   :  { %v778_v54 = vpop.f32.mrf.mxu0 }
 0x60b   :  { %v799_v55 = vpop.f32.mrf.mxu1 }
 0x60c   :  { %v806_v58 = vmul.f32 0.35355338, %v799_v55 }
 0x60e   :  { %v810_v59 = vadd.f32 %v806_v58, %v3644_v36 }
 0x610   :  { %v820_v63 = vsel %vm213_vm14, %v810_v59, -inf }
 0x613   :  { %v801_v56 = vpop.f32.mrf.mxu1 }
 0x617   :  { %859 = vrot.lane.b32.xlu0 %v3602_v30, %s3460_s25 }
 0x63f   :  { %v813_v60 = vpop.xlane.xlu2 %812 }
 0x640   :  { %v823_v62 = vsub.f32 %v807_v38, %v813_v60 }
 0x641   :  { %821 = vmax.xlane.f32.xlu0 %v820_v63 }
 0x642   :  { %v827_v0 = vmul.f32 1.442695, %v823_v62 }
 0x644   :  { %3306 = vpow2.f32 %v827_v0 }
 0x647   :  { %v881_v2 = vpop.permute.xlu2 %880 }
 0x648   :  { %v886_v3 = vsel %vm374_vm15, %v881_v2, 0 }
 0x649   :  { %895 = vmatpush.bf16.msrb.mxu3 %v886_v3  ;;  %815 = vmax.xlane.f32.xlu0 %v814_v4 }
 0x64a   :  { %v3307_v5 = vpop.eup %3306 }
 0x64b   :  { %v835_v6 = vsel %vm213_vm14, %v3307_v5, 0.0 }
 0x64c   :  { %836 = vadd.xlane.f32.xlu1 %v835_v6 }
 0x64f   :  { %v965_v48 = vpop.permute.xlu2 %964 }
 0x65d   :  { %989 = vrot.lane.b32.xlu0 %v3606_v51, %s3462_s27 }
 0x665   :  { %966 = vrot.lane.b32.xlu1 %v3602_v30, %s3462_s27 }
 0x676   :  { %v819_v7 = vpop.xlane.xlu0 %818 }
 0x677   :  { %v825_v9 = vsub.f32 %v809_v49, %v819_v7 }
 0x679   :  { %v831_v10 = vmul.f32 1.442695, %v825_v9 }
 0x67b   :  { %3308 = vpow2.f32 %v831_v10 }
 0x681   :  { %v3309_v11 = vpop.eup %3308 }
 0x682   :  { %v841_v12 = vsel %vm213_vm14, %v3309_v11, 0.0 }
 0x683   :  { %842 = vadd.xlane.f32.xlu2 %v841_v12 }
 0x689   :  { %v860_v13 = vpop.permute.xlu0 %859 }
 0x68a   :  { %v865_v16 = vsel %vm374_vm15, %v860_v13, 0 }
 0x68b   :  { %874 = vmatpush.bf16.msrb.mxu2 %v865_v16 }
 0x69b   :  { %1033 = vrot.lane.b32.xlu2 %v3614_v57, %s3461_s26 }
 0x6b4   :  { %v822_v17 = vpop.xlane.xlu0 %821 }
 0x6b5   :  { %v826_v18 = vsub.f32 %v810_v59, %v822_v17 }
 0x6b7   :  { %v833_v20 = vmul.f32 1.442695, %v826_v18 }
 0x6b9   :  { %3310 = vpow2.f32 %v833_v20 }
 0x6bc   :  { %v816_v21 = vpop.xlane.xlu0 %815 }
 0x6bd   :  { %v824_v22 = vsub.f32 %v808_v1, %v816_v21 }
 0x6bf   :  { %v3311_v26 = vpop.eup %3310  ;;  %v829_v27 = vmul.f32 1.442695, %v824_v22  ;;  %v837_v29 = vpop.xlane.xlu1 %836 }
 0x6c0   :  { %3312 = vrcp.f32 %v837_v29  ;;  %v844_v32 = vsel %vm213_vm14, %v3311_v26, 0.0 }
 0x6c1   :  { %3314 = vpow2.f32 %v829_v27  ;;  %845 = vadd.xlane.f32.xlu1 %v844_v32 }
 0x6c6   :  { %v3313_v33 = vpop.eup %3312 }
 0x6c7   :  { %v3315_v19 = vpop.eup %3314  ;;  %v851_v38 = vmul.f32 %v3313_v33, %v3307_v5 }
 0x6c8   :  { %v838_v39 = vsel %vm213_vm14, %v3315_v19, 0.0 }
 0x6c9   :  { %v855_v40 = vpack.c.bf16 %v851_v38, %v851_v38  ;;  %839 = vadd.xlane.f32.xlu0 %v838_v39 }
 0x6cb   :  { %3089 = vmatmul.msk.bf16.vlgmr.msrb.gmra.mxu2 %vm213_vm14, %v855_v40 }
 0x6cf   :  { %v990_v41 = vpop.permute.xlu0 %989 }
 0x6d0   :  { %v995_v42 = vsel %vm213_vm14, %v990_v41, 0 }
 0x6d1   :  { %1004 = vmatpush.bf16.xpose.msra.mxu3 %v995_v42 }
 0x6d7   :  { %v967_v44 = vpop.permute.xlu1 %966 }
 0x6d8   :  { %v972_v47 = vsel %vm213_vm14, %v967_v44, 0 }
 0x6d9   :  { %981 = vmatpush.bf16.xpose.msra.mxu2 %v972_v47 }
 0x6dd   :  { %987 = vrot.lane.b32.xlu0 %v3606_v51, %s3461_s26 }
 0x6e0   :  { %3093 = vmatmul.msk.bf16.vlgmr.msra.gmra.mxu2 %vm213_vm14, %v965_v48 }
 0x6e5   :  { %901 = vrot.lane.b32.xlu0 %v3608_v52, %s3460_s25 }
 0x6ed   :  { %922 = vrot.lane.b32.xlu0 %v3614_v57, %s3460_s25 }
 0x6f5   :  { %1012 = vrot.lane.b32.xlu0 %v3608_v52, %s3462_s27 }
 0x6f6   :  { %v843_v55 = vpop.xlane.xlu2 %842 }
 0x6fd   :  { %1035 = vrot.lane.b32.xlu0 %v3614_v57, %s3462_s27 }
 0x6fe   :  { %v1034_v20 = vpop.permute.xlu2 %1033 }
 0x705   :  { %1010 = vrot.lane.b32.xlu0 %v3608_v52, %s3461_s26 }
 0x734   :  { %v846_v59 = vpop.xlane.xlu1 %845 }
 0x73c   :  { %v840_v49 = vpop.xlane.xlu0 %839 }
 0x73d   :  { %3316 = vrcp.f32 %v840_v49 }
 0x73e   :  { %3318 = vrcp.f32 %v843_v55 }
 0x73f   :  { %3320 = vrcp.f32 %v846_v59 }
 0x743   :  { %v3317_v50 = vpop.eup %3316 }
 0x744   :  { %v852_v53 = vmul.f32 %v3317_v50, %v3315_v19  ;;  %v3319_v60 = vpop.eup %3318 }
 0x745   :  { %v853_v61 = vmul.f32 %v3319_v60, %v3309_v11  ;;  %v3321_v2 = vpop.eup %3320 }
 0x746   :  { %v856_v54 = vpack.c.bf16 %v852_v53, %v852_v53  ;;  %v854_v3 = vmul.f32 %v3321_v2, %v3311_v26 }
 0x747   :  { %v857_v1 = vpack.c.bf16 %v853_v61, %v853_v61 }
 0x748   :  { %3090 = vmatmul.msk.bf16.vlgmr.msrb.gmra.mxu3 %vm213_vm14, %v856_v54  ;;  %v858_v6 = vpack.c.bf16 %v854_v3, %v854_v3 }
 0x74e   :  { %v3796_v56 = vpop.f32.mrf.mxu2 }
 0x74f   :  { %v988_v58 = vpop.permute.xlu0 %987 }
 0x756   :  { %v878_v62 = vpop.f32.mrf.mxu2 }
 0x757   :  { %v902_v63 = vpop.permute.xlu0 %901 }
 0x758   :  { %v907_v0 = vsel %vm374_vm15, %v902_v63, 0  ;;  %3094 = vmatmul.msk.bf16.vlgmr.msra.gmra.mxu3 %vm213_vm14, %v988_v58 }
 0x759   :  { %916 = vmatpush.bf16.msrb.mxu0 %v907_v0 }
 0x75c   :  { %3091 = vmatmul.msk.bf16.vlgmr.msrb.gmra.mxu0 %vm213_vm14, %v857_v1 }
 0x75f   :  { %v923_v4 = vpop.permute.xlu0 %922 }
 0x760   :  { %v928_v5 = vsel %vm374_vm15, %v923_v4, 0 }
 0x761   :  { %937 = vmatpush.bf16.msrb.mxu1 %v928_v5 }
 0x763   :  { %v983_v7 = vpop.f32.mrf.mxu2 }
 0x764   :  { %v1056_v9 = vmul.f32 0.35355338, %v983_v7  ;;  %3092 = vmatmul.msk.bf16.vlgmr.msrb.gmra.mxu1 %vm213_vm14, %v858_v6 }
 0x766   :  { %v1060_v10 = vadd.f32 %v1056_v9, %v3636_v15 }
 0x767   :  { %v1013_v11 = vpop.permute.xlu0 %1012 }
 0x768   :  { %v1018_v12 = vsel %vm213_vm14, %v1013_v11, 0  ;;  %v1064_v13 = vsel %vm213_vm14, %v1060_v10, -inf }
 0x769   :  { %1065 = vmax.xlane.f32.xlu0 %v1064_v13  ;;  %1027 = vmatpush.bf16.xpose.msra.mxu0 %v1018_v12 }
 0x76b   :  { %v985_v16 = vpop.f32.mrf.mxu2 }
 0x76f   :  { %v1036_v17 = vpop.permute.xlu0 %1035 }
 0x770   :  { %v1041_v18 = vsel %vm213_vm14, %v1036_v17, 0 }
 0x771   :  { %1050 = vmatpush.bf16.xpose.msra.mxu1 %v1041_v18 }
 0x777   :  { %v1011_v21 = vpop.permute.xlu0 %1010 }
 0x778   :  { %3095 = vmatmul.msk.bf16.vlgmr.msra.gmra.mxu0 %vm213_vm14, %v1011_v21  ;;  %3096 = vmatmul.msk.bf16.vlgmr.msra.gmra.mxu1 %vm213_vm14, %v1034_v20 }
 0x77d   :  { %1133 = vrot.lane.b32.xlu0 %v3606_v51, %s3463_s28 }
 0x7cb   :  { %v3811_v22 = vpop.f32.mrf.mxu3 }
 0x7d3   :  { %v899_v26 = vpop.f32.mrf.mxu3 }
 0x7d9   :  { %v3813_v27 = vpop.f32.mrf.mxu0 }
 0x7db   :  { %v1006_v29 = vpop.f32.mrf.mxu3 }
 0x7dc   :  { %v1057_v32 = vmul.f32 0.35355338, %v1006_v29  ;;  %v1066_v33 = vpop.xlane.xlu0 %1065 }
 0x7dd   :  { %v1076_v19 = vsub.f32 %v1060_v10, %v1066_v33 }
 0x7de   :  { %v1061_v38 = vadd.f32 %v1057_v32, %v3632_v8 }
 0x7df   :  { %v1080_v39 = vmul.f32 1.442695, %v1076_v19 }
 0x7e0   :  { %v1067_v40 = vsel %vm213_vm14, %v1061_v38, -inf }
 0x7e1   :  { %3322 = vpow2.f32 %v1080_v39  ;;  %1068 = vmax.xlane.f32.xlu1 %v1067_v40  ;;  %v920_v41 = vpop.f32.mrf.mxu0  ;;  %v3817_v42 = vpop.f32.mrf.mxu1 }
 0x7e3   :  { %v1008_v51 = vpop.f32.mrf.mxu3 }
 0x7e7   :  { %v3819_v44 = vpop.eup %3322 }
 0x7e8   :  { %v1088_v47 = vsel %vm213_vm14, %v3819_v44, 0.0 }
 0x7e9   :  { %1089 = vadd.xlane.f32.xlu2 %v1088_v47  ;;  %v941_v48 = vpop.f32.mrf.mxu1 }
 0x7ef   :  { %v1134_v49 = vpop.permute.xlu0 %1133 }
 0x7f0   :  { %v1139_v50 = vsel %vm374_vm15, %v1134_v49, 0 }
 0x7f1   :  { %1148 = vmatpush.bf16.msrb.mxu3 %v1139_v50 }
 0x7f5   :  { %v1029_v53 = vpop.f32.mrf.mxu0  ;;  %v1052_v54 = vpop.f32.mrf.mxu1 }
 0x7f6   :  { %v1058_v55 = vmul.f32 0.35355338, %v1029_v53  ;;  %v1059_v59 = vmul.f32 0.35355338, %v1052_v54 }
 0x7f8   :  { %v1062_v58 = vadd.f32 %v1058_v55, %v3640_v23  ;;  %v1063_v63 = vadd.f32 %v1059_v59, %v3644_v36 }
 0x7fa   :  { %v1070_v60 = vsel %vm213_vm14, %v1062_v58, -inf  ;;  %v1073_v0 = vsel %vm213_vm14, %v1063_v63, -inf }
 0x7fb   :  { %1071 = vmax.xlane.f32.xlu1 %v1070_v60 }
 0x7fd   :  { %v1031_v61 = vpop.f32.mrf.mxu0  ;;  %v1054_v62 = vpop.f32.mrf.mxu1 }
 0x7fe   :  { %v3450_v62 = vld [vmem:[%s4449_s5] ss:$0 sm:$0xff] }
 0x801   :  { %1154 = vrot.lane.b32.xlu2 %v3608_v52, %s3463_s28 }
 0x803   :  { %1074 = vmax.xlane.f32.xlu1 %v1073_v0 }
 0x809   :  { %1175 = vrot.lane.b32.xlu2 %v3614_v57, %s3463_s28 }
 0x811   :  { %694 = vrot.lane.b32.xlu2 %v3745_v28, %s3464_s0 }
 0x819   :  { %947 = vrot.lane.b32.xlu2 %v3796_v56, %s3465_s29 }
 0x854   :  { %v1069_v1 = vpop.xlane.xlu1 %1068 }
 0x855   :  { %v1077_v2 = vsub.f32 %v1061_v38, %v1069_v1 }
 0x857   :  { %v1082_v3 = vmul.f32 1.442695, %v1077_v2 }
 0x859   :  { %3324 = vpow2.f32 %v1082_v3 }
 0x85c   :  { %v1090_v4 = vpop.xlane.xlu2 %1089 }
 0x85f   :  { %v3325_v52 = vpop.eup %3324 }
 0x860   :  { %v1091_v5 = vsel %vm213_vm14, %v3325_v52, 0.0 }
 0x861   :  { %1092 = vadd.xlane.f32.xlu1 %v1091_v5 }
 0x864   :  { %v1155_v6 = vpop.permute.xlu2 %1154 }
 0x865   :  { %v1160_v57 = vsel %vm374_vm15, %v1155_v6, 0 }
 0x866   :  { %1169 = vmatpush.bf16.msrb.mxu0 %v1160_v57 }
 0x86c   :  { %v1176_v7 = vpop.permute.xlu2 %1175 }
 0x86d   :  { %v1181_v28 = vsel %vm374_vm15, %v1176_v7, 0 }
 0x86e   :  { %v1072_v9 = vpop.xlane.xlu1 %1071  ;;  %1190 = vmatpush.bf16.msrb.mxu1 %v1181_v28 }
 0x86f   :  { %v1078_v18 = vsub.f32 %v1062_v58, %v1072_v9 }
 0x871   :  { %v1084_v20 = vmul.f32 1.442695, %v1078_v18 }
 0x874   :  { %v695_v56 = vpop.permute.xlu2 %694 }
 0x875   :  { %707 = vst.msk [vmem:[#allocation2] sm:$0xff] %vm706_vm1, %v695_v56 }
 0x876   :  { %v1075_v10 = vpop.xlane.xlu1 %1074 }
 0x877   :  { %v1079_v11 = vsub.f32 %v1063_v63, %v1075_v10 }
 0x879   :  { %v1086_v12 = vmul.f32 1.442695, %v1079_v11 }
 0x87a   :  { %1112 = vrot.lane.b32.xlu1 %v3602_v30, %s3463_s28 }
 0x87b   :  { %3326 = vpow2.f32 %v1086_v12 }
 0x87c   :  { %v948_v13 = vpop.permute.xlu2 %947  ;;  %3328 = vpow2.f32 %v1084_v20 }
 0x87d   :  { %960 = vst.msk [vmem:[#allocation2] sm:$0xff] %vm959_vm2, %v948_v13 }
 0x881   :  { %v3327_v16 = vpop.eup %3326 }
 0x882   :  { %v1097_v17 = vsel %vm213_vm14, %v3327_v16, 0.0  ;;  %v3329_v30 = vpop.eup %3328 }
 0x883   :  { %1098 = vadd.xlane.f32.xlu0 %v1097_v17  ;;  %v1094_v21 = vsel %vm213_vm14, %v3329_v30, 0.0 }
 0x897   :  { %949 = vrot.lane.b32.xlu0 %v3811_v22, %s3465_s29 }
 0x89f   :  { %1225 = vrot.lane.b32.xlu0 %v3551_v37, %s3466_s30 }
 0x8a4   :  { %1095 = vadd.xlane.f32.xlu1 %v1094_v21 }
 0x8a7   :  { %700 = vrot.lane.b32.xlu0 %v3757_v45, %s3464_s0 }
 0x8bd   :  { %696 = vrot.lane.b32.xlu1 %v3747_v31, %s3464_s0 }
 0x8c5   :  { %1223 = vrot.lane.b32.xlu1 %v3563_v46, %s3466_s30 }
 0x8cd   :  { %951 = vrot.lane.b32.xlu1 %v3813_v27, %s3465_s29 }
 0x8d4   :  { %v1093_v22 = vpop.xlane.xlu1 %1092 }
 0x8d5   :  { %3330 = vrcp.f32 %v1093_v22 }
 0x8d6   :  { %3332 = vrcp.f32 %v1090_v4 }
 0x8db   :  { %v3331_v26 = vpop.eup %3330 }
 0x8dc   :  { %v1105_v37 = vmul.f32 %v3331_v26, %v3325_v52  ;;  %v3333_v32 = vpop.eup %3332 }
 0x8dd   :  { %v1104_v45 = vmul.f32 %v3333_v32, %v3819_v44 }
 0x8de   :  { %v1109_v29 = vpack.c.bf16 %v1105_v37, %v1105_v37 }
 0x8df   :  { %v1108_v19 = vpack.c.bf16 %v1104_v45, %v1104_v45 }
 0x8e0   :  { %3098 = vmatmul.msk.bf16.vlgmr.msrb.gmra.mxu3 %vm213_vm14, %v1109_v29 }
 0x8ec   :  { %v1113_v33 = vpop.permute.xlu1 %1112 }
 0x8ed   :  { %v1118_v31 = vsel %vm374_vm15, %v1113_v33, 0 }
 0x8ee   :  { %1127 = vmatpush.bf16.msrb.mxu2 %v1118_v31 }
 0x8f1   :  { %3097 = vmatmul.msk.bf16.vlgmr.msrb.gmra.mxu2 %vm213_vm14, %v1108_v19 }
 0x8f6   :  { %v1099_v46 = vpop.xlane.xlu0 %1098 }
 0x8f7   :  { %3334 = vrcp.f32 %v1099_v46 }
 0x8fd   :  { %v3335_v27 = vpop.eup %3334 }
 0x8fe   :  { %v1107_v38 = vmul.f32 %v3335_v27, %v3327_v16 }
 0x900   :  { %v1111_v39 = vpack.c.bf16 %v1107_v38, %v1107_v38 }
 0x902   :  { %3100 = vmatmul.msk.bf16.vlgmr.msrb.gmra.mxu1 %vm213_vm14, %v1111_v39 }
 0x909   :  { %v950_v40 = vpop.permute.xlu0 %949 }
 0x911   :  { %v1226_v41 = vpop.permute.xlu0 %1225 }
 0x912   :  { %1244 = vmatpush.bf16.msra.mxu2 %v1226_v41 }
 0x917   :  { %v1096_v51 = vpop.xlane.xlu1 %1095 }
 0x918   :  { %3336 = vrcp.f32 %v1096_v51 }
 0x919   :  { %v701_v44 = vpop.permute.xlu0 %700 }
 0x91a   :  { %710 = vst.msk [vmem:[#allocation2 + $0x18] sm:$0xff] %vm706_vm1, %v701_v44 }
 0x91e   :  { %v3337_v47 = vpop.eup %3336 }
 0x91f   :  { %v1106_v48 = vmul.f32 %v3337_v47, %v3329_v30 }
 0x921   :  { %v1110_v49 = vpack.c.bf16 %v1106_v48, %v1106_v48 }
 0x923   :  { %3099 = vmatmul.msk.bf16.vlgmr.msrb.gmra.mxu0 %vm213_vm14, %v1110_v49 }
 0x92f   :  { %v697_v50 = vpop.permute.xlu1 %696 }
 0x930   :  { %708 = vst.msk [vmem:[#allocation2 + $0x8] sm:$0xff] %vm706_vm1, %v697_v50 }
 0x931   :  { %961 = vst.msk [vmem:[#allocation2 + $0x8] sm:$0xff] %vm959_vm2, %v950_v40 }
 0x937   :  { %v1224_v53 = vpop.permute.xlu1 %1223 }
 0x938   :  { %1245 = vmatpush.bf16.msra.mxu2 %v1224_v53 }
 0x93f   :  { %v952_v4 = vpop.permute.xlu1 %951 }
 0x963   :  { %v1150_v54 = vpop.f32.mrf.mxu3 }
 0x96b   :  { %v1152_v55 = vpop.f32.mrf.mxu3 }
 0x96c   :  { %v3109_v55 = vld [vmem:[%s4450_s3 + $0x14] sm:$0xf] }
 0x974   :  { %v1129_v58 = vpop.f32.mrf.mxu2 }
 0x975   :  { %1200 = vrot.lane.b32.xlu2 %v1129_v58, %s3467_s7  ;;  %v3225_v58 = vld [vmem:[%s4450_s3 + $0x18] sm:$0xf0] }
 0x97c   :  { %v1131_v59 = vpop.f32.mrf.mxu2 }
 0x97d   :  { %1202 = vrot.lane.b32.xlu2 %v1150_v54, %s3467_s7  ;;  %v3110_v59 = vor.u32 %v3225_v58, %v3109_v55 }
 0x97f   :  { %v1192_v60 = vpop.f32.mrf.mxu1  ;;  %1392 = vmatpush.bf16.msra.mxu3 %v3110_v59 }
 0x980   :  { %1206 = vrot.lane.b32.xlu1 %v1192_v60, %s3467_s7 }
 0x985   :  { %698 = vrot.lane.b32.xlu2 %v3755_v43, %s3464_s0 }
 0x987   :  { %v1194_v61 = vpop.f32.mrf.mxu1 }
 0x98d   :  { %953 = vrot.lane.b32.xlu2 %v3817_v42, %s3465_s29 }
 0x995   :  { %1229 = vrot.lane.b32.xlu2 %v3450_v62, %s3466_s30  ;;  %v3105_v62 = vld [vmem:[%s4450_s3 + $0x4] sm:$0xf] }
 0x9a0   :  { %v1171_v63 = vpop.f32.mrf.mxu0 }
 0x9a1   :  { %1204 = vrot.lane.b32.xlu0 %v1171_v63, %s3467_s7  ;;  %v3224_v63 = vld [vmem:[%s4450_s3 + $0x8] sm:$0xf0] }
 0x9a8   :  { %v1173_v0 = vpop.f32.mrf.mxu0 }
 0x9cf   :  { %v1201_v1 = vpop.permute.xlu2 %1200 }
 0x9d0   :  { %1213 = vst.msk [vmem:[#allocation2] sm:$0xff] %vm1212_vm3, %v1201_v1  ;;  %v3106_v1 = vor.u32 %v3224_v63, %v3105_v62  ;;  %v3226_v62 = vld [vmem:[%s4452_s4] sm:$0xff] }
 0x9d2   :  { %1393 = vmatpush.bf16.msra.mxu3 %v3106_v1 }
 0x9d7   :  { %v1203_v2 = vpop.permute.xlu2 %1202  ;;  %v1217_v3 = vld [vmem:[#allocation2] sm:$0xff] }
 0x9d8   :  { %1214 = vst.msk [vmem:[#allocation2 + $0x8] sm:$0xff] %vm1212_vm3, %v1203_v2 }
 0x9df   :  { %v699_v43 = vpop.permute.xlu2 %698  ;;  %v1218_v42 = vld [vmem:[#allocation2 + $0x8] sm:$0xff] }
 0x9e0   :  { %709 = vst.msk [vmem:[#allocation2 + $0x10] sm:$0xff] %vm706_vm1, %v699_v43  ;;  %v1221_v52 = vpack.c.bf16 %v1218_v42, %v1217_v3 }
 0x9e1   :  { %962 = vst.msk [vmem:[#allocation2 + $0x10] sm:$0xff] %vm959_vm2, %v952_v4 }
 0x9e2   :  { %3101 = vmatmul.msk.bf16.vlgmr.msra.gmra.mxu2 %vm30_vm0, %v1221_v52 }
 0x9e7   :  { %v954_v5 = vpop.permute.xlu2 %953 }
 0x9e8   :  { %963 = vst.msk [vmem:[#allocation2 + $0x18] sm:$0xff] %vm959_vm2, %v954_v5 }
 0x9ef   :  { %v1230_v56 = vpop.permute.xlu2 %1229 }
 0x9f2   :  { %v1207_v6 = vpop.permute.xlu1 %1206 }
 0x9f3   :  { %1216 = vst.msk [vmem:[#allocation2 + $0x18] sm:$0xff] %vm1212_vm3, %v1207_v6 }
 0x9fa   :  { %v1220_v28 = vld [vmem:[#allocation2 + $0x18] sm:$0xff] }
 0xa13   :  { %v1205_v57 = vpop.permute.xlu0 %1204 }
 0xa14   :  { %1215 = vst.msk [vmem:[#allocation2 + $0x10] sm:$0xff] %vm1212_vm3, %v1205_v57 }
 0xa1b   :  { %v1219_v7 = vld [vmem:[#allocation2 + $0x10] sm:$0xff] }
 0xa1c   :  { %v1222_v9 = vpack.c.bf16 %v1220_v28, %v1219_v7 }
 0xa1e   :  { %3102 = vmatmul.msk.bf16.gmra.mxu2 %vm30_vm0, %v1222_v9 }
 0xa65   :  { %v1247_v10 = vpop.f32.mrf.mxu2 }
 0xa66   :  { %v1248_v11 = vadd.f32 %v1247_v10, %v1230_v56 }
 0xa68   :  { %v1257_v12 = vadd.f32 %v1248_v11, %v3583_v24 }
 0xa6a   :  { %v1261_v13 = vsel %vm30_vm0, %v1257_v12, 0.0 }
 0xa6b   :  { %1262 = vadd.xlane.f32.xlu0 %v1261_v13 }
 0xa6d   :  { %v1249_v16 = vpop.f32.mrf.mxu2 }
 0xa6e   :  { %v1250_v17 = vadd.f32 %v1249_v16, %v1230_v56 }
 0xa70   :  { %v1258_v18 = vadd.f32 %v1250_v17, %v3585_v25  ;;  %v3898_v25 = vld [vmem:[%s4449_s5 + $0x1] ss:$0 sm:$0xff] }
 0xa72   :  { %v1264_v20 = vsel %vm30_vm0, %v1258_v18, 0.0 }
 0xa73   :  { %1265 = vadd.xlane.f32.xlu1 %v1264_v20 }
 0xaa1   :  { %v1252_v30 = vpop.f32.mrf.mxu2 }
 0xaa2   :  { %v1253_v21 = vadd.f32 %v1252_v30, %v1230_v56 }
 0xaa4   :  { %v1259_v22 = vadd.f32 %v1253_v21, %v3592_v34 }
 0xaa6   :  { %v1267_v26 = vsel %vm30_vm0, %v1259_v22, 0.0 }
 0xaa7   :  { %1268 = vadd.xlane.f32.xlu2 %v1267_v26 }
 0xaa9   :  { %v1254_v37 = vpop.f32.mrf.mxu2 }
 0xaaa   :  { %v1255_v29 = vadd.f32 %v1254_v37, %v1230_v56 }
 0xaac   :  { %v1260_v24 = vadd.f32 %v1255_v29, %v3594_v35 }
 0xaae   :  { %v1270_v32 = vsel %vm30_vm0, %v1260_v24, 0.0 }
 0xaaf   :  { %1271 = vadd.xlane.f32.xlu0 %v1270_v32 }
 0xac3   :  { %1356 = vrot.lane.b32.xlu0 %v3898_v25, %s3453_s17 }
 0xade   :  { %v1263_v45 = vpop.xlane.xlu0 %1262 }
 0xadf   :  { %v1273_v34 = vmul.f32 %v1263_v45, %v3519_v14 }
 0xae1   :  { %v1277_v33 = vsub.f32 %v1257_v12, %v1273_v34 }
 0xae3   :  { %v1281_v31 = vmul.f32 %v1277_v33, %v1277_v33 }
 0xae5   :  { %v1285_v19 = vsel %vm30_vm0, %v1281_v31, 0.0 }
 0xae6   :  { %1286 = vadd.xlane.f32.xlu1 %v1285_v19  ;;  %v1266_v35 = vpop.xlane.xlu1 %1265 }
 0xae7   :  { %v1274_v46 = vmul.f32 %v1266_v35, %v3519_v14 }
 0xae9   :  { %v1278_v27 = vsub.f32 %v1258_v18, %v1274_v46 }
 0xaeb   :  { %v1282_v38 = vmul.f32 %v1278_v27, %v1278_v27 }
 0xaed   :  { %v1288_v39 = vsel %vm30_vm0, %v1282_v38, 0.0 }
 0xaee   :  { %1289 = vadd.xlane.f32.xlu2 %v1288_v39 }
 0xb1a   :  { %v1269_v40 = vpop.xlane.xlu2 %1268 }
 0xb1b   :  { %v1275_v41 = vmul.f32 %v1269_v40, %v3519_v14 }
 0xb1d   :  { %v3907_v51 = vsub.f32 %v1259_v22, %v1275_v41 }
 0xb1f   :  { %v1283_v44 = vmul.f32 %v3907_v51, %v3907_v51 }
 0xb21   :  { %v1291_v47 = vsel %vm30_vm0, %v1283_v44, 0.0 }
 0xb22   :  { %v1272_v48 = vpop.xlane.xlu0 %1271  ;;  %1292 = vadd.xlane.f32.xlu1 %v1291_v47 }
 0xb23   :  { %v1276_v49 = vmul.f32 %v1272_v48, %v3519_v14 }
 0xb25   :  { %v3913_v50 = vsub.f32 %v1260_v24, %v1276_v49 }
 0xb27   :  { %v1284_v53 = vmul.f32 %v3913_v50, %v3913_v50 }
 0xb29   :  { %v1294_v54 = vsel %vm30_vm0, %v1284_v53, 0.0 }
 0xb2a   :  { %1295 = vadd.xlane.f32.xlu2 %v1294_v54 }
 0xb35   :  { %v1357_v20 = vpop.permute.xlu0 %1356 }
 0xb3b   :  { %1377 = vrot.lane.b32.xlu1 %v3898_v25, %s3454_s18 }
 0xb59   :  { %v1287_v60 = vpop.xlane.xlu1 %1286 }
 0xb5a   :  { %v1297_v61 = vmul.f32 %v1287_v60, %v3519_v14 }
 0xb5c   :  { %v1301_v0 = vadd.f32 1e-12, %v1297_v61 }
 0xb5e   :  { %3338 = vrsqrt.f32 %v1301_v0  ;;  %vm1311_vm5 = vweird.f32 %v1301_v0 }
 0xb61   :  { %v1290_v2 = vpop.xlane.xlu2 %1289 }
 0xb62   :  { %v1298_v43 = vmul.f32 %v1290_v2, %v3519_v14 }
 0xb64   :  { %v3339_v3 = vpop.eup %3338  ;;  %v1302_v42 = vadd.f32 1e-12, %v1298_v43 }
 0xb65   :  { %v1306_v4 = vmul.f32 %v3339_v3, %v1301_v0  ;;  %vm1312_vm4 = vweird.f32 %v3339_v3 }
 0xb66   :  { %3340 = vrsqrt.f32 %v1302_v42  ;;  %vm1313_vm6 = vmor %vm1311_vm5, %vm1312_vm4  ;;  %vm1321_vm8 = vweird.f32 %v1302_v42 }
 0xb67   :  { %v1307_v52 = vmul.f32 %v3339_v3, %v1306_v4 }
 0xb69   :  { %v1308_v5 = vmul.f32 0.5, %v1307_v52 }
 0xb6b   :  { %v1309_v6 = vsub.f32 1.5, %v1308_v5 }
 0xb6c   :  { %v3341_v57 = vpop.eup %3340 }
 0xb6d   :  { %v1310_v7 = vmul.f32 %v3339_v3, %v1309_v6  ;;  %v1316_v28 = vmul.f32 %v3341_v57, %v1302_v42  ;;  %vm1322_vm7 = vweird.f32 %v3341_v57 }
 0xb6e   :  { %vm1323_vm9 = vmor %vm1321_vm8, %vm1322_vm7 }
 0xb6f   :  { %v1317_v9 = vmul.f32 %v3341_v57, %v1316_v28  ;;  %v1314_v56 = vsel %vm1313_vm6, %v3339_v3, %v1310_v7  ;;  %vm1470_vm6 = vcmask 523264  }
 0xb70   :  { %v1345_v12 = vmul.f32 %v1314_v56, %v1277_v33 }
 0xb71   :  { %v1318_v10 = vmul.f32 0.5, %v1317_v9 }
 0xb72   :  { %v1352_v18 = vmul.f32 %v3898_v25, %v1345_v12 }
 0xb73   :  { %v1319_v11 = vsub.f32 1.5, %v1318_v10 }
 0xb74   :  { %v3936_v21 = vadd.f32 %v1357_v20, %v1352_v18 }
 0xb75   :  { %v1320_v13 = vmul.f32 %v3341_v57, %v1319_v11 }
 0xb77   :  { %v1324_v16 = vsel %vm1323_vm9, %v3341_v57, %v1320_v13 }
 0xb78   :  { %v1346_v17 = vmul.f32 %v1324_v16, %v1278_v27 }
 0xb7a   :  { %v1353_v30 = vmul.f32 %v3898_v25, %v1346_v17 }
 0xb7c   :  { %v3938_v22 = vadd.f32 %v1357_v20, %v1353_v30 }
 0xb7e   :  { %v1363_v26 = vpack.c.bf16 %v3938_v22, %v3936_v21 }
 0xb80   :  { %3111 = vmatmul.msk.bf16.vlgmr.msra.gmra.mxu3 %vm30_vm0, %v1363_v26 }
 0xb95   :  { %v1293_v37 = vpop.xlane.xlu1 %1292 }
 0xb96   :  { %v1299_v29 = vmul.f32 %v1293_v37, %v3519_v14 }
 0xb98   :  { %v1303_v24 = vadd.f32 1e-12, %v1299_v29 }
 0xb9a   :  { %3342 = vrsqrt.f32 %v1303_v24  ;;  %vm1331_vm11 = vweird.f32 %v1303_v24 }
 0xb9d   :  { %v1296_v32 = vpop.xlane.xlu2 %1295 }
 0xb9e   :  { %v1300_v45 = vmul.f32 %v1296_v32, %v3519_v14 }
 0xba0   :  { %v3343_v34 = vpop.eup %3342  ;;  %v1304_v33 = vadd.f32 1e-12, %v1300_v45 }
 0xba1   :  { %v1326_v31 = vmul.f32 %v3343_v34, %v1303_v24  ;;  %vm1332_vm10 = vweird.f32 %v3343_v34 }
 0xba2   :  { %3344 = vrsqrt.f32 %v1304_v33  ;;  %vm1333_vm12 = vmor %vm1331_vm11, %vm1332_vm10  ;;  %vm1341_vm4 = vweird.f32 %v1304_v33 }
 0xba3   :  { %v1327_v19 = vmul.f32 %v3343_v34, %v1326_v31 }
 0xba5   :  { %v1328_v35 = vmul.f32 0.5, %v1327_v19 }
 0xba7   :  { %v1329_v46 = vsub.f32 1.5, %v1328_v35 }
 0xba8   :  { %v3345_v27 = vpop.eup %3344 }
 0xba9   :  { %v1330_v38 = vmul.f32 %v3343_v34, %v1329_v46  ;;  %v1336_v39 = vmul.f32 %v3345_v27, %v1304_v33  ;;  %vm1342_vm13 = vweird.f32 %v3345_v27 }
 0xbaa   :  { %vm1343_vm5 = vmor %vm1341_vm4, %vm1342_vm13 }
 0xbab   :  { %v1337_v40 = vmul.f32 %v3345_v27, %v1336_v39  ;;  %v1334_v41 = vsel %vm1333_vm12, %v3343_v34, %v1330_v38 }
 0xbac   :  { %v1347_v48 = vmul.f32 %v1334_v41, %v3907_v51  ;;  %v3229_v51 = vld [vmem:[%s4452_s4 + $0x18] sm:$0xff] }
 0xbad   :  { %v1338_v44 = vmul.f32 0.5, %v1337_v40  ;;  %1481 = vmatpush.bf16.msra.mxu0 %v3229_v51  ;;  %v1378_v63 = vpop.permute.xlu1 %1377 }
 0xbae   :  { %v1354_v55 = vmul.f32 %v3898_v25, %v1347_v48 }
 0xbaf   :  { %v1339_v47 = vsub.f32 1.5, %v1338_v44 }
 0xbb0   :  { %v3949_v59 = vadd.f32 %v1357_v20, %v1354_v55 }
 0xbb1   :  { %v1340_v49 = vmul.f32 %v3345_v27, %v1339_v47 }
 0xbb3   :  { %v1344_v53 = vsel %vm1343_vm5, %v3345_v27, %v1340_v49 }
 0xbb4   :  { %v1348_v54 = vmul.f32 %v1344_v53, %v3913_v50  ;;  %v3228_v50 = vld [vmem:[%s4452_s4 + $0x10] sm:$0xff] }
 0xbb5   :  { %1482 = vmatpush.bf16.msra.mxu0 %v3228_v50 }
 0xbb6   :  { %v1355_v58 = vmul.f32 %v3898_v25, %v1348_v54  ;;  %v3227_v25 = vld [vmem:[%s4452_s4 + $0x8] sm:$0xff]  ;;  %v3260_v54 = vld [vmem:[%s4449_s5 + $0x2] ss:$0 sm:$0xff] }
 0xbb8   :  { %v3951_v60 = vadd.f32 %v1357_v20, %v1355_v58 }
 0xbb9   :  { %1483 = vmatpush.bf16.msra.mxu0 %v3227_v25 }
 0xbba   :  { %v1364_v61 = vpack.c.bf16 %v3951_v60, %v3949_v59 }
 0xbbc   :  { %3112 = vmatmul.msk.bf16.gmra.mxu3 %vm30_vm0, %v1364_v61 }
 0xbbd   :  { %1484 = vmatpush.bf16.msra.mxu0 %v3226_v62 }
 0xc03   :  { %v1395_v0 = vpop.f32.mrf.mxu3 }
 0xc04   :  { %v1396_v1 = vadd.f32 %v1395_v0, %v1378_v63 }
 0xc06   :  { %v1409_v2 = vmul.f32 0.044715, %v1396_v1  ;;  %v1405_v16 = vmul.f32 0.5, %v1396_v1 }
 0xc08   :  { %v1413_v43 = vmul.f32 %v1409_v2, %v1396_v1 }
 0xc0a   :  { %v1417_v3 = vmul.f32 %v1413_v43, %v1396_v1 }
 0xc0b   :  { %v1397_v42 = vpop.f32.mrf.mxu3 }
 0xc0c   :  { %v1421_v4 = vadd.f32 %v1417_v3, %v1396_v1  ;;  %v1398_v52 = vadd.f32 %v1397_v42, %v1378_v63 }
 0xc0e   :  { %v1410_v5 = vmul.f32 0.044715, %v1398_v52  ;;  %v1425_v57 = vmul.f32 0.7978846, %v1421_v4  ;;  %v1406_v12 = vmul.f32 0.5, %v1398_v52 }
 0xc10   :  { %v1414_v6 = vmul.f32 %v1410_v5, %v1398_v52  ;;  %3346 = vtanh.f32 %v1425_v57 }
 0xc12   :  { %v1418_v7 = vmul.f32 %v1414_v6, %v1398_v52 }
 0xc14   :  { %v1422_v28 = vadd.f32 %v1418_v7, %v1398_v52 }
 0xc16   :  { %v1426_v9 = vmul.f32 0.7978846, %v1422_v28  ;;  %v3347_v56 = vpop.eup %3346 }
 0xc17   :  { %v1433_v10 = vadd.f32 1.0, %v3347_v56 }
 0xc18   :  { %3348 = vtanh.f32 %v1426_v9 }
 0xc19   :  { %v1437_v17 = vmul.f32 %v1433_v10, %v1405_v16 }
 0xc1e   :  { %v3349_v11 = vpop.eup %3348 }
 0xc1f   :  { %v1434_v13 = vadd.f32 1.0, %v3349_v11 }
 0xc21   :  { %v1438_v18 = vmul.f32 %v1434_v13, %v1406_v12 }
 0xc23   :  { %v1441_v20 = vpack.c.bf16 %v1438_v18, %v1437_v17 }
 0xc25   :  { %3129 = vmatmul.msk.bf16.vlgmr.msra.gmra.mxu0 %vm1470_vm6, %v1441_v20 }
 0xc3f   :  { %v1400_v30 = vpop.f32.mrf.mxu3 }
 0xc40   :  { %v1401_v26 = vadd.f32 %v1400_v30, %v1378_v63 }
 0xc42   :  { %v1411_v37 = vmul.f32 0.044715, %v1401_v26  ;;  %v1407_v41 = vmul.f32 0.5, %v1401_v26 }
 0xc44   :  { %v1415_v29 = vmul.f32 %v1411_v37, %v1401_v26  ;;  %v3231_v37 = vld [vmem:[%s4450_s3 + $0x34] sm:$0xf0] }
 0xc46   :  { %v1419_v24 = vmul.f32 %v1415_v29, %v1401_v26 }
 0xc47   :  { %v1402_v32 = vpop.f32.mrf.mxu3 }
 0xc48   :  { %v1403_v45 = vadd.f32 %v1402_v32, %v1378_v63  ;;  %v1423_v34 = vadd.f32 %v1419_v24, %v1401_v26  ;;  %v3156_v26 = vld [vmem:[%s4450_s3 + $0x30] sm:$0xf] }
 0xc49   :  { %v4005_v29 = vor.u32 %v3231_v37, %v3156_v26 }
 0xc4a   :  { %v1412_v33 = vmul.f32 0.044715, %v1403_v45  ;;  %v1427_v19 = vmul.f32 0.7978846, %v1423_v34  ;;  %v1408_v44 = vmul.f32 0.5, %v1403_v45 }
 0xc4b   :  { %1653 = vmatpush.bf16.msra.mxu1 %v4005_v29  ;;  %v3230_v34 = vld [vmem:[%s4450_s3 + $0x24] sm:$0xf0] }
 0xc4c   :  { %v1416_v31 = vmul.f32 %v1412_v33, %v1403_v45  ;;  %3350 = vtanh.f32 %v1427_v19 }
 0xc4e   :  { %v1420_v35 = vmul.f32 %v1416_v31, %v1403_v45 }
 0xc50   :  { %v1424_v46 = vadd.f32 %v1420_v35, %v1403_v45  ;;  %v3152_v45 = vld [vmem:[%s4450_s3 + $0x20] sm:$0xf] }
 0xc51   :  { %v4015_v31 = vor.u32 %v3230_v34, %v3152_v45 }
 0xc52   :  { %v1428_v27 = vmul.f32 0.7978846, %v1424_v46  ;;  %v3351_v38 = vpop.eup %3350 }
 0xc53   :  { %v1435_v39 = vadd.f32 1.0, %v3351_v38  ;;  %1654 = vmatpush.bf16.msra.mxu1 %v4015_v31 }
 0xc54   :  { %3352 = vtanh.f32 %v1428_v27 }
 0xc55   :  { %v1439_v48 = vmul.f32 %v1435_v39, %v1407_v41 }
 0xc5a   :  { %v3353_v40 = vpop.eup %3352 }
 0xc5b   :  { %v1436_v47 = vadd.f32 1.0, %v3353_v40 }
 0xc5d   :  { %v1440_v49 = vmul.f32 %v1436_v47, %v1408_v44 }
 0xc5f   :  { %v1442_v53 = vpack.c.bf16 %v1440_v49, %v1439_v48 }
 0xc61   :  { %3130 = vmatmul.msk.bf16.gmra.mxu0 %vm1470_vm6, %v1442_v53 }
 0xca2   :  { %v1486_v55 = vpop.f32.mrf.mxu0 }
 0xca3   :  { %v1487_v58 = vadd.f32 %v3260_v54, %v1486_v55 }
 0xca5   :  { %v1496_v61 = vadd.f32 %v1487_v58, %v3936_v21 }
 0xca7   :  { %v1500_v51 = vsel %vm30_vm0, %v1496_v61, 0.0 }
 0xca8   :  { %1501 = vadd.xlane.f32.xlu2 %v1500_v51 }
 0xcaa   :  { %v1488_v50 = vpop.f32.mrf.mxu0 }
 0xcab   :  { %v1489_v25 = vadd.f32 %v3260_v54, %v1488_v50 }
 0xcad   :  { %v1497_v62 = vadd.f32 %v1489_v25, %v3938_v22 }
 0xcaf   :  { %v1503_v63 = vsel %vm30_vm0, %v1497_v62, 0.0 }
 0xcb0   :  { %1504 = vadd.xlane.f32.xlu2 %v1503_v63 }
 0xcde   :  { %v1491_v0 = vpop.f32.mrf.mxu0 }
 0xcdf   :  { %v1492_v1 = vadd.f32 %v3260_v54, %v1491_v0 }
 0xce1   :  { %v1498_v2 = vadd.f32 %v1492_v1, %v3949_v59 }
 0xce3   :  { %v1506_v43 = vsel %vm30_vm0, %v1498_v2, 0.0 }
 0xce4   :  { %1507 = vadd.xlane.f32.xlu0 %v1506_v43 }
 0xce6   :  { %v1493_v3 = vpop.f32.mrf.mxu0 }
 0xce7   :  { %v1494_v42 = vadd.f32 %v3260_v54, %v1493_v3 }
 0xce9   :  { %v1499_v21 = vadd.f32 %v1494_v42, %v3951_v60 }
 0xceb   :  { %v1509_v4 = vsel %vm30_vm0, %v1499_v21, 0.0 }
 0xcec   :  { %1510 = vadd.xlane.f32.xlu2 %v1509_v4 }
 0xcf8   :  { %1595 = vrot.lane.b32.xlu0 %v3260_v54, %s3454_s18 }
 0xd1b   :  { %v1502_v22 = vpop.xlane.xlu2 %1501 }
 0xd1c   :  { %v1512_v52 = vmul.f32 %v1502_v22, %v3519_v14 }
 0xd1e   :  { %v1516_v5 = vsub.f32 %v1496_v61, %v1512_v52 }
 0xd20   :  { %v1520_v6 = vmul.f32 %v1516_v5, %v1516_v5 }
 0xd22   :  { %v1524_v57 = vsel %vm30_vm0, %v1520_v6, 0.0 }
 0xd23   :  { %1525 = vadd.xlane.f32.xlu1 %v1524_v57  ;;  %v1505_v59 = vpop.xlane.xlu2 %1504 }
 0xd24   :  { %v1513_v7 = vmul.f32 %v1505_v59, %v3519_v14 }
 0xd26   :  { %v1517_v28 = vsub.f32 %v1497_v62, %v1513_v7 }
 0xd28   :  { %v1521_v9 = vmul.f32 %v1517_v28, %v1517_v28 }
 0xd2a   :  { %v1527_v60 = vsel %vm30_vm0, %v1521_v9, 0.0 }
 0xd2b   :  { %1528 = vadd.xlane.f32.xlu2 %v1527_v60 }
 0xd43   :  { %1588 = vrot.lane.b32.xlu2 %v3260_v54, %s3453_s17 }
 0xd57   :  { %v1508_v56 = vpop.xlane.xlu0 %1507 }
 0xd58   :  { %v1514_v10 = vmul.f32 %v1508_v56, %v3519_v14 }
 0xd5a   :  { %v3991_v16 = vsub.f32 %v1498_v2, %v1514_v10 }
 0xd5c   :  { %v1522_v20 = vmul.f32 %v3991_v16, %v3991_v16 }
 0xd5e   :  { %v1530_v30 = vsel %vm30_vm0, %v1522_v20, 0.0 }
 0xd5f   :  { %v1511_v11 = vpop.xlane.xlu2 %1510 }
 0xd60   :  { %v1515_v12 = vmul.f32 %v1511_v11, %v3519_v14 }
 0xd62   :  { %v3989_v13 = vsub.f32 %v1499_v21, %v1515_v12 }
 0xd64   :  { %v1523_v17 = vmul.f32 %v3989_v13, %v3989_v13 }
 0xd66   :  { %v1533_v18 = vsel %vm30_vm0, %v1523_v17, 0.0 }
 0xd67   :  { %1534 = vadd.xlane.f32.xlu1 %v1533_v18 }
 0xd6a   :  { %v1596_v63 = vpop.permute.xlu0 %1595 }
 0xd6c   :  { %1531 = vadd.xlane.f32.xlu2 %v1530_v30 }
 0xd96   :  { %v1526_v24 = vpop.xlane.xlu1 %1525 }
 0xd97   :  { %v1536_v32 = vmul.f32 %v1526_v24, %v3519_v14 }
 0xd99   :  { %v1540_v33 = vadd.f32 1e-12, %v1536_v32 }
 0xd9b   :  { %3354 = vrsqrt.f32 %v1540_v33  ;;  %vm1550_vm8 = vweird.f32 %v1540_v33 }
 0xd9e   :  { %v1529_v19 = vpop.xlane.xlu2 %1528 }
 0xd9f   :  { %v1537_v35 = vmul.f32 %v1529_v19, %v3519_v14 }
 0xda1   :  { %v3355_v46 = vpop.eup %3354  ;;  %v1541_v27 = vadd.f32 1e-12, %v1537_v35 }
 0xda2   :  { %v1545_v38 = vmul.f32 %v3355_v46, %v1540_v33  ;;  %vm1551_vm7 = vweird.f32 %v3355_v46 }
 0xda3   :  { %3356 = vrsqrt.f32 %v1541_v27  ;;  %vm1552_vm9 = vmor %vm1550_vm8, %vm1551_vm7  ;;  %vm1560_vm11 = vweird.f32 %v1541_v27 }
 0xda4   :  { %v1546_v39 = vmul.f32 %v3355_v46, %v1545_v38 }
 0xda6   :  { %v1547_v40 = vmul.f32 0.5, %v1546_v39  ;;  %v1589_v50 = vpop.permute.xlu2 %1588 }
 0xda8   :  { %v1548_v41 = vsub.f32 1.5, %v1547_v40 }
 0xda9   :  { %v3357_v44 = vpop.eup %3356 }
 0xdaa   :  { %v1549_v47 = vmul.f32 %v3355_v46, %v1548_v41  ;;  %v1555_v48 = vmul.f32 %v3357_v44, %v1541_v27  ;;  %vm1561_vm10 = vweird.f32 %v3357_v44 }
 0xdab   :  { %vm1562_vm12 = vmor %vm1560_vm11, %vm1561_vm10 }
 0xdac   :  { %v1556_v49 = vmul.f32 %v3357_v44, %v1555_v48  ;;  %v1553_v54 = vsel %vm1552_vm9, %v3355_v46, %v1549_v47 }
 0xdad   :  { %v1584_v58 = vmul.f32 %v1553_v54, %v1516_v5 }
 0xdae   :  { %v1557_v53 = vmul.f32 0.5, %v1556_v49 }
 0xdaf   :  { %v1591_v62 = vmul.f32 %v1589_v50, %v1584_v58 }
 0xdb0   :  { %v1558_v55 = vsub.f32 1.5, %v1557_v53 }
 0xdb1   :  { %v4019_v1 = vadd.f32 %v1596_v63, %v1591_v62 }
 0xdb2   :  { %v1559_v61 = vmul.f32 %v3357_v44, %v1558_v55 }
 0xdb4   :  { %v1563_v51 = vsel %vm1562_vm12, %v3357_v44, %v1559_v61 }
 0xdb5   :  { %v1585_v25 = vmul.f32 %v1563_v51, %v1517_v28 }
 0xdb7   :  { %v1592_v0 = vmul.f32 %v1589_v50, %v1585_v25 }
 0xdb9   :  { %v4021_v2 = vadd.f32 %v1596_v63, %v1592_v0 }
 0xdbb   :  { %v1624_v43 = vpack.c.bf16 %v4021_v2, %v4019_v1 }
 0xdbd   :  { %3158 = vmatmul.msk.bf16.vlgmr.msra.gmra.mxu1 %vm30_vm0, %v1624_v43 }
 0xdda   :  { %v1535_v3 = vpop.xlane.xlu1 %1534 }
 0xddb   :  { %v1539_v42 = vmul.f32 %v1535_v3, %v3519_v14 }
 0xddd   :  { %v1543_v21 = vadd.f32 1e-12, %v1539_v42 }
 0xddf   :  { %3358 = vrsqrt.f32 %v1543_v21  ;;  %v1532_v4 = vpop.xlane.xlu2 %1531  ;;  %vm1580_vm4 = vweird.f32 %v1543_v21 }
 0xde0   :  { %v1538_v22 = vmul.f32 %v1532_v4, %v3519_v14 }
 0xde2   :  { %v1542_v52 = vadd.f32 1e-12, %v1538_v22 }
 0xde4   :  { %3360 = vrsqrt.f32 %v1542_v52  ;;  %vm1570_vm8 = vweird.f32 %v1542_v52 }
 0xde5   :  { %v3359_v5 = vpop.eup %3358 }
 0xde6   :  { %v1575_v6 = vmul.f32 %v3359_v5, %v1543_v21  ;;  %vm1581_vm13 = vweird.f32 %v3359_v5 }
 0xde7   :  { %vm1582_vm5 = vmor %vm1580_vm4, %vm1581_vm13 }
 0xde8   :  { %v1576_v57 = vmul.f32 %v3359_v5, %v1575_v6 }
 0xdea   :  { %v3361_v59 = vpop.eup %3360  ;;  %v1577_v7 = vmul.f32 0.5, %v1576_v57 }
 0xdeb   :  { %v1565_v28 = vmul.f32 %v3361_v59, %v1542_v52  ;;  %vm1571_vm7 = vweird.f32 %v3361_v59 }
 0xdec   :  { %v1578_v9 = vsub.f32 1.5, %v1577_v7  ;;  %vm1572_vm9 = vmor %vm1570_vm8, %vm1571_vm7 }
 0xded   :  { %v1566_v60 = vmul.f32 %v3361_v59, %v1565_v28 }
 0xdee   :  { %v1579_v56 = vmul.f32 %v3359_v5, %v1578_v9 }
 0xdef   :  { %v1567_v10 = vmul.f32 0.5, %v1566_v60 }
 0xdf0   :  { %v1583_v11 = vsel %vm1582_vm5, %v3359_v5, %v1579_v56 }
 0xdf1   :  { %v1568_v12 = vsub.f32 1.5, %v1567_v10  ;;  %v1587_v17 = vmul.f32 %v1583_v11, %v3989_v13  ;;  %v3261_v13 = vld [vmem:[%s4449_s5 + $0x3] ss:$0 sm:$0xff] }
 0xdf3   :  { %v1569_v18 = vmul.f32 %v3361_v59, %v1568_v12  ;;  %v1594_v26 = vmul.f32 %v1589_v50, %v1587_v17 }
 0xdf5   :  { %v1573_v20 = vsel %vm1572_vm9, %v3361_v59, %v1569_v18  ;;  %v4032_v32 = vadd.f32 %v1596_v63, %v1594_v26 }
 0xdf6   :  { %v1586_v30 = vmul.f32 %v1573_v20, %v3991_v16 }
 0xdf8   :  { %v1593_v37 = vmul.f32 %v1589_v50, %v1586_v30 }
 0xdfa   :  { %v4030_v24 = vadd.f32 %v1596_v63, %v1593_v37 }
 0xdfc   :  { %v1625_v45 = vpack.c.bf16 %v4032_v32, %v4030_v24 }
 0xdfe   :  { %3159 = vmatmul.msk.bf16.gmra.mxu1 %vm30_vm0, %v1625_v45 }
 0xe3a   :  { %v1656_v34 = vpop.f32.mrf.mxu1 }
 0xe3b   :  { %v1657_v33 = vadd.f32 %v3261_v13, %v1656_v34 }
 0xe3d   :  { %v1666_v19 = vpack.c.bf16 %v1657_v33, %v1657_v33 }
 0xe3f   :  { %v1671_v35 = vunpack.c.l.b16 %v1666_v19 }
 0xe41   :  { %v4040_v16 = vpack.c.b16 %v1671_v35, %v1671_v35 }
 0xe42   :  { %v1658_v46 = vpop.f32.mrf.mxu1 }
 0xe43   :  { %v1659_v27 = vadd.f32 %v3261_v13, %v1658_v46  ;;  %1822 = vrot.lane.b32.xlu2 %v4040_v16, %s3454_s18  ;;  %1673 = vrot.lane.b32.xlu0 %v4040_v16, %s3453_s17 }
 0xe45   :  { %v1667_v38 = vpack.c.bf16 %v1659_v27, %v1659_v27 }
 0xe47   :  { %v1695_v39 = vunpack.c.l.b16 %v1667_v38 }
 0xe49   :  { %v4046_v40 = vpack.c.b16 %v1695_v39, %v1695_v39 }
 0xe4b   :  { %1697 = vrot.lane.b32.xlu1 %v4046_v40, %s3453_s17 }
 0xe7b   :  { %v1661_v41 = vpop.f32.mrf.mxu1 }
 0xe7c   :  { %v1662_v44 = vadd.f32 %v3261_v13, %v1661_v41 }
 0xe7e   :  { %v1668_v47 = vpack.c.bf16 %v1662_v44, %v1662_v44 }
 0xe80   :  { %v1719_v48 = vunpack.c.l.b16 %v1668_v47 }
 0xe82   :  { %v4050_v49 = vpack.c.b16 %v1719_v48, %v1719_v48 }
 0xe83   :  { %v1663_v53 = vpop.f32.mrf.mxu1 }
 0xe84   :  { %v1664_v54 = vadd.f32 %v3261_v13, %v1663_v53  ;;  %1721 = vrot.lane.b32.xlu0 %v4050_v49, %s3453_s17 }
 0xe86   :  { %v1669_v55 = vpack.c.bf16 %v1664_v54, %v1664_v54 }
 0xe88   :  { %v1743_v58 = vunpack.c.l.b16 %v1669_v55 }
 0xe8a   :  { %v4054_v61 = vpack.c.b16 %v1743_v58, %v1743_v58 }
 0xe8c   :  { %1745 = vrot.lane.b32.xlu0 %v4054_v61, %s3453_s17 }
 0xe9d   :  { %v1823_v51 = vpop.permute.xlu2 %1822 }
 0xe9e   :  { %v1828_v62 = vsel %vm374_vm15, %v1823_v51, 0 }
 0xeb5   :  { %v1674_v50 = vpop.permute.xlu0 %1673 }
 0xeb6   :  { %v1679_v25 = vsel %vm213_vm14, %v1674_v50, 0 }
 0xeb7   :  { %1688 = vmatpush.bf16.xpose.msrb.mxu2 %v1679_v25 }
 0xebd   :  { %v1698_v63 = vpop.permute.xlu1 %1697 }
 0xebe   :  { %v1703_v0 = vsel %vm213_vm14, %v1698_v63, 0  ;;  %3160 = vmatmul.msk.bf16.vlgmr.msrb.gmra.mxu2 %vm213_vm14, %v1666_v19 }
 0xebf   :  { %1837 = vmatpush.bf16.msra.mxu2 %v1828_v62  ;;  %1712 = vmatpush.bf16.xpose.msrb.mxu3 %v1703_v0 }
 0xec6   :  { %3161 = vmatmul.msk.bf16.vlgmr.msrb.gmra.mxu3 %vm213_vm14, %v1667_v38 }
 0xef6   :  { %v1722_v43 = vpop.permute.xlu0 %1721 }
 0xef7   :  { %v1727_v3 = vsel %vm213_vm14, %v1722_v43, 0 }
 0xef8   :  { %1736 = vmatpush.bf16.xpose.msrb.mxu0 %v1727_v3 }
 0xefe   :  { %v1746_v42 = vpop.permute.xlu0 %1745 }
 0xeff   :  { %v1751_v21 = vsel %vm213_vm14, %v1746_v42, 0  ;;  %3162 = vmatmul.msk.bf16.vlgmr.msrb.gmra.mxu0 %vm213_vm14, %v1668_v47 }
 0xf00   :  { %1760 = vmatpush.bf16.xpose.msrb.mxu1 %v1751_v21 }
 0xf07   :  { %3163 = vmatmul.msk.bf16.vlgmr.msrb.gmra.mxu1 %vm213_vm14, %v1669_v55 }
 0xf41   :  { %v1690_v4 = vpop.f32.mrf.mxu2 }
 0xf42   :  { %v1766_v22 = vmul.f32 0.35355338, %v1690_v4 }
 0xf44   :  { %v1770_v52 = vadd.f32 %v1766_v22, %v3636_v15 }
 0xf46   :  { %v1774_v5 = vsel %vm213_vm14, %v1770_v52, -inf }
 0xf47   :  { %1775 = vmax.xlane.f32.xlu0 %v1774_v5 }
 0xf49   :  { %v1692_v6 = vpop.f32.mrf.mxu2  ;;  %v1714_v57 = vpop.f32.mrf.mxu3 }
 0xf4a   :  { %v1767_v59 = vmul.f32 0.35355338, %v1714_v57 }
 0xf4c   :  { %v1771_v7 = vadd.f32 %v1767_v59, %v3632_v8 }
 0xf4e   :  { %v1777_v28 = vsel %vm213_vm14, %v1771_v7, -inf }
 0xf4f   :  { %1778 = vmax.xlane.f32.xlu2 %v1777_v28 }
 0xf51   :  { %v1716_v9 = vpop.f32.mrf.mxu3 }
 0xf5b   :  { %1843 = vrot.lane.b32.xlu0 %v4046_v40, %s3454_s18 }
 0xf63   :  { %1910 = vrot.lane.b32.xlu0 %v4040_v16, %s3456_s21 }
 0xf67   :  { %1935 = vrot.lane.b32.xlu2 %v4046_v40, %s3455_s1 }
 0xf6f   :  { %1933 = vrot.lane.b32.xlu2 %v4046_v40, %s3456_s21 }
 0xf7c   :  { %v1738_v60 = vpop.f32.mrf.mxu0 }
 0xf7d   :  { %v1768_v56 = vmul.f32 0.35355338, %v1738_v60 }
 0xf7f   :  { %v1772_v10 = vadd.f32 %v1768_v56, %v3640_v23 }
 0xf81   :  { %v1780_v11 = vsel %vm213_vm14, %v1772_v10, -inf }
 0xf82   :  { %1781 = vmax.xlane.f32.xlu1 %v1780_v11 }
 0xf84   :  { %v1740_v12 = vpop.f32.mrf.mxu0  ;;  %v1762_v17 = vpop.f32.mrf.mxu1 }
 0xf85   :  { %v1769_v20 = vmul.f32 0.35355338, %v1762_v17 }
 0xf87   :  { %v1773_v30 = vadd.f32 %v1769_v20, %v3644_v36 }
 0xf89   :  { %v1783_v26 = vsel %vm213_vm14, %v1773_v30, -inf }
 0xf8c   :  { %v1764_v18 = vpop.f32.mrf.mxu1 }
 0xf98   :  { %1784 = vmax.xlane.f32.xlu2 %v1783_v26 }
 0xf9b   :  { %1912 = vrot.lane.b32.xlu1 %v4040_v16, %s3455_s1 }
 0xfba   :  { %v1776_v37 = vpop.xlane.xlu0 %1775 }
 0xfbb   :  { %v1786_v45 = vsub.f32 %v1770_v52, %v1776_v37 }
 0xfbd   :  { %v1790_v13 = vmul.f32 1.442695, %v1786_v45 }
 0xfbf   :  { %3362 = vpow2.f32 %v1790_v13 }
 0xfc2   :  { %v1779_v34 = vpop.xlane.xlu2 %1778 }
 0xfc3   :  { %v1787_v33 = vsub.f32 %v1771_v7, %v1779_v34 }
 0xfc5   :  { %v3363_v19 = vpop.eup %3362  ;;  %v1792_v35 = vmul.f32 1.442695, %v1787_v33 }
 0xfc6   :  { %v1798_v46 = vsel %vm213_vm14, %v3363_v19, 0.0 }
 0xfc7   :  { %3364 = vpow2.f32 %v1792_v35  ;;  %1799 = vadd.xlane.f32.xlu2 %v1798_v46 }
 0xfca   :  { %v1936_v27 = vpop.permute.xlu2 %1935 }
 0xfcb   :  { %v1941_v47 = vsel %vm213_vm14, %v1936_v27, 0 }
 0xfcd   :  { %v3365_v38 = vpop.eup %3364  ;;  %v1844_v39 = vpop.permute.xlu0 %1843 }
 0xfce   :  { %v1849_v41 = vsel %vm374_vm15, %v1844_v39, 0  ;;  %v1801_v44 = vsel %vm213_vm14, %v3365_v38, 0.0 }
 0xfcf   :  { %1802 = vadd.xlane.f32.xlu2 %v1801_v44  ;;  %1858 = vmatpush.bf16.msra.mxu3 %v1849_v41 }
 0xfd2   :  { %v1934_v51 = vpop.permute.xlu2 %1933 }
 0xfd3   :  { %1950 = vmatpush.bf16.xpose.msrb.mxu3 %v1941_v47 }
 0xfd5   :  { %v1911_v60 = vpop.permute.xlu0 %1910 }
 0xfe7   :  { %1864 = vrot.lane.b32.xlu2 %v4050_v49, %s3454_s18 }
 0xfef   :  { %1885 = vrot.lane.b32.xlu2 %v4054_v61, %s3454_s18 }
 0xff5   :  { %v1782_v48 = vpop.xlane.xlu1 %1781 }
 0xff6   :  { %v1788_v53 = vsub.f32 %v1772_v10, %v1782_v48 }
 0xff7   :  { %1958 = vrot.lane.b32.xlu2 %v4050_v49, %s3455_s1 }
 0xff8   :  { %v1794_v54 = vmul.f32 1.442695, %v1788_v53 }
 0xffa   :  { %3366 = vpow2.f32 %v1794_v54 }
 0xfff   :  { %1981 = vrot.lane.b32.xlu2 %v4054_v61, %s3455_s1 }
0x1000   :  { %v3367_v55 = vpop.eup %3366 }
0x1001   :  { %v1804_v58 = vsel %vm213_vm14, %v3367_v55, 0.0 }
0x1002   :  { %1805 = vadd.xlane.f32.xlu0 %v1804_v58 }
0x1007   :  { %1956 = vrot.lane.b32.xlu2 %v4050_v49, %s3456_s21 }
0x100b   :  { %v1785_v50 = vpop.xlane.xlu2 %1784 }
0x100c   :  { %v1789_v25 = vsub.f32 %v1773_v30, %v1785_v50 }
0x100d   :  { %v1913_v62 = vpop.permute.xlu1 %1912 }
0x100e   :  { %v1796_v63 = vmul.f32 1.442695, %v1789_v25  ;;  %v1918_v0 = vsel %vm213_vm14, %v1913_v62, 0 }
0x100f   :  { %1927 = vmatpush.bf16.xpose.msrb.mxu2 %v1918_v0 }
0x1010   :  { %3368 = vpow2.f32 %v1796_v63 }
0x1016   :  { %v3369_v43 = vpop.eup %3368  ;;  %1979 = vrot.lane.b32.xlu0 %v4054_v61, %s3456_s21 }
0x1017   :  { %v1807_v3 = vsel %vm213_vm14, %v3369_v43, 0.0 }
0x1018   :  { %1808 = vadd.xlane.f32.xlu1 %v1807_v3 }
0x101e   :  { %2187 = vrot.lane.b32.xlu0 %v4046_v40, %s3458_s23 }
0x103a   :  { %v1800_v42 = vpop.xlane.xlu2 %1799 }
0x103b   :  { %3370 = vrcp.f32 %v1800_v42 }
0x1041   :  { %v3371_v21 = vpop.eup %3370 }
0x1042   :  { %v1814_v4 = vmul.f32 %v3371_v21, %v3363_v19  ;;  %v1803_v22 = vpop.xlane.xlu2 %1802 }
0x1043   :  { %3372 = vrcp.f32 %v1803_v22 }
0x1044   :  { %v1818_v52 = vpack.c.bf16 %v1814_v4, %v1814_v4 }
0x1046   :  { %3164 = vmatmul.msk.bf16.vlgmr.msra.gmra.mxu2 %vm213_vm14, %v1818_v52 }
0x1049   :  { %v3373_v5 = vpop.eup %3372 }
0x104a   :  { %v1815_v6 = vmul.f32 %v3373_v5, %v3365_v38  ;;  %v1865_v57 = vpop.permute.xlu2 %1864 }
0x104b   :  { %v1870_v59 = vsel %vm374_vm15, %v1865_v57, 0 }
0x104c   :  { %v1819_v7 = vpack.c.bf16 %v1815_v6, %v1815_v6  ;;  %1879 = vmatpush.bf16.msra.mxu0 %v1870_v59 }
0x104e   :  { %3165 = vmatmul.msk.bf16.vlgmr.msra.gmra.mxu3 %vm213_vm14, %v1819_v7 }
0x1052   :  { %v1886_v28 = vpop.permute.xlu2 %1885 }
0x1053   :  { %v1891_v9 = vsel %vm374_vm15, %v1886_v28, 0 }
0x1054   :  { %1900 = vmatpush.bf16.msra.mxu1 %v1891_v9 }
0x1056   :  { %3168 = vmatmul.msk.bf16.vlgmr.msrb.gmra.mxu2 %vm213_vm14, %v1911_v60 }
0x105a   :  { %v1959_v56 = vpop.permute.xlu2 %1958 }
0x105b   :  { %v1964_v10 = vsel %vm213_vm14, %v1959_v56, 0 }
0x105c   :  { %1973 = vmatpush.bf16.xpose.msrb.mxu0 %v1964_v10 }
0x105e   :  { %3169 = vmatmul.msk.bf16.vlgmr.msrb.gmra.mxu3 %vm213_vm14, %v1934_v51 }
0x1062   :  { %v1982_v11 = vpop.permute.xlu2 %1981 }
0x1063   :  { %v1987_v12 = vsel %vm213_vm14, %v1982_v11, 0 }
0x1064   :  { %1996 = vmatpush.bf16.xpose.msrb.mxu1 %v1987_v12 }
0x106a   :  { %v1957_v37 = vpop.permute.xlu2 %1956 }
0x1075   :  { %v1806_v17 = vpop.xlane.xlu0 %1805 }
0x1076   :  { %3374 = vrcp.f32 %v1806_v17 }
0x107c   :  { %v3375_v18 = vpop.eup %3374 }
0x107d   :  { %v1816_v20 = vmul.f32 %v3375_v18, %v3367_v55 }
0x107f   :  { %v1820_v30 = vpack.c.bf16 %v1816_v20, %v1816_v20 }
0x1081   :  { %3166 = vmatmul.msk.bf16.vlgmr.msra.gmra.mxu0 %vm213_vm14, %v1820_v30 }
0x1088   :  { %v1980_v33 = vpop.permute.xlu0 %1979 }
0x108b   :  { %v1809_v26 = vpop.xlane.xlu1 %1808 }
0x108c   :  { %3376 = vrcp.f32 %v1809_v26 }
0x1090   :  { %v2188_v10 = vpop.permute.xlu0 %2187 }
0x1091   :  { %3170 = vmatmul.msk.bf16.vlgmr.msrb.gmra.mxu0 %vm213_vm14, %v1957_v37  ;;  %v2193_v17 = vsel %vm213_vm14, %v2188_v10, 0 }
0x1092   :  { %v3377_v45 = vpop.eup %3376 }
0x1093   :  { %v1817_v13 = vmul.f32 %v3377_v45, %v3369_v43 }
0x1095   :  { %v1821_v34 = vpack.c.bf16 %v1817_v13, %v1817_v13 }
0x1097   :  { %3167 = vmatmul.msk.bf16.vlgmr.msra.gmra.mxu1 %vm213_vm14, %v1821_v34 }
0x10a7   :  { %3171 = vmatmul.msk.bf16.vlgmr.msrb.gmra.mxu1 %vm213_vm14, %v1980_v33 }
0x10c9   :  { %v1839_v19 = vpop.f32.mrf.mxu2 }
0x10ca   :  { %1906 = vst.msk [vmem:[#allocation2] sm:$0xff] %vm213_vm14, %v1839_v19 }
0x10d1   :  { %v1841_v35 = vpop.f32.mrf.mxu2  ;;  %v1860_v46 = vpop.f32.mrf.mxu3 }
0x10d2   :  { %1907 = vst.msk [vmem:[#allocation2 + $0x8] sm:$0xff] %vm213_vm14, %v1860_v46 }
0x10d9   :  { %v1862_v27 = vpop.f32.mrf.mxu3  ;;  %v1929_v38 = vpop.f32.mrf.mxu2 }
0x10da   :  { %v2002_v39 = vmul.f32 0.35355338, %v1929_v38 }
0x10dc   :  { %v2006_v41 = vadd.f32 %v2002_v39, %v3636_v15 }
0x10de   :  { %v2010_v44 = vsel %vm213_vm14, %v2006_v41, -inf }
0x10df   :  { %2011 = vmax.xlane.f32.xlu1 %v2010_v44 }
0x10e1   :  { %v1931_v47 = vpop.f32.mrf.mxu2  ;;  %v1952_v48 = vpop.f32.mrf.mxu3 }
0x10e2   :  { %v2003_v53 = vmul.f32 0.35355338, %v1952_v48 }
0x10e4   :  { %v2007_v54 = vadd.f32 %v2003_v53, %v3632_v8 }
0x10e6   :  { %v2013_v55 = vsel %vm213_vm14, %v2007_v54, -inf }
0x10e7   :  { %2014 = vmax.xlane.f32.xlu2 %v2013_v55 }
0x10e9   :  { %v1954_v58 = vpop.f32.mrf.mxu3 }
0x10fe   :  { %v1881_v51 = vpop.f32.mrf.mxu0 }
0x10ff   :  { %1908 = vst.msk [vmem:[#allocation2 + $0x10] sm:$0xff] %vm213_vm14, %v1881_v51  ;;  %2079 = vrot.lane.b32.xlu2 %v4046_v40, %s3457_s22 }
0x1106   :  { %v1883_v50 = vpop.f32.mrf.mxu0 }
0x1107   :  { %2185 = vrot.lane.b32.xlu2 %v4046_v40, %s3459_s24 }
0x110e   :  { %v1975_v25 = vpop.f32.mrf.mxu0 }
0x110f   :  { %v2004_v62 = vmul.f32 0.35355338, %v1975_v25 }
0x1111   :  { %v2008_v63 = vadd.f32 %v2004_v62, %v3640_v23 }
0x1113   :  { %v2016_v0 = vsel %vm213_vm14, %v2008_v63, -inf }
0x1114   :  { %v1902_v43 = vpop.f32.mrf.mxu1  ;;  %2017 = vmax.xlane.f32.xlu1 %v2016_v0 }
0x1115   :  { %1909 = vst.msk [vmem:[#allocation2 + $0x18] sm:$0xff] %vm213_vm14, %v1902_v43 }
0x1116   :  { %v1977_v3 = vpop.f32.mrf.mxu0 }
0x111c   :  { %v1904_v42 = vpop.f32.mrf.mxu1 }
0x1124   :  { %v1998_v21 = vpop.f32.mrf.mxu1 }
0x1125   :  { %v2005_v6 = vmul.f32 0.35355338, %v1998_v21 }
0x1127   :  { %v2009_v59 = vadd.f32 %v2005_v6, %v3644_v36 }
0x1129   :  { %v2019_v56 = vsel %vm213_vm14, %v2009_v59, -inf }
0x112c   :  { %v2000_v4 = vpop.f32.mrf.mxu1 }
0x112d   :  { %2058 = vrot.lane.b32.xlu1 %v4040_v16, %s3457_s22 }
0x1135   :  { %2164 = vrot.lane.b32.xlu1 %v4040_v16, %s3458_s23 }
0x1152   :  { %v2012_v22 = vpop.xlane.xlu1 %2011 }
0x1153   :  { %v2022_v52 = vsub.f32 %v2006_v41, %v2012_v22 }
0x1155   :  { %v2026_v5 = vmul.f32 1.442695, %v2022_v52 }
0x1157   :  { %3378 = vpow2.f32 %v2026_v5 }
0x115a   :  { %v2015_v57 = vpop.xlane.xlu2 %2014 }
0x115b   :  { %v2023_v7 = vsub.f32 %v2007_v54, %v2015_v57 }
0x115d   :  { %v3379_v28 = vpop.eup %3378  ;;  %v2028_v9 = vmul.f32 1.442695, %v2023_v7 }
0x115e   :  { %v2034_v60 = vsel %vm213_vm14, %v3379_v28, 0.0 }
0x115f   :  { %3380 = vpow2.f32 %v2028_v9  ;;  %2035 = vadd.xlane.f32.xlu0 %v2034_v60  ;;  %2020 = vmax.xlane.f32.xlu1 %v2019_v56 }
0x1162   :  { %v2080_v11 = vpop.permute.xlu2 %2079 }
0x1163   :  { %v2085_v12 = vsel %vm374_vm15, %v2080_v11, 0 }
0x1164   :  { %2094 = vmatpush.bf16.msra.mxu3 %v2085_v12 }
0x1165   :  { %v3381_v18 = vpop.eup %3380 }
0x1166   :  { %v2037_v20 = vsel %vm213_vm14, %v3381_v18, 0.0 }
0x1167   :  { %2038 = vadd.xlane.f32.xlu1 %v2037_v20 }
0x1168   :  { %2202 = vmatpush.bf16.xpose.msrb.mxu3 %v2193_v17 }
0x116a   :  { %v2186_v43 = vpop.permute.xlu2 %2185 }
0x1173   :  { %2100 = vrot.lane.b32.xlu0 %v4050_v49, %s3457_s22 }
0x117b   :  { %2121 = vrot.lane.b32.xlu0 %v4054_v61, %s3457_s22 }
0x1180   :  { %2162 = vrot.lane.b32.xlu1 %v4040_v16, %s3459_s24 }
0x1183   :  { %2210 = vrot.lane.b32.xlu0 %v4050_v49, %s3458_s23 }
0x1187   :  { %v2018_v30 = vpop.xlane.xlu1 %2017 }
0x1188   :  { %v2024_v26 = vsub.f32 %v2008_v63, %v2018_v30 }
0x118a   :  { %v2030_v37 = vmul.f32 1.442695, %v2024_v26 }
0x118b   :  { %2233 = vrot.lane.b32.xlu0 %v4054_v61, %s3458_s23 }
0x118c   :  { %3382 = vpow2.f32 %v2030_v37 }
0x1192   :  { %v3383_v34 = vpop.eup %3382 }
0x1193   :  { %2208 = vrot.lane.b32.xlu0 %v4050_v49, %s3459_s24  ;;  %v2040_v35 = vsel %vm213_vm14, %v3383_v34, 0.0 }
0x119f   :  { %v2059_v45 = vpop.permute.xlu1 %2058 }
0x11a0   :  { %v2064_v13 = vsel %vm374_vm15, %v2059_v45, 0 }
0x11a1   :  { %2073 = vmatpush.bf16.msra.mxu2 %v2064_v13 }
0x11a7   :  { %v2165_v33 = vpop.permute.xlu1 %2164 }
0x11a8   :  { %v2170_v19 = vsel %vm213_vm14, %v2165_v33, 0 }
0x11a9   :  { %2179 = vmatpush.bf16.xpose.msrb.mxu2 %v2170_v19 }
0x11aa   :  { %2041 = vadd.xlane.f32.xlu1 %v2040_v35 }
0x11c3   :  { %2231 = vrot.lane.b32.xlu1 %v4054_v61, %s3459_s24 }
0x11d2   :  { %v2021_v46 = vpop.xlane.xlu1 %2020  ;;  %v2036_v27 = vpop.xlane.xlu0 %2035 }
0x11d3   :  { %v2025_v38 = vsub.f32 %v2009_v59, %v2021_v46  ;;  %3384 = vrcp.f32 %v2036_v27 }
0x11d5   :  { %v2032_v39 = vmul.f32 1.442695, %v2025_v38 }
0x11d7   :  { %3386 = vpow2.f32 %v2032_v39 }
0x11d9   :  { %v3385_v41 = vpop.eup %3384 }
0x11da   :  { %v2050_v44 = vmul.f32 %v3385_v41, %v3379_v28  ;;  %v2039_v47 = vpop.xlane.xlu1 %2038 }
0x11db   :  { %3388 = vrcp.f32 %v2039_v47 }
0x11dc   :  { %v2054_v48 = vpack.c.bf16 %v2050_v44, %v2050_v44 }
0x11dd   :  { %v3387_v53 = vpop.eup %3386 }
0x11de   :  { %3172 = vmatmul.msk.bf16.vlgmr.msra.gmra.mxu2 %vm213_vm14, %v2054_v48  ;;  %v2043_v54 = vsel %vm213_vm14, %v3387_v53, 0.0 }
0x11df   :  { %2044 = vadd.xlane.f32.xlu2 %v2043_v54 }
0x11e1   :  { %v3389_v55 = vpop.eup %3388 }
0x11e2   :  { %v2051_v58 = vmul.f32 %v3389_v55, %v3381_v18 }
0x11e4   :  { %v2055_v51 = vpack.c.bf16 %v2051_v58, %v2051_v58 }
0x11e5   :  { %v2101_v50 = vpop.permute.xlu0 %2100 }
0x11e6   :  { %v2106_v25 = vsel %vm374_vm15, %v2101_v50, 0  ;;  %3173 = vmatmul.msk.bf16.vlgmr.msra.gmra.mxu3 %vm213_vm14, %v2055_v51 }
0x11e7   :  { %2115 = vmatpush.bf16.msra.mxu0 %v2106_v25 }
0x11ed   :  { %v2122_v62 = vpop.permute.xlu0 %2121 }
0x11ee   :  { %v2127_v63 = vsel %vm374_vm15, %v2122_v62, 0 }
0x11ef   :  { %2136 = vmatpush.bf16.msra.mxu1 %v2127_v63 }
0x11f2   :  { %v2163_v0 = vpop.permute.xlu1 %2162 }
0x11f3   :  { %3176 = vmatmul.msk.bf16.vlgmr.msrb.gmra.mxu2 %vm213_vm14, %v2163_v0 }
0x11f5   :  { %v2211_v3 = vpop.permute.xlu0 %2210 }
0x11f6   :  { %v2216_v42 = vsel %vm213_vm14, %v2211_v3, 0  ;;  %3177 = vmatmul.msk.bf16.vlgmr.msrb.gmra.mxu3 %vm213_vm14, %v2186_v43 }
0x11f7   :  { %2225 = vmatpush.bf16.xpose.msrb.mxu0 %v2216_v42 }
0x11fd   :  { %v2234_v21 = vpop.permute.xlu0 %2233 }
0x11fe   :  { %v2239_v4 = vsel %vm213_vm14, %v2234_v21, 0 }
0x11ff   :  { %2248 = vmatpush.bf16.xpose.msrb.mxu1 %v2239_v4 }
0x1205   :  { %v2209_v57 = vpop.permute.xlu0 %2208 }
0x121d   :  { %v2042_v22 = vpop.xlane.xlu1 %2041 }
0x121e   :  { %3390 = vrcp.f32 %v2042_v22 }
0x1224   :  { %v3391_v52 = vpop.eup %3390 }
0x1225   :  { %v2052_v5 = vmul.f32 %v3391_v52, %v3383_v34 }
0x1227   :  { %v2056_v6 = vpack.c.bf16 %v2052_v5, %v2052_v5 }
0x1229   :  { %3174 = vmatmul.msk.bf16.vlgmr.msra.gmra.mxu0 %vm213_vm14, %v2056_v6 }
0x1235   :  { %v2232_v11 = vpop.permute.xlu1 %2231 }
0x1239   :  { %3178 = vmatmul.msk.bf16.vlgmr.msrb.gmra.mxu0 %vm213_vm14, %v2209_v57 }
0x1252   :  { %v2045_v59 = vpop.xlane.xlu2 %2044 }
0x1253   :  { %3392 = vrcp.f32 %v2045_v59 }
0x1259   :  { %v3393_v7 = vpop.eup %3392 }
0x125a   :  { %v2053_v28 = vmul.f32 %v3393_v7, %v3387_v53 }
0x125c   :  { %v2057_v9 = vpack.c.bf16 %v2053_v28, %v2053_v28 }
0x125e   :  { %3175 = vmatmul.msk.bf16.vlgmr.msra.gmra.mxu1 %vm213_vm14, %v2057_v9 }
0x1261   :  { %v4171_v60 = vpop.f32.mrf.mxu2 }
0x1269   :  { %v2077_v56 = vpop.f32.mrf.mxu2  ;;  %v4173_v10 = vpop.f32.mrf.mxu3 }
0x126e   :  { %3179 = vmatmul.msk.bf16.vlgmr.msrb.gmra.mxu1 %vm213_vm14, %v2232_v11 }
0x1271   :  { %v2098_v12 = vpop.f32.mrf.mxu3 }
0x1276   :  { %v2181_v17 = vpop.f32.mrf.mxu2 }
0x1277   :  { %v2254_v18 = vmul.f32 0.35355338, %v2181_v17 }
0x1279   :  { %v2258_v20 = vadd.f32 %v2254_v18, %v3636_v15  ;;  %v2204_v30 = vpop.f32.mrf.mxu3 }
0x127a   :  { %v2255_v26 = vmul.f32 0.35355338, %v2204_v30 }
0x127b   :  { %v2262_v37 = vsel %vm213_vm14, %v2258_v20, -inf }
0x127c   :  { %v2259_v45 = vadd.f32 %v2255_v26, %v3632_v8  ;;  %2263 = vmax.xlane.f32.xlu2 %v2262_v37 }
0x127e   :  { %v2183_v13 = vpop.f32.mrf.mxu2  ;;  %v2265_v34 = vsel %vm213_vm14, %v2259_v45, -inf }
0x127f   :  { %2266 = vmax.xlane.f32.xlu0 %v2265_v34 }
0x1281   :  { %v2206_v33 = vpop.f32.mrf.mxu3 }
0x1293   :  { %2331 = vrot.lane.b32.xlu0 %v4046_v40, %s3460_s25 }
0x12a6   :  { %v4182_v19 = vpop.f32.mrf.mxu0 }
0x12ae   :  { %v2119_v35 = vpop.f32.mrf.mxu0 }
0x12b6   :  { %v2227_v46 = vpop.f32.mrf.mxu0 }
0x12b7   :  { %v2256_v27 = vmul.f32 0.35355338, %v2227_v46 }
0x12b9   :  { %v2260_v38 = vadd.f32 %v2256_v27, %v3640_v23 }
0x12bb   :  { %v2268_v39 = vsel %vm213_vm14, %v2260_v38, -inf }
0x12bc   :  { %2269 = vmax.xlane.f32.xlu2 %v2268_v39 }
0x12be   :  { %v2229_v41 = vpop.f32.mrf.mxu0 }
0x12db   :  { %v4186_v44 = vpop.f32.mrf.mxu1 }
0x12e3   :  { %v2140_v47 = vpop.f32.mrf.mxu1 }
0x12eb   :  { %v2250_v48 = vpop.f32.mrf.mxu1 }
0x12ec   :  { %v2257_v53 = vmul.f32 0.35355338, %v2250_v48 }
0x12ee   :  { %v2261_v54 = vadd.f32 %v2257_v53, %v3644_v36 }
0x12ef   :  { %v2264_v62 = vpop.xlane.xlu2 %2263 }
0x12f0   :  { %v2271_v55 = vsel %vm213_vm14, %v2261_v54, -inf  ;;  %v2274_v0 = vsub.f32 %v2258_v20, %v2264_v62 }
0x12f1   :  { %2272 = vmax.xlane.f32.xlu2 %v2271_v55 }
0x12f2   :  { %v2267_v51 = vpop.xlane.xlu0 %2266  ;;  %v2278_v21 = vmul.f32 1.442695, %v2274_v0 }
0x12f3   :  { %v2252_v58 = vpop.f32.mrf.mxu1  ;;  %v2275_v3 = vsub.f32 %v2259_v45, %v2267_v51 }
0x12f5   :  { %v2280_v4 = vmul.f32 1.442695, %v2275_v3 }
0x1305   :  { %v2332_v50 = vpop.permute.xlu0 %2331 }
0x1306   :  { %v2337_v25 = vsel %vm374_vm15, %v2332_v50, 0 }
0x1307   :  { %2346 = vmatpush.bf16.msra.mxu3 %v2337_v25 }
0x1309   :  { %2310 = vrot.lane.b32.xlu2 %v4040_v16, %s3460_s25 }
0x1311   :  { %2416 = vrot.lane.b32.xlu2 %v4040_v16, %s3462_s27 }
0x1319   :  { %2439 = vrot.lane.b32.xlu2 %v4046_v40, %s3462_s27 }
0x132f   :  { %v2270_v63 = vpop.xlane.xlu2 %2269 }
0x1330   :  { %v2276_v43 = vsub.f32 %v2260_v38, %v2270_v63 }
0x1332   :  { %v2282_v42 = vmul.f32 1.442695, %v2276_v43 }
0x1334   :  { %3394 = vpow2.f32 %v2282_v42 }
0x1335   :  { %3396 = vpow2.f32 %v2278_v21 }
0x1336   :  { %3398 = vpow2.f32 %v2280_v4 }
0x133a   :  { %v3395_v22 = vpop.eup %3394 }
0x133b   :  { %v2292_v52 = vsel %vm213_vm14, %v3395_v22, 0.0  ;;  %v3397_v5 = vpop.eup %3396 }
0x133c   :  { %2293 = vadd.xlane.f32.xlu1 %v2292_v52  ;;  %v3399_v6 = vpop.eup %3398  ;;  %v2286_v57 = vsel %vm213_vm14, %v3397_v5, 0.0 }
0x133d   :  { %v2289_v59 = vsel %vm213_vm14, %v3399_v6, 0.0 }
0x1342   :  { %2287 = vadd.xlane.f32.xlu2 %v2286_v57 }
0x1344   :  { %2290 = vadd.xlane.f32.xlu1 %v2289_v59 }
0x135a   :  { %2414 = vrot.lane.b32.xlu2 %v4040_v16, %s3461_s26 }
0x135d   :  { %2437 = vrot.lane.b32.xlu1 %v4046_v40, %s3461_s26 }
0x1362   :  { %2352 = vrot.lane.b32.xlu2 %v4050_v49, %s3460_s25 }
0x1364   :  { %v2273_v7 = vpop.xlane.xlu2 %2272 }
0x1365   :  { %v2277_v28 = vsub.f32 %v2261_v54, %v2273_v7  ;;  %2485 = vrot.lane.b32.xlu1 %v4054_v61, %s3462_s27 }
0x1367   :  { %v2284_v9 = vmul.f32 1.442695, %v2277_v28 }
0x1369   :  { %3400 = vpow2.f32 %v2284_v9 }
0x136a   :  { %2373 = vrot.lane.b32.xlu2 %v4054_v61, %s3460_s25 }
0x136c   :  { %v2311_v56 = vpop.permute.xlu2 %2310 }
0x136d   :  { %v2316_v11 = vsel %vm374_vm15, %v2311_v56, 0  ;;  %2483 = vrot.lane.b32.xlu1 %v4054_v61, %s3461_s26 }
0x136e   :  { %2325 = vmatpush.bf16.msra.mxu2 %v2316_v11 }
0x136f   :  { %v3401_v12 = vpop.eup %3400 }
0x1370   :  { %v2295_v17 = vsel %vm213_vm14, %v3401_v12, 0.0 }
0x1371   :  { %2296 = vadd.xlane.f32.xlu0 %v2295_v17 }
0x1372   :  { %2462 = vrot.lane.b32.xlu2 %v4050_v49, %s3462_s27 }
0x1374   :  { %v2417_v18 = vpop.permute.xlu2 %2416 }
0x1375   :  { %v2422_v20 = vsel %vm213_vm14, %v2417_v18, 0 }
0x1376   :  { %2431 = vmatpush.bf16.xpose.msrb.mxu2 %v2422_v20 }
0x137a   :  { %2460 = vrot.lane.b32.xlu2 %v4050_v49, %s3461_s26 }
0x137c   :  { %v2440_v30 = vpop.permute.xlu2 %2439 }
0x137d   :  { %v2445_v26 = vsel %vm213_vm14, %v2440_v30, 0 }
0x137e   :  { %2454 = vmatpush.bf16.xpose.msrb.mxu3 %v2445_v26 }
0x13af   :  { %v2294_v37 = vpop.xlane.xlu1 %2293 }
0x13b5   :  { %v2288_v45 = vpop.xlane.xlu2 %2287 }
0x13b6   :  { %3402 = vrcp.f32 %v2288_v45 }
0x13b7   :  { %v2291_v13 = vpop.xlane.xlu1 %2290 }
0x13b8   :  { %3404 = vrcp.f32 %v2291_v13 }
0x13b9   :  { %3406 = vrcp.f32 %v2294_v37 }
0x13bc   :  { %v3403_v34 = vpop.eup %3402 }
0x13bd   :  { %v2302_v33 = vmul.f32 %v3403_v34, %v3397_v5  ;;  %v2415_v35 = vpop.permute.xlu2 %2414 }
0x13be   :  { %v3405_v46 = vpop.eup %3404 }
0x13bf   :  { %v2306_v27 = vpack.c.bf16 %v2302_v33, %v2302_v33  ;;  %v2303_v38 = vmul.f32 %v3405_v46, %v3399_v6  ;;  %v3407_v39 = vpop.eup %3406 }
0x13c0   :  { %v2304_v47 = vmul.f32 %v3407_v39, %v3395_v22 }
0x13c1   :  { %v2307_v41 = vpack.c.bf16 %v2303_v38, %v2303_v38  ;;  %3180 = vmatmul.msk.bf16.vlgmr.msra.gmra.mxu2 %vm213_vm14, %v2306_v27 }
0x13c2   :  { %v2308_v54 = vpack.c.bf16 %v2304_v47, %v2304_v47 }
0x13c3   :  { %3181 = vmatmul.msk.bf16.vlgmr.msra.gmra.mxu3 %vm213_vm14, %v2307_v41 }
0x13c5   :  { %v2353_v48 = vpop.permute.xlu2 %2352 }
0x13c6   :  { %v2358_v53 = vsel %vm374_vm15, %v2353_v48, 0 }
0x13c7   :  { %2367 = vmatpush.bf16.msra.mxu0 %v2358_v53 }
0x13ca   :  { %3182 = vmatmul.msk.bf16.vlgmr.msra.gmra.mxu0 %vm213_vm14, %v2308_v54 }
0x13cd   :  { %v2374_v55 = vpop.permute.xlu2 %2373 }
0x13ce   :  { %v2379_v58 = vsel %vm374_vm15, %v2374_v55, 0 }
0x13cf   :  { %2388 = vmatpush.bf16.msra.mxu1 %v2379_v58  ;;  %v2438_v51 = vpop.permute.xlu1 %2437 }
0x13d1   :  { %3184 = vmatmul.msk.bf16.vlgmr.msrb.gmra.mxu2 %vm213_vm14, %v2415_v35 }
0x13d3   :  { %3185 = vmatmul.msk.bf16.vlgmr.msrb.gmra.mxu3 %vm213_vm14, %v2438_v51 }
0x13d5   :  { %v2463_v50 = vpop.permute.xlu2 %2462 }
0x13d6   :  { %v2468_v25 = vsel %vm213_vm14, %v2463_v50, 0 }
0x13d7   :  { %2477 = vmatpush.bf16.xpose.msrb.mxu0 %v2468_v25  ;;  %v2486_v62 = vpop.permute.xlu1 %2485 }
0x13d8   :  { %v2491_v63 = vsel %vm213_vm14, %v2486_v62, 0 }
0x13d9   :  { %2500 = vmatpush.bf16.xpose.msrb.mxu1 %v2491_v63 }
0x13dd   :  { %v2461_v0 = vpop.permute.xlu2 %2460 }
0x13de   :  { %3186 = vmatmul.msk.bf16.vlgmr.msrb.gmra.mxu0 %vm213_vm14, %v2461_v0 }
0x13df   :  { %v2484_v4 = vpop.permute.xlu1 %2483 }
0x13e4   :  { %v2297_v43 = vpop.xlane.xlu0 %2296 }
0x13e5   :  { %3408 = vrcp.f32 %v2297_v43 }
0x13eb   :  { %v3409_v3 = vpop.eup %3408 }
0x13ec   :  { %v2305_v42 = vmul.f32 %v3409_v3, %v3401_v12 }
0x13ee   :  { %v2309_v21 = vpack.c.bf16 %v2305_v42, %v2305_v42 }
0x13f0   :  { %3183 = vmatmul.msk.bf16.vlgmr.msra.gmra.mxu1 %vm213_vm14, %v2309_v21 }
0x1400   :  { %3187 = vmatmul.msk.bf16.vlgmr.msrb.gmra.mxu1 %vm213_vm14, %v2484_v4 }
0x1444   :  { %v2327_v22 = vpop.f32.mrf.mxu2 }
0x1446   :  { %v4232_v52 = vpop.f32.mrf.mxu3 }
0x1447   :  { %v4234_v5 = vpop.f32.mrf.mxu0 }
0x144c   :  { %v2329_v6 = vpop.f32.mrf.mxu2 }
0x144e   :  { %v2350_v57 = vpop.f32.mrf.mxu3 }
0x144f   :  { %v2371_v59 = vpop.f32.mrf.mxu0 }
0x1454   :  { %v2433_v7 = vpop.f32.mrf.mxu2 }
0x1455   :  { %v2506_v28 = vmul.f32 0.35355338, %v2433_v7 }
0x1456   :  { %v2456_v9 = vpop.f32.mrf.mxu3 }
0x1457   :  { %v2510_v56 = vadd.f32 %v2506_v28, %v3636_v15  ;;  %v2507_v11 = vmul.f32 0.35355338, %v2456_v9 }
0x1459   :  { %v2511_v12 = vadd.f32 %v2507_v11, %v3632_v8  ;;  %v2514_v17 = vsel %vm213_vm14, %v2510_v56, -inf }
0x145a   :  { %2515 = vmax.xlane.f32.xlu0 %v2514_v17 }
0x145b   :  { %v2479_v18 = vpop.f32.mrf.mxu0  ;;  %v2517_v20 = vsel %vm213_vm14, %v2511_v12, -inf }
0x145c   :  { %v2508_v30 = vmul.f32 0.35355338, %v2479_v18  ;;  %v2435_v26 = vpop.f32.mrf.mxu2  ;;  %2518 = vmax.xlane.f32.xlu2 %v2517_v20 }
0x145e   :  { %v2512_v37 = vadd.f32 %v2508_v30, %v3640_v23  ;;  %v2458_v45 = vpop.f32.mrf.mxu3 }
0x1460   :  { %v2520_v13 = vsel %vm213_vm14, %v2512_v37, -inf }
0x1461   :  { %2521 = vmax.xlane.f32.xlu1 %v2520_v13 }
0x1463   :  { %v2481_v34 = vpop.f32.mrf.mxu0 }
0x146d   :  { %v4242_v15 = vpop.f32.mrf.mxu1 }
0x1474   :  { %2583 = vrot.lane.b32.xlu2 %v4046_v40, %s3463_s28 }
0x1475   :  { %v2392_v8 = vpop.f32.mrf.mxu1 }
0x147c   :  { %2625 = vrot.lane.b32.xlu2 %v4054_v61, %s3463_s28 }
0x147d   :  { %v2502_v33 = vpop.f32.mrf.mxu1 }
0x147e   :  { %v2509_v35 = vmul.f32 0.35355338, %v2502_v33 }
0x1480   :  { %v2513_v46 = vadd.f32 %v2509_v35, %v3644_v36 }
0x1482   :  { %v2523_v23 = vsel %vm213_vm14, %v2513_v46, -inf }
0x1483   :  { %2524 = vmax.xlane.f32.xlu0 %v2523_v23 }
0x1484   :  { %2146 = vrot.lane.b32.xlu2 %v4171_v60, %s3464_s0 }
0x1485   :  { %v2504_v27 = vpop.f32.mrf.mxu1 }
0x1486   :  { %v3451_v27 = vld [vmem:[%s4449_s5 + $0x3] ss:$0 sm:$0xff] }
0x148c   :  { %2398 = vrot.lane.b32.xlu2 %v2327_v22, %s3465_s29 }
0x14cd   :  { %v2516_v38 = vpop.xlane.xlu0 %2515 }
0x14ce   :  { %v2526_v39 = vsub.f32 %v2510_v56, %v2516_v38 }
0x14cf   :  { %v2519_v40 = vpop.xlane.xlu2 %2518 }
0x14d0   :  { %v2530_v41 = vmul.f32 1.442695, %v2526_v39  ;;  %v2527_v47 = vsub.f32 %v2511_v12, %v2519_v40 }
0x14d2   :  { %3410 = vpow2.f32 %v2530_v41  ;;  %v2532_v61 = vmul.f32 1.442695, %v2527_v47 }
0x14d4   :  { %v2522_v48 = vpop.xlane.xlu1 %2521  ;;  %3412 = vpow2.f32 %v2532_v61 }
0x14d5   :  { %v2528_v53 = vsub.f32 %v2512_v37, %v2522_v48 }
0x14d7   :  { %v2534_v54 = vmul.f32 1.442695, %v2528_v53  ;;  %v2584_v36 = vpop.permute.xlu2 %2583 }
0x14d8   :  { %v3411_v55 = vpop.eup %3410  ;;  %v2589_v58 = vsel %vm374_vm15, %v2584_v36, 0 }
0x14d9   :  { %3414 = vpow2.f32 %v2534_v54  ;;  %2598 = vmatpush.bf16.msra.mxu3 %v2589_v58  ;;  %v2538_v60 = vsel %vm213_vm14, %v3411_v55, 0.0 }
0x14da   :  { %2539 = vadd.xlane.f32.xlu0 %v2538_v60  ;;  %v3413_v51 = vpop.eup %3412 }
0x14db   :  { %v2541_v0 = vsel %vm213_vm14, %v3413_v51, 0.0 }
0x14df   :  { %v3415_v50 = vpop.eup %3414  ;;  %v2626_v25 = vpop.permute.xlu2 %2625 }
0x14e0   :  { %v2631_v62 = vsel %vm374_vm15, %v2626_v25, 0  ;;  %v2544_v63 = vsel %vm213_vm14, %v3415_v50, 0.0 }
0x14e1   :  { %2545 = vadd.xlane.f32.xlu1 %v2544_v63  ;;  %2640 = vmatpush.bf16.msra.mxu1 %v2631_v62 }
0x14e2   :  { %2542 = vadd.xlane.f32.xlu0 %v2541_v0 }
0x14e7   :  { %v2147_v43 = vpop.permute.xlu2 %2146 }
0x14e8   :  { %2158 = vst.msk [vmem:[#allocation2] sm:$0xff] %vm706_vm1, %v2147_v43 }
0x14ef   :  { %v2399_v3 = vpop.permute.xlu2 %2398 }
0x14f0   :  { %2410 = vst.msk [vmem:[#allocation2] sm:$0xff] %vm959_vm2, %v2399_v3 }
0x14f6   :  { %2562 = vrot.lane.b32.xlu0 %v4040_v16, %s3463_s28  ;;  %v2525_v42 = vpop.xlane.xlu0 %2524 }
0x14f7   :  { %v2529_v21 = vsub.f32 %v2513_v46, %v2525_v42 }
0x14f9   :  { %v2536_v4 = vmul.f32 1.442695, %v2529_v21 }
0x14fa   :  { %2604 = vrot.lane.b32.xlu1 %v4050_v49, %s3463_s28 }
0x14fb   :  { %3416 = vpow2.f32 %v2536_v4 }
0x1501   :  { %v3417_v16 = vpop.eup %3416 }
0x1502   :  { %2148 = vrot.lane.b32.xlu1 %v4173_v10, %s3464_s0  ;;  %v2547_v22 = vsel %vm213_vm14, %v3417_v16, 0.0 }
0x150a   :  { %2400 = vrot.lane.b32.xlu1 %v4232_v52, %s3465_s29 }
0x1512   :  { %2674 = vrot.lane.b32.xlu1 %v4005_v29, %s3466_s30 }
0x151a   :  { %2150 = vrot.lane.b32.xlu1 %v4182_v19, %s3464_s0 }
0x1520   :  { %2548 = vadd.xlane.f32.xlu0 %v2547_v22 }
0x1522   :  { %2402 = vrot.lane.b32.xlu1 %v4234_v5, %s3465_s29 }
0x154d   :  { %v2540_v49 = vpop.xlane.xlu0 %2539 }
0x1554   :  { %v2546_v57 = vpop.xlane.xlu1 %2545 }
0x1555   :  { %v2543_v10 = vpop.xlane.xlu0 %2542 }
0x1556   :  { %3418 = vrcp.f32 %v2543_v10 }
0x1557   :  { %3420 = vrcp.f32 %v2540_v49 }
0x1558   :  { %3422 = vrcp.f32 %v2546_v57 }
0x155c   :  { %v3419_v52 = vpop.eup %3418 }
0x155d   :  { %v2555_v6 = vmul.f32 %v3419_v52, %v3413_v51  ;;  %v3421_v29 = vpop.eup %3420 }
0x155e   :  { %v2554_v19 = vmul.f32 %v3421_v29, %v3411_v55  ;;  %v3423_v7 = vpop.eup %3422 }
0x155f   :  { %v2559_v59 = vpack.c.bf16 %v2555_v6, %v2555_v6  ;;  %v2556_v5 = vmul.f32 %v3423_v7, %v3415_v50 }
0x1560   :  { %v2558_v56 = vpack.c.bf16 %v2554_v19, %v2554_v19 }
0x1561   :  { %3189 = vmatmul.msk.bf16.vlgmr.msra.gmra.mxu3 %vm213_vm14, %v2559_v59  ;;  %v2560_v17 = vpack.c.bf16 %v2556_v5, %v2556_v5 }
0x1568   :  { %v2563_v28 = vpop.permute.xlu0 %2562 }
0x1569   :  { %v2568_v9 = vsel %vm374_vm15, %v2563_v28, 0 }
0x156a   :  { %2577 = vmatpush.bf16.msra.mxu2 %v2568_v9 }
0x156c   :  { %v2605_v11 = vpop.permute.xlu1 %2604 }
0x156d   :  { %v2610_v12 = vsel %vm374_vm15, %v2605_v11, 0  ;;  %3188 = vmatmul.msk.bf16.vlgmr.msra.gmra.mxu2 %vm213_vm14, %v2558_v56 }
0x156e   :  { %2619 = vmatpush.bf16.msra.mxu0 %v2610_v12 }
0x1571   :  { %3190 = vmatmul.msk.bf16.vlgmr.msra.gmra.mxu0 %vm213_vm14, %v2560_v17 }
0x1574   :  { %v2149_v18 = vpop.permute.xlu1 %2148 }
0x1575   :  { %2159 = vst.msk [vmem:[#allocation2 + $0x8] sm:$0xff] %vm706_vm1, %v2149_v18 }
0x157c   :  { %v2401_v20 = vpop.permute.xlu1 %2400 }
0x157d   :  { %2411 = vst.msk [vmem:[#allocation2 + $0x8] sm:$0xff] %vm959_vm2, %v2401_v20 }
0x1584   :  { %v2675_v30 = vpop.permute.xlu1 %2674 }
0x1585   :  { %2693 = vmatpush.bf16.msrb.mxu2 %v2675_v30 }
0x158c   :  { %v2151_v26 = vpop.permute.xlu1 %2150 }
0x158d   :  { %2160 = vst.msk [vmem:[#allocation2 + $0x10] sm:$0xff] %vm706_vm1, %v2151_v26 }
0x1593   :  { %v2549_v37 = vpop.xlane.xlu0 %2548 }
0x1594   :  { %3424 = vrcp.f32 %v2549_v37  ;;  %v2403_v45 = vpop.permute.xlu1 %2402 }
0x1595   :  { %2412 = vst.msk [vmem:[#allocation2 + $0x10] sm:$0xff] %vm959_vm2, %v2403_v45 }
0x159a   :  { %v3425_v13 = vpop.eup %3424 }
0x159b   :  { %v2557_v34 = vmul.f32 %v3425_v13, %v3417_v16  ;;  %v3200_v13 = vld [vmem:[%s4450_s3 + $0x34] sm:$0xf] }
0x159d   :  { %v2561_v8 = vpack.c.bf16 %v2557_v34, %v2557_v34  ;;  %v3233_v34 = vld [vmem:[%s4450_s3 + $0x38] sm:$0xf0] }
0x159f   :  { %3191 = vmatmul.msk.bf16.vlgmr.msra.gmra.mxu1 %vm213_vm14, %v2561_v8  ;;  %v3201_v8 = vor.u32 %v3233_v34, %v3200_v13 }
0x15a1   :  { %2841 = vmatpush.bf16.msrb.mxu3 %v3201_v8  ;;  %v3234_v8 = vld [vmem:[%s4452_s4 + $0x20] sm:$0xff] }
0x15e4   :  { %v2600_v33 = vpop.f32.mrf.mxu3 }
0x15e5   :  { %2652 = vrot.lane.b32.xlu0 %v2600_v33, %s3467_s7 }
0x15ec   :  { %v2602_v35 = vpop.f32.mrf.mxu3 }
0x15ed   :  { %2404 = vrot.lane.b32.xlu0 %v4242_v15, %s3465_s29 }
0x15ee   :  { %v2621_v46 = vpop.f32.mrf.mxu0 }
0x15f0   :  { %v2579_v23 = vpop.f32.mrf.mxu2 }
0x15f1   :  { %2650 = vrot.lane.b32.xlu2 %v2579_v23, %s3467_s7  ;;  %v3232_v23 = vld [vmem:[%s4450_s3 + $0x28] sm:$0xf0] }
0x15f5   :  { %2678 = vrot.lane.b32.xlu0 %v3451_v27, %s3466_s30 }
0x15f6   :  { %v2623_v38 = vpop.f32.mrf.mxu0 }
0x15f8   :  { %v2581_v39 = vpop.f32.mrf.mxu2 }
0x15f9   :  { %2672 = vrot.lane.b32.xlu2 %v4015_v31, %s3466_s30 }
0x1601   :  { %2152 = vrot.lane.b32.xlu2 %v4186_v44, %s3464_s0 }
0x1609   :  { %2654 = vrot.lane.b32.xlu2 %v2621_v46, %s3467_s7  ;;  %v3196_v46 = vld [vmem:[%s4450_s3 + $0x24] sm:$0xf] }
0x160a   :  { %v3197_v38 = vor.u32 %v3232_v23, %v3196_v46 }
0x160c   :  { %2842 = vmatpush.bf16.msrb.mxu3 %v3197_v38 }
0x161c   :  { %v2642_v15 = vpop.f32.mrf.mxu1 }
0x161d   :  { %2656 = vrot.lane.b32.xlu1 %v2642_v15, %s3467_s7 }
0x1624   :  { %v2644_v40 = vpop.f32.mrf.mxu1 }
0x164b   :  { %v2651_v41 = vpop.permute.xlu2 %2650 }
0x164c   :  { %2662 = vst.msk [vmem:[#allocation2] sm:$0xff] %vm1212_vm3, %v2651_v41 }
0x1653   :  { %v2673_v47 = vpop.permute.xlu2 %2672  ;;  %v2666_v53 = vld [vmem:[#allocation2] sm:$0xff] }
0x1654   :  { %2694 = vmatpush.bf16.msrb.mxu2 %v2673_v47 }
0x1657   :  { %v2653_v61 = vpop.permute.xlu0 %2652 }
0x1658   :  { %2663 = vst.msk [vmem:[#allocation2 + $0x8] sm:$0xff] %vm1212_vm3, %v2653_v61 }
0x165b   :  { %v2153_v48 = vpop.permute.xlu2 %2152 }
0x165c   :  { %2161 = vst.msk [vmem:[#allocation2 + $0x18] sm:$0xff] %vm706_vm1, %v2153_v48 }
0x165f   :  { %v2405_v31 = vpop.permute.xlu0 %2404  ;;  %v2667_v44 = vld [vmem:[#allocation2 + $0x8] sm:$0xff] }
0x1660   :  { %2413 = vst.msk [vmem:[#allocation2 + $0x18] sm:$0xff] %vm959_vm2, %v2405_v31  ;;  %v2670_v54 = vpack.c.bf16 %v2667_v44, %v2666_v53 }
0x1662   :  { %3192 = vmatmul.msk.bf16.vlgmr.msrb.gmra.mxu2 %vm30_vm0, %v2670_v54 }
0x1663   :  { %v2655_v36 = vpop.permute.xlu2 %2654 }
0x1664   :  { %2664 = vst.msk [vmem:[#allocation2 + $0x10] sm:$0xff] %vm1212_vm3, %v2655_v36 }
0x1667   :  { %v2679_v50 = vpop.permute.xlu0 %2678 }
0x166b   :  { %v2668_v58 = vld [vmem:[#allocation2 + $0x10] sm:$0xff] }
0x168f   :  { %v2657_v55 = vpop.permute.xlu1 %2656 }
0x1690   :  { %2665 = vst.msk [vmem:[#allocation2 + $0x18] sm:$0xff] %vm1212_vm3, %v2657_v55 }
0x1697   :  { %v2669_v60 = vld [vmem:[#allocation2 + $0x18] sm:$0xff] }
0x1698   :  { %v2671_v51 = vpack.c.bf16 %v2669_v60, %v2668_v58 }
0x169a   :  { %3193 = vmatmul.msk.bf16.gmra.mxu2 %vm30_vm0, %v2671_v51 }
0x16e5   :  { %v2696_v25 = vpop.f32.mrf.mxu2 }
0x16e6   :  { %v2697_v62 = vadd.f32 %v2696_v25, %v2679_v50 }
0x16e8   :  { %v2706_v63 = vadd.f32 %v2697_v62, %v4019_v1 }
0x16ea   :  { %v2710_v0 = vsel %vm30_vm0, %v2706_v63, 0.0 }
0x16eb   :  { %2711 = vadd.xlane.f32.xlu2 %v2710_v0 }
0x16ed   :  { %v2698_v43 = vpop.f32.mrf.mxu2 }
0x16ee   :  { %v2699_v3 = vadd.f32 %v2698_v43, %v2679_v50 }
0x16f0   :  { %v2707_v42 = vadd.f32 %v2699_v3, %v4021_v2 }
0x16f2   :  { %v2713_v21 = vsel %vm30_vm0, %v2707_v42, 0.0 }
0x16f3   :  { %2714 = vadd.xlane.f32.xlu1 %v2713_v21 }
0x171d   :  { %v2701_v4 = vpop.f32.mrf.mxu2 }
0x171e   :  { %v2702_v16 = vadd.f32 %v2701_v4, %v2679_v50 }
0x1720   :  { %v2708_v22 = vadd.f32 %v2702_v16, %v4030_v24 }
0x1722   :  { %v2716_v49 = vsel %vm30_vm0, %v2708_v22, 0.0 }
0x1723   :  { %2717 = vadd.xlane.f32.xlu0 %v2716_v49 }
0x1725   :  { %v2703_v10 = vpop.f32.mrf.mxu2 }
0x1726   :  { %v2704_v52 = vadd.f32 %v2703_v10, %v2679_v50 }
0x1728   :  { %v2709_v1 = vadd.f32 %v2704_v52, %v4032_v32  ;;  %v4322_v32 = vld [vmem:[%s4449_s5 + $0x4] ss:$0 sm:$0xff] }
0x172a   :  { %v2719_v6 = vsel %vm30_vm0, %v2709_v1, 0.0 }
0x172b   :  { %2720 = vadd.xlane.f32.xlu2 %v2719_v6 }
0x175e   :  { %v2712_v57 = vpop.xlane.xlu2 %2711 }
0x175f   :  { %v2722_v2 = vmul.f32 %v2712_v57, %v3519_v14 }
0x1761   :  { %v2726_v59 = vsub.f32 %v2706_v63, %v2722_v2 }
0x1763   :  { %v2730_v29 = vmul.f32 %v2726_v59, %v2726_v59 }
0x1765   :  { %v2734_v19 = vsel %vm30_vm0, %v2730_v29, 0.0 }
0x1766   :  { %v2715_v7 = vpop.xlane.xlu1 %2714  ;;  %2735 = vadd.xlane.f32.xlu1 %v2734_v19 }
0x1767   :  { %v2723_v24 = vmul.f32 %v2715_v7, %v3519_v14 }
0x1769   :  { %v2727_v28 = vsub.f32 %v2707_v42, %v2723_v24 }
0x176b   :  { %v2731_v9 = vmul.f32 %v2727_v28, %v2727_v28 }
0x176d   :  { %v2737_v56 = vsel %vm30_vm0, %v2731_v9, 0.0 }
0x176e   :  { %2738 = vadd.xlane.f32.xlu2 %v2737_v56 }
0x1786   :  { %2805 = vrot.lane.b32.xlu2 %v4322_v32, %s3453_s17 }
0x1796   :  { %v2718_v5 = vpop.xlane.xlu0 %2717 }
0x1797   :  { %v2724_v11 = vmul.f32 %v2718_v5, %v3519_v14 }
0x1799   :  { %v4327_v12 = vsub.f32 %v2708_v22, %v2724_v11 }
0x179b   :  { %v2732_v17 = vmul.f32 %v4327_v12, %v4327_v12 }
0x179d   :  { %v2740_v18 = vsel %vm30_vm0, %v2732_v17, 0.0 }
0x179e   :  { %2741 = vadd.xlane.f32.xlu0 %v2740_v18  ;;  %v2721_v20 = vpop.xlane.xlu2 %2720 }
0x179f   :  { %v2725_v30 = vmul.f32 %v2721_v20, %v3519_v14 }
0x17a1   :  { %v4333_v26 = vsub.f32 %v2709_v1, %v2725_v30 }
0x17a3   :  { %v2733_v37 = vmul.f32 %v4333_v26, %v4333_v26 }
0x17a5   :  { %v2743_v45 = vsel %vm30_vm0, %v2733_v37, 0.0 }
0x17a6   :  { %2744 = vadd.xlane.f32.xlu1 %v2743_v45 }
0x17b2   :  { %2826 = vrot.lane.b32.xlu0 %v4322_v32, %s3454_s18 }
0x17d9   :  { %v2736_v33 = vpop.xlane.xlu1 %2735 }
0x17da   :  { %v2746_v35 = vmul.f32 %v2736_v33, %v3519_v14 }
0x17dc   :  { %v2750_v27 = vadd.f32 1e-12, %v2746_v35 }
0x17de   :  { %3426 = vrsqrt.f32 %v2750_v27  ;;  %vm2760_vm15 = vweird.f32 %v2750_v27 }
0x17e1   :  { %v2739_v39 = vpop.xlane.xlu2 %2738 }
0x17e2   :  { %v2747_v15 = vmul.f32 %v2739_v39, %v3519_v14 }
0x17e4   :  { %v3427_v40 = vpop.eup %3426  ;;  %v2751_v41 = vadd.f32 1e-12, %v2747_v15 }
0x17e5   :  { %v2755_v47 = vmul.f32 %v3427_v40, %v2750_v27  ;;  %vm2761_vm14 = vweird.f32 %v3427_v40 }
0x17e6   :  { %3428 = vrsqrt.f32 %v2751_v41  ;;  %vm2762_vm1 = vmor %vm2760_vm15, %vm2761_vm14  ;;  %vm2770_vm3 = vweird.f32 %v2751_v41 }
0x17e7   :  { %v2756_v61 = vmul.f32 %v3427_v40, %v2755_v47 }
0x17e9   :  { %v2757_v48 = vmul.f32 0.5, %v2756_v61  ;;  %v2806_v0 = vpop.permute.xlu2 %2805 }
0x17eb   :  { %v2758_v31 = vsub.f32 1.5, %v2757_v48 }
0x17ec   :  { %v3429_v53 = vpop.eup %3428 }
0x17ed   :  { %v2759_v44 = vmul.f32 %v3427_v40, %v2758_v31  ;;  %v2765_v54 = vmul.f32 %v3429_v53, %v2751_v41  ;;  %vm2771_vm2 = vweird.f32 %v3429_v53 }
0x17ee   :  { %vm2772_vm10 = vmor %vm2770_vm3, %vm2771_vm2 }
0x17ef   :  { %v2766_v36 = vmul.f32 %v3429_v53, %v2765_v54  ;;  %v2763_v55 = vsel %vm2762_vm1, %v3427_v40, %v2759_v44 }
0x17f0   :  { %v2794_v51 = vmul.f32 %v2763_v55, %v2726_v59 }
0x17f1   :  { %v2767_v58 = vmul.f32 0.5, %v2766_v36 }
0x17f2   :  { %v2801_v63 = vmul.f32 %v4322_v32, %v2794_v51 }
0x17f3   :  { %v2768_v60 = vsub.f32 1.5, %v2767_v58 }
0x17f4   :  { %v4356_v3 = vadd.f32 %v2806_v0, %v2801_v63 }
0x17f5   :  { %v2769_v50 = vmul.f32 %v3429_v53, %v2768_v60 }
0x17f7   :  { %v2773_v25 = vsel %vm2772_vm10, %v3429_v53, %v2769_v50 }
0x17f8   :  { %v2795_v62 = vmul.f32 %v2773_v25, %v2727_v28 }
0x17fa   :  { %v2802_v43 = vmul.f32 %v4322_v32, %v2795_v62 }
0x17fc   :  { %v4358_v42 = vadd.f32 %v2806_v0, %v2802_v43 }
0x17fe   :  { %v2812_v21 = vpack.c.bf16 %v4358_v42, %v4356_v3 }
0x1800   :  { %3202 = vmatmul.msk.bf16.vlgmr.msrb.gmra.mxu3 %vm30_vm0, %v2812_v21 }
0x1811   :  { %v2742_v4 = vpop.xlane.xlu0 %2741 }
0x1812   :  { %v2748_v16 = vmul.f32 %v2742_v4, %v3519_v14 }
0x1814   :  { %v2752_v22 = vadd.f32 1e-12, %v2748_v16 }
0x1816   :  { %3430 = vrsqrt.f32 %v2752_v22  ;;  %vm2780_vm12 = vweird.f32 %v2752_v22 }
0x1819   :  { %v2745_v49 = vpop.xlane.xlu1 %2744 }
0x181a   :  { %v2749_v10 = vmul.f32 %v2745_v49, %v3519_v14 }
0x181c   :  { %v3431_v52 = vpop.eup %3430  ;;  %v2753_v1 = vadd.f32 1e-12, %v2749_v10 }
0x181d   :  { %v2775_v6 = vmul.f32 %v3431_v52, %v2752_v22  ;;  %vm2781_vm11 = vweird.f32 %v3431_v52 }
0x181e   :  { %3432 = vrsqrt.f32 %v2753_v1  ;;  %vm2782_vm13 = vmor %vm2780_vm12, %vm2781_vm11  ;;  %vm2790_vm5 = vweird.f32 %v2753_v1 }
0x181f   :  { %v2776_v57 = vmul.f32 %v3431_v52, %v2775_v6 }
0x1821   :  { %v2777_v2 = vmul.f32 0.5, %v2776_v57 }
0x1823   :  { %v2778_v59 = vsub.f32 1.5, %v2777_v2 }
0x1824   :  { %v3433_v29 = vpop.eup %3432  ;;  %v2827_v34 = vpop.permute.xlu0 %2826 }
0x1825   :  { %v2779_v19 = vmul.f32 %v3431_v52, %v2778_v59  ;;  %v2785_v7 = vmul.f32 %v3433_v29, %v2753_v1  ;;  %vm2791_vm4 = vweird.f32 %v3433_v29 }
0x1826   :  { %vm2792_vm7 = vmor %vm2790_vm5, %vm2791_vm4 }
0x1827   :  { %v2786_v24 = vmul.f32 %v3433_v29, %v2785_v7  ;;  %v2783_v28 = vsel %vm2782_vm13, %v3431_v52, %v2779_v19  ;;  %vm3050_vm13 = vcmask 253952  }
0x1828   :  { %v2796_v5 = vmul.f32 %v2783_v28, %v4327_v12  ;;  %v3237_v12 = vld [vmem:[%s4452_s4 + $0x38] sm:$0xff] }
0x1829   :  { %v2787_v9 = vmul.f32 0.5, %v2786_v24  ;;  %2929 = vmatpush.bf16.msrb.mxu0 %v3237_v12 }
0x182a   :  { %v2803_v20 = vmul.f32 %v4322_v32, %v2796_v5 }
0x182b   :  { %v2788_v56 = vsub.f32 1.5, %v2787_v9 }
0x182c   :  { %v4369_v37 = vadd.f32 %v2806_v0, %v2803_v20 }
0x182d   :  { %v2789_v11 = vmul.f32 %v3433_v29, %v2788_v56  ;;  %v3263_v56 = vld [vmem:[%s4449_s5 + $0x5] ss:$0 sm:$0xff] }
0x182f   :  { %v2793_v17 = vsel %vm2792_vm7, %v3433_v29, %v2789_v11 }
0x1830   :  { %v2797_v18 = vmul.f32 %v2793_v17, %v4333_v26  ;;  %v3236_v26 = vld [vmem:[%s4452_s4 + $0x30] sm:$0xff] }
0x1831   :  { %2930 = vmatpush.bf16.msrb.mxu0 %v3236_v26 }
0x1832   :  { %v2804_v30 = vmul.f32 %v4322_v32, %v2797_v18  ;;  %v3235_v32 = vld [vmem:[%s4452_s4 + $0x28] sm:$0xff] }
0x1834   :  { %v4371_v45 = vadd.f32 %v2806_v0, %v2804_v30 }
0x1835   :  { %2931 = vmatpush.bf16.msrb.mxu0 %v3235_v32 }
0x1836   :  { %v2813_v13 = vpack.c.bf16 %v4371_v45, %v4369_v37 }
0x1838   :  { %3203 = vmatmul.msk.bf16.gmra.mxu3 %vm30_vm0, %v2813_v13 }
0x1839   :  { %2932 = vmatpush.bf16.msrb.mxu0 %v3234_v8 }
0x1883   :  { %v2844_v33 = vpop.f32.mrf.mxu3 }
0x1884   :  { %v2845_v35 = vadd.f32 %v2844_v33, %v2827_v34 }
0x1886   :  { %v2858_v46 = vmul.f32 0.044715, %v2845_v35  ;;  %v2854_v36 = vmul.f32 0.5, %v2845_v35 }
0x1888   :  { %v2862_v23 = vmul.f32 %v2858_v46, %v2845_v35 }
0x188a   :  { %v2866_v27 = vmul.f32 %v2862_v23, %v2845_v35 }
0x188b   :  { %v2846_v38 = vpop.f32.mrf.mxu3 }
0x188c   :  { %v2870_v39 = vadd.f32 %v2866_v27, %v2845_v35  ;;  %v2847_v15 = vadd.f32 %v2846_v38, %v2827_v34 }
0x188e   :  { %v2859_v40 = vmul.f32 0.044715, %v2847_v15  ;;  %v2874_v41 = vmul.f32 0.7978846, %v2870_v39  ;;  %v2855_v55 = vmul.f32 0.5, %v2847_v15 }
0x1890   :  { %v2863_v47 = vmul.f32 %v2859_v40, %v2847_v15  ;;  %3434 = vtanh.f32 %v2874_v41 }
0x1892   :  { %v2867_v61 = vmul.f32 %v2863_v47, %v2847_v15 }
0x1894   :  { %v2871_v48 = vadd.f32 %v2867_v61, %v2847_v15 }
0x1896   :  { %v2875_v31 = vmul.f32 0.7978846, %v2871_v48  ;;  %v3435_v53 = vpop.eup %3434 }
0x1897   :  { %v2882_v44 = vadd.f32 1.0, %v3435_v53 }
0x1898   :  { %3436 = vtanh.f32 %v2875_v31 }
0x1899   :  { %v2886_v60 = vmul.f32 %v2882_v44, %v2854_v36 }
0x189e   :  { %v3437_v54 = vpop.eup %3436 }
0x189f   :  { %v2883_v58 = vadd.f32 1.0, %v3437_v54 }
0x18a1   :  { %v2887_v51 = vmul.f32 %v2883_v58, %v2855_v55 }
0x18a3   :  { %v2890_v50 = vpack.c.bf16 %v2887_v51, %v2886_v60 }
0x18a5   :  { %3220 = vmatmul.msk.bf16.vlgmr.msrb.gmra.mxu0 %vm1470_vm6, %v2890_v50 }
0x18bb   :  { %v2849_v25 = vpop.f32.mrf.mxu3 }
0x18bc   :  { %v2850_v62 = vadd.f32 %v2849_v25, %v2827_v34 }
0x18be   :  { %v2860_v63 = vmul.f32 0.044715, %v2850_v62  ;;  %v2856_v29 = vmul.f32 0.5, %v2850_v62 }
0x18c0   :  { %v2864_v0 = vmul.f32 %v2860_v63, %v2850_v62 }
0x18c2   :  { %v2868_v43 = vmul.f32 %v2864_v0, %v2850_v62 }
0x18c3   :  { %v2851_v21 = vpop.f32.mrf.mxu3 }
0x18c4   :  { %v2872_v4 = vadd.f32 %v2868_v43, %v2850_v62  ;;  %v2852_v16 = vadd.f32 %v2851_v21, %v2827_v34 }
0x18c6   :  { %v2861_v22 = vmul.f32 0.044715, %v2852_v16  ;;  %v2876_v49 = vmul.f32 0.7978846, %v2872_v4  ;;  %v2857_v19 = vmul.f32 0.5, %v2852_v16 }
0x18c8   :  { %v2865_v10 = vmul.f32 %v2861_v22, %v2852_v16  ;;  %3438 = vtanh.f32 %v2876_v49 }
0x18ca   :  { %v2869_v52 = vmul.f32 %v2865_v10, %v2852_v16 }
0x18cc   :  { %v2873_v1 = vadd.f32 %v2869_v52, %v2852_v16 }
0x18ce   :  { %v2877_v6 = vmul.f32 0.7978846, %v2873_v1  ;;  %v3439_v57 = vpop.eup %3438 }
0x18cf   :  { %v2884_v2 = vadd.f32 1.0, %v3439_v57 }
0x18d0   :  { %3440 = vtanh.f32 %v2877_v6 }
0x18d1   :  { %v2888_v24 = vmul.f32 %v2884_v2, %v2856_v29 }
0x18d6   :  { %v3441_v59 = vpop.eup %3440 }
0x18d7   :  { %v2885_v7 = vadd.f32 1.0, %v3441_v59 }
0x18d9   :  { %v2889_v28 = vmul.f32 %v2885_v7, %v2857_v19 }
0x18db   :  { %v2891_v9 = vpack.c.bf16 %v2889_v28, %v2888_v24 }
0x18dd   :  { %3221 = vmatmul.msk.bf16.gmra.mxu0 %vm1470_vm6, %v2891_v9 }
0x1922   :  { %v2934_v5 = vpop.f32.mrf.mxu0 }
0x1923   :  { %v2935_v11 = vadd.f32 %v3263_v56, %v2934_v5 }
0x1925   :  { %v2944_v17 = vadd.f32 %v2935_v11, %v4356_v3 }
0x1927   :  { %v2948_v18 = vsel %vm30_vm0, %v2944_v17, 0.0 }
0x1928   :  { %2949 = vadd.xlane.f32.xlu1 %v2948_v18 }
0x192a   :  { %v2936_v20 = vpop.f32.mrf.mxu0 }
0x192b   :  { %v2937_v30 = vadd.f32 %v3263_v56, %v2936_v20 }
0x192d   :  { %v2945_v13 = vadd.f32 %v2937_v30, %v4358_v42 }
0x192f   :  { %v2951_v12 = vsel %vm30_vm0, %v2945_v13, 0.0 }
0x1930   :  { %2952 = vadd.xlane.f32.xlu1 %v2951_v12 }
0x195a   :  { %v2939_v26 = vpop.f32.mrf.mxu0 }
0x195b   :  { %v2940_v32 = vadd.f32 %v3263_v56, %v2939_v26 }
0x195d   :  { %v2946_v34 = vadd.f32 %v2940_v32, %v4369_v37 }
0x195f   :  { %v2954_v8 = vsel %vm30_vm0, %v2946_v34, 0.0 }
0x1960   :  { %2955 = vadd.xlane.f32.xlu0 %v2954_v8 }
0x1962   :  { %v2941_v33 = vpop.f32.mrf.mxu0 }
0x1963   :  { %v2942_v35 = vadd.f32 %v3263_v56, %v2941_v33 }
0x1965   :  { %v2947_v3 = vadd.f32 %v2942_v35, %v4371_v45 }
0x1967   :  { %v2957_v46 = vsel %vm30_vm0, %v2947_v3, 0.0 }
0x1968   :  { %2958 = vadd.xlane.f32.xlu1 %v2957_v46 }
0x1974   :  { %3043 = vrot.lane.b32.xlu0 %v3263_v56, %s3454_s18 }
0x199b   :  { %v2950_v42 = vpop.xlane.xlu1 %2949 }
0x199c   :  { %v2960_v23 = vmul.f32 %v2950_v42, %v3519_v14 }
0x199e   :  { %v4403_v27 = vsub.f32 %v2944_v17, %v2960_v23 }
0x19a0   :  { %v2968_v37 = vmul.f32 %v4403_v27, %v4403_v27 }
0x19a2   :  { %v2972_v38 = vsel %vm30_vm0, %v2968_v37, 0.0 }
0x19a3   :  { %2973 = vadd.xlane.f32.xlu2 %v2972_v38  ;;  %v2953_v39 = vpop.xlane.xlu1 %2952 }
0x19a4   :  { %v2961_v15 = vmul.f32 %v2953_v39, %v3519_v14 }
0x19a6   :  { %v4409_v45 = vsub.f32 %v2945_v13, %v2961_v15 }
0x19a8   :  { %v2969_v40 = vmul.f32 %v4409_v45, %v4409_v45 }
0x19aa   :  { %v2975_v41 = vsel %vm30_vm0, %v2969_v40, 0.0 }
0x19ab   :  { %2976 = vadd.xlane.f32.xlu1 %v2975_v41 }
0x19d3   :  { %v2956_v47 = vpop.xlane.xlu0 %2955 }
0x19d4   :  { %v2962_v61 = vmul.f32 %v2956_v47, %v3519_v14 }
0x19d6   :  { %v4415_v48 = vsub.f32 %v2946_v34, %v2962_v61 }
0x19d8   :  { %v2970_v31 = vmul.f32 %v4415_v48, %v4415_v48 }
0x19da   :  { %v2978_v53 = vsel %vm30_vm0, %v2970_v31, 0.0 }
0x19db   :  { %2979 = vadd.xlane.f32.xlu1 %v2978_v53  ;;  %v2959_v44 = vpop.xlane.xlu1 %2958 }
0x19dc   :  { %v2963_v54 = vmul.f32 %v2959_v44, %v3519_v14 }
0x19de   :  { %v4421_v36 = vsub.f32 %v2947_v3, %v2963_v54 }
0x19e0   :  { %v2971_v55 = vmul.f32 %v4421_v36, %v4421_v36 }
0x19e2   :  { %v2981_v58 = vsel %vm30_vm0, %v2971_v55, 0.0 }
0x19e3   :  { %2982 = vadd.xlane.f32.xlu1 %v2981_v58 }
0x19e6   :  { %v3044_v23 = vpop.permute.xlu0 %3043 }
0x19fc   :  { %3036 = vrot.lane.b32.xlu1 %v3263_v56, %s3453_s17 }
0x1a16   :  { %v2974_v60 = vpop.xlane.xlu2 %2973 }
0x1a17   :  { %v2984_v50 = vmul.f32 %v2974_v60, %v3519_v14 }
0x1a19   :  { %v2988_v62 = vadd.f32 1e-12, %v2984_v50 }
0x1a1b   :  { %3442 = vrsqrt.f32 %v2988_v62  ;;  %vm2998_vm6 = vweird.f32 %v2988_v62 }
0x1a1e   :  { %v2977_v51 = vpop.xlane.xlu1 %2976 }
0x1a1f   :  { %v2985_v25 = vmul.f32 %v2977_v51, %v3519_v14 }
0x1a21   :  { %v2989_v63 = vadd.f32 1e-12, %v2985_v25  ;;  %v3443_v4 = vpop.eup %3442 }
0x1a22   :  { %v2993_v22 = vmul.f32 %v3443_v4, %v2988_v62  ;;  %vm2999_vm0 = vweird.f32 %v3443_v4 }
0x1a23   :  { %3444 = vrsqrt.f32 %v2989_v63  ;;  %vm3000_vm14 = vmor %vm2998_vm6, %vm2999_vm0  ;;  %vm3008_vm15 = vweird.f32 %v2989_v63 }
0x1a24   :  { %v2994_v6 = vmul.f32 %v3443_v4, %v2993_v22 }
0x1a26   :  { %v2995_v19 = vmul.f32 0.5, %v2994_v6 }
0x1a28   :  { %v2996_v9 = vsub.f32 1.5, %v2995_v19 }
0x1a29   :  { %v3445_v16 = vpop.eup %3444 }
0x1a2a   :  { %v3003_v49 = vmul.f32 %v3445_v16, %v2989_v63  ;;  %v2997_v18 = vmul.f32 %v3443_v4, %v2996_v9  ;;  %vm3009_vm8 = vweird.f32 %v3445_v16 }
0x1a2b   :  { %vm3010_vm1 = vmor %vm3008_vm15, %vm3009_vm8 }
0x1a2c   :  { %v3004_v2 = vmul.f32 %v3445_v16, %v3003_v49  ;;  %v3001_v12 = vsel %vm3000_vm14, %v3443_v4, %v2997_v18 }
0x1a2d   :  { %v3032_v33 = vmul.f32 %v3001_v12, %v4403_v27 }
0x1a2e   :  { %v3005_v7 = vmul.f32 0.5, %v3004_v2 }
0x1a30   :  { %v3006_v56 = vsub.f32 1.5, %v3005_v7 }
0x1a4e   :  { %v2980_v0 = vpop.xlane.xlu1 %2979 }
0x1a4f   :  { %v2986_v43 = vmul.f32 %v2980_v0, %v3519_v14 }
0x1a51   :  { %v2990_v21 = vadd.f32 1e-12, %v2986_v43 }
0x1a53   :  { %3446 = vrsqrt.f32 %v2990_v21  ;;  %vm3018_vm2 = vweird.f32 %v2990_v21 }
0x1a56   :  { %v2983_v10 = vpop.xlane.xlu1 %2982 }
0x1a57   :  { %v2987_v52 = vmul.f32 %v2983_v10, %v3519_v14  ;;  %v3007_v14 = vmul.f32 %v3445_v16, %v3006_v56 }
0x1a59   :  { %v3447_v1 = vpop.eup %3446  ;;  %v2991_v57 = vadd.f32 1e-12, %v2987_v52  ;;  %v3011_v32 = vsel %vm3010_vm1, %v3445_v16, %v3007_v14 }
0x1a5a   :  { %v3013_v59 = vmul.f32 %v3447_v1, %v2990_v21  ;;  %vm3019_vm9 = vweird.f32 %v3447_v1  ;;  %v3033_v35 = vmul.f32 %v3011_v32, %v4409_v45 }
0x1a5b   :  { %3448 = vrsqrt.f32 %v2991_v57  ;;  %vm3020_vm10 = vmor %vm3018_vm2, %vm3019_vm9  ;;  %vm3028_vm11 = vweird.f32 %v2991_v57 }
0x1a5c   :  { %v3014_v29 = vmul.f32 %v3447_v1, %v3013_v59 }
0x1a5e   :  { %v3015_v24 = vmul.f32 0.5, %v3014_v29 }
0x1a60   :  { %v3016_v5 = vsub.f32 1.5, %v3015_v24 }
0x1a61   :  { %v3449_v28 = vpop.eup %3448 }
0x1a62   :  { %v3023_v11 = vmul.f32 %v3449_v28, %v2991_v57  ;;  %v3017_v20 = vmul.f32 %v3447_v1, %v3016_v5  ;;  %vm3029_vm3 = vweird.f32 %v3449_v28 }
0x1a63   :  { %vm3030_vm12 = vmor %vm3028_vm11, %vm3029_vm3 }
0x1a64   :  { %v3024_v17 = vmul.f32 %v3449_v28, %v3023_v11  ;;  %v3021_v34 = vsel %vm3020_vm10, %v3447_v1, %v3017_v20 }
0x1a65   :  { %v3034_v3 = vmul.f32 %v3021_v34, %v4415_v48 }
0x1a66   :  { %v3025_v30 = vmul.f32 0.5, %v3024_v17 }
0x1a68   :  { %v3026_v13 = vsub.f32 1.5, %v3025_v30 }
0x1a6a   :  { %v3027_v26 = vmul.f32 %v3449_v28, %v3026_v13 }
0x1a6c   :  { %v3031_v8 = vsel %vm3030_vm12, %v3449_v28, %v3027_v26 }
0x1a6d   :  { %v3035_v46 = vmul.f32 %v3031_v8, %v4421_v36 }
0x1a6e   :  { %v3037_v42 = vpop.permute.xlu1 %3036 }
0x1a6f   :  { %v3039_v37 = vmul.f32 %v3037_v42, %v3032_v33  ;;  %v3040_v38 = vmul.f32 %v3037_v42, %v3033_v35  ;;  %v3041_v39 = vmul.f32 %v3037_v42, %v3034_v3  ;;  %v3042_v15 = vmul.f32 %v3037_v42, %v3035_v46 }
0x1a71   :  { %v3046_v40 = vadd.f32 %v3044_v23, %v3039_v37  ;;  %v3047_v41 = vadd.f32 %v3044_v23, %v3040_v38  ;;  %v3048_v47 = vadd.f32 %v3044_v23, %v3041_v39  ;;  %v3049_v61 = vadd.f32 %v3044_v23, %v3042_v15 }
0x1a73   :  { %3051 = vst.msk [vmem:[%s4453_s6] sm:$0x1] %vm3050_vm13, %v3046_v40 }
0x1a74   :  { %3052 = vst.msk [vmem:[%s4453_s6 + $0x1] sm:$0x1] %vm3050_vm13, %v3047_v41 }
0x1a75   :  { %3053 = vst.msk [vmem:[%s4453_s6 + $0x2] sm:$0x1] %vm3050_vm13, %v3048_v47 }
0x1a76   :  { %3054 = vst.msk [vmem:[%s4453_s6 + $0x3] sm:$0x1] %vm3050_vm13, %v3049_v61 }

</bundles_post_ra>
